<compile_context>
chip_gen: v7x
topology: tpu7x:2x2x1
jax: 0.10.0
libtpu: 0.0.40
codegen_flags: <defaults>
</compile_context>

<pallas_src>
import jax
import jax.numpy as jnp
from jax.experimental import pallas as pl
from jax.experimental.pallas import tpu as pltpu


HIDDEN = 768  # fixed by the module: nn.Linear(768, 768), nn.Linear(768, 1)


def _round_up(x, m):
    return ((x + m - 1) // m) * m


def _rating_kernel(x_ref, w1_ref, b1_ref, w2_ref, b2_ref, o_ref):
    # x_ref:  (tm, 768)   bf16
    # w1_ref: (768, 768)  bf16   (pre-transposed: in x out)
    # b1_ref: (1, 768)    f32
    # w2_ref: (1, 768)    f32    (star_beta weight as a row)
    # b2_ref: (1,)        f32 scalar in SMEM
    # o_ref:  (tm, 1)     f32
    h = jnp.dot(x_ref[...], w1_ref[...], preferred_element_type=jnp.float32)
    h = jnp.tanh(h + b1_ref[...])                       # f32 epilogue (VPU/EUP)
    # Second linear has N=1 -> VPU mul + lane reduction instead of an MXU pass.
    out = jnp.sum(h * w2_ref[...], axis=-1, keepdims=True) + b2_ref[0]
    o_ref[...] = out.astype(o_ref.dtype)


def rating_prediction(x, w1, b1, w2, b2, *, tm=None):
    """x: (..., 768) f32.  w1:(768,768), b1:(768,), w2:(1,768), b2:(1,) (PyTorch layout).
    Returns (..., 1) f32, matching Rating_Prediction.forward."""
    lead_shape = x.shape[:-1]
    xm = x.reshape(-1, HIDDEN)
    M = xm.shape[0]

    if tm is None:
        # Fixed row tile: multiple of 256 (safe on v5e/v6e/v7x), capped for VMEM.
        tm = min(512, _round_up(max(M, 1), 256))
    tm = _round_up(tm, 256)

    M_pad = _round_up(M, tm)
    if M_pad != M:
        xm = jnp.pad(xm, ((0, M_pad - M), (0, 0)))
    grid = (M_pad // tm,)

    # bf16 operands for the MXU GEMM; accumulation is f32 inside the kernel.
    x_bf = xm.astype(jnp.bfloat16)
    w1_t = w1.T.astype(jnp.bfloat16)                 # (768, 768), in x out
    b1_r = b1.reshape(1, HIDDEN).astype(jnp.float32)
    w2_r = w2.reshape(1, HIDDEN).astype(jnp.float32)
    b2_r = b2.reshape(1).astype(jnp.float32)

    # VMEM budget: double-buffered x tiles + single-buffered weights + headroom.
    vmem_bytes = (2 * tm * HIDDEN * 2        # x tiles (bf16, double-buffered)
                  + HIDDEN * HIDDEN * 2      # w1 (bf16, single-buffered)
                  + 2 * HIDDEN * 4           # b1 + w2 rows
                  + 2 * tm * 4)              # output tiles
    vmem_limit = int(max(vmem_bytes + (8 << 20), 32 << 20))

    cost = pl.CostEstimate(
        flops=2 * M_pad * HIDDEN * HIDDEN + 3 * M_pad * HIDDEN,
        transcendentals=M_pad * HIDDEN,
        bytes_accessed=M_pad * HIDDEN * 2 + HIDDEN * HIDDEN * 2 + M_pad * 4,
    )

    resident = pl.Buffered(1)   # constant index maps -> no double buffering needed

    out = pl.pallas_call(
        _rating_kernel,
        out_shape=jax.ShapeDtypeStruct((M_pad, 1), jnp.float32),
        grid_spec=pltpu.PrefetchScalarGridSpec(
            num_scalar_prefetch=0,
            grid=grid,
            in_specs=[
                pl.BlockSpec((tm, HIDDEN), lambda i: (i, 0)),             # x tile
                pl.BlockSpec((HIDDEN, HIDDEN), lambda i: (0, 0),
                             pipeline_mode=resident),                     # w1^T (resident)
                pl.BlockSpec((1, HIDDEN), lambda i: (0, 0),
                             pipeline_mode=resident),                     # b1
                pl.BlockSpec((1, HIDDEN), lambda i: (0, 0),
                             pipeline_mode=resident),                     # w2 row
                pl.BlockSpec(memory_space=pltpu.MemorySpace.SMEM),        # b2 scalar
            ],
            out_specs=pl.BlockSpec((tm, 1), lambda i: (i, 0)),
        ),
        compiler_params=pltpu.CompilerParams(
            dimension_semantics=("parallel",),
            vmem_limit_bytes=vmem_limit,
        ),
        cost_estimate=cost,
    )(x_bf, w1_t, b1_r, w2_r, b2_r)

    out = out[:M]
    return out.reshape(*lead_shape, 1)


def init_params(key):
    """Deterministic synthetic params with PyTorch nn.Linear shapes."""
    k1, k2, k3, k4 = jax.random.split(key, 4)
    bound = 1.0 / jnp.sqrt(HIDDEN)
    w1 = jax.random.uniform(k1, (HIDDEN, HIDDEN), jnp.float32, -bound, bound)  # star_w.weight
    b1 = jax.random.uniform(k2, (HIDDEN,), jnp.float32, -bound, bound)          # star_w.bias
    w2 = jax.random.uniform(k3, (1, HIDDEN), jnp.float32, -bound, bound)        # star_beta.weight
    b2 = jax.random.uniform(k4, (1,), jnp.float32, -bound, bound)               # star_beta.bias
    return w1, b1, w2, b2


if __name__ == "__main__":
    key = jax.random.PRNGKey(0)
    kx, kp = jax.random.split(key)

    batch, seq = 2, 8
    x = jax.random.normal(kx, (batch, seq, HIDDEN), jnp.float32)
    w1, b1, w2, b2 = init_params(kp)

    # jit so the wrapper-side transpose/cast/pad are compiled together with the kernel
    # (avoids a hidden per-call XLA transpose of w1).
    fn = jax.jit(rating_prediction)
    out = jax.block_until_ready(fn(x, w1, b1, w2, b2))

    # Reference check (pure f32 JAX). Tolerance loosened vs. the f32 reference because
    # the GEMM intentionally uses bf16 operands (with f32 accumulation) for MXU speed.
    ref = jnp.tanh(x @ w1.T + b1) @ w2.T + b2
    assert out.shape == (batch, seq, 1)
    assert jnp.allclose(out, ref, atol=3e-2, rtol=3e-2), float(jnp.max(jnp.abs(out - ref)))

    print("KERNEL_OK")
</pallas_src>

<mosaic_0001>
module attributes {stable_mosaic.version = 11 : i64} {
  func.func @_rating_kernel(%arg0: i32, %arg1: memref<256x768xbf16, #tpu.memory_space<vmem>>, %arg2: memref<768x768xbf16, #tpu.memory_space<vmem>>, %arg3: memref<1x768xf32, #tpu.memory_space<vmem>>, %arg4: memref<1x768xf32, #tpu.memory_space<vmem>>, %arg5: memref<1xf32, #tpu.memory_space<smem>>, %arg6: memref<256x1xf32, #tpu.memory_space<vmem>>) attributes {dimension_semantics = [#tpu.dimension_semantics<parallel>], iteration_bounds = array<i64: 1>, scalar_prefetch = 0 : i64, scratch_operands = 0 : i64, tpu.core_type = #tpu.core_type<tc>, window_params = [{transform_indices = @transform_0, window_bounds = array<i64: 256, 768>}, {pipeline_mode = #tpu.pipeline_mode<synchronous>, transform_indices = @transform_1, window_bounds = array<i64: 768, 768>}, {pipeline_mode = #tpu.pipeline_mode<synchronous>, transform_indices = @transform_2, window_bounds = array<i64: 1, 768>}, {pipeline_mode = #tpu.pipeline_mode<synchronous>, transform_indices = @transform_3, window_bounds = array<i64: 1, 768>}, {transform_indices = @transform_4, window_bounds = array<i64: 1>}, {transform_indices = @transform_5, window_bounds = array<i64: 256, 1>}]} {
    %c0 = arith.constant 0 : index
    %c0_0 = arith.constant 0 : index
    %0 = vector.load %arg1[%c0, %c0_0] : memref<256x768xbf16, #tpu.memory_space<vmem>>, vector<256x768xbf16>
    %c0_1 = arith.constant 0 : index
    %c0_2 = arith.constant 0 : index
    %1 = vector.load %arg2[%c0_1, %c0_2] : memref<768x768xbf16, #tpu.memory_space<vmem>>, vector<768x768xbf16>
    %cst = arith.constant dense<0.000000e+00> : vector<256x768xf32>
    %2 = tpu.matmul %0, %1, %cst {dimension_numbers = #tpu.dot_dimension_numbers<[1], [0], [0], [1], [0, 0, 1, 1], [], []>} : vector<256x768xbf16>, vector<768x768xbf16>, vector<256x768xf32> -> vector<256x768xf32>
    %c0_3 = arith.constant 0 : index
    %c0_4 = arith.constant 0 : index
    %3 = vector.load %arg3[%c0_3, %c0_4] : memref<1x768xf32, #tpu.memory_space<vmem>>, vector<1x768xf32>
    %4 = vector.broadcast %3 : vector<1x768xf32> to vector<256x768xf32>
    %5 = arith.addf %2, %4 : vector<256x768xf32>
    %6 = math.tanh %5 : vector<256x768xf32>
    %c0_5 = arith.constant 0 : index
    %c0_6 = arith.constant 0 : index
    %7 = vector.load %arg4[%c0_5, %c0_6] : memref<1x768xf32, #tpu.memory_space<vmem>>, vector<1x768xf32>
    %8 = vector.broadcast %7 : vector<1x768xf32> to vector<256x768xf32>
    %9 = arith.mulf %6, %8 : vector<256x768xf32>
    %cst_7 = arith.constant dense<0.000000e+00> : vector<256xf32>
    %10 = vector.multi_reduction <add>, %9, %cst_7 [1] : vector<256x768xf32> to vector<256xf32>
    %11 = vector.shape_cast %10 : vector<256xf32> to vector<256x1xf32>
    %c0_8 = arith.constant 0 : index
    %12 = memref.load %arg5[%c0_8] : memref<1xf32, #tpu.memory_space<smem>>
    %13 = vector.broadcast %12 : f32 to vector<256x1xf32>
    %14 = arith.addf %11, %13 : vector<256x1xf32>
    %c0_9 = arith.constant 0 : index
    %c0_10 = arith.constant 0 : index
    %15 = vector.load %arg6[%c0_9, %c0_10] : memref<256x1xf32, #tpu.memory_space<vmem>>, vector<256x1xf32>
    tpu.vector_store %arg6[%c0_9, %c0_10], %14 {strides = array<i32>} : memref<256x1xf32, #tpu.memory_space<vmem>>, vector<256x1xf32>,
    return
  }
  func.func @transform_0(%arg0: i32) -> (i32, i32) {
    %c0_i32 = arith.constant 0 : i32
    %c0_i32_0 = arith.constant 0 : i32
    return %arg0, %c0_i32 : i32, i32
  }
  func.func @transform_1(%arg0: i32) -> (i32, i32) {
    %c0_i32 = arith.constant 0 : i32
    %c0_i32_0 = arith.constant 0 : i32
    %c0_i32_1 = arith.constant 0 : i32
    return %c0_i32, %c0_i32_0 : i32, i32
  }
  func.func @transform_2(%arg0: i32) -> (i32, i32) {
    %c0_i32 = arith.constant 0 : i32
    %c0_i32_0 = arith.constant 0 : i32
    %c0_i32_1 = arith.constant 0 : i32
    return %c0_i32, %c0_i32_0 : i32, i32
  }
  func.func @transform_3(%arg0: i32) -> (i32, i32) {
    %c0_i32 = arith.constant 0 : i32
    %c0_i32_0 = arith.constant 0 : i32
    %c0_i32_1 = arith.constant 0 : i32
    return %c0_i32, %c0_i32_0 : i32, i32
  }
  func.func @transform_4(%arg0: i32) -> i32 {
    %c0_i32 = arith.constant 0 : i32
    %c0_i32_0 = arith.constant 0 : i32
    return %c0_i32 : i32
  }
  func.func @transform_5(%arg0: i32) -> (i32, i32) {
    %c0_i32 = arith.constant 0 : i32
    %c0_i32_0 = arith.constant 0 : i32
    return %arg0, %c0_i32 : i32, i32
  }
}

</mosaic_0001>

<bundles_post_ra>
// kernel: rating_prediction.1
= control target key start
LH: loop header
LB: loop body
LE: loop exit
PB: predicated region body
PF: predicated region fallthrough
CT: control target
= control target key end

     0   :  { %vm4768_vm0 = vcmask 7168   ;;  %s9242_s1 = inlined_call_operand.vmem [shape: bf16[768,768], index: 1, kind: input, shape index: {}]   ;;  %s9243_s0 = inlined_call_operand.vmem [shape: bf16[256,768], index: 0, kind: input, shape index: {}]   ;;  %s9244_s2 = inlined_call_operand.vmem [shape: f32[1,768], index: 2, kind: input, shape index: {}]   ;;  %s9245_s3 = inlined_call_operand.vmem [shape: f32[1,768], index: 3, kind: input, shape index: {}]   ;;  %s9246_s4 = inlined_call_operand.<no memory space> [shape: f32[1], index: 4, kind: input, shape index: {}]   ;;  %s9247_s5 = inlined_call_operand.vmem [shape: f32[256,1], index: 5, kind: output, shape index: {}]  }
   0x1   :  { %v5797_v0 = vld [vmem:[%s9242_s1 + $0x4] ss:$24 sps:$4 sm:$0xff]   ;;  %v5801_v2 = vld [vmem:[%s9242_s1] ss:$24 sps:$4 sm:$0xff]   ;;  %v5803_v4 = vld [vmem:[%s9242_s1 + $0x34] ss:$24 sps:$4 sm:$0xff]  }
   0x2   :  { %v6891_v1 = vld [vmem:[%s9242_s1 + $0x304] ss:$24 sps:$4 sm:$0xff]   ;;  %2357 = vmatprep.subr.bf16.mxu1 %v5797_v0  ;;  %v6899_v3 = vld [vmem:[%s9242_s1 + $0x300] ss:$24 sps:$4 sm:$0xff]   ;;  %v6909_v5 = vld [vmem:[%s9242_s1 + $0x334] ss:$24 sps:$4 sm:$0xff]  }
   0x3   :  { %2550 = vmatprep.subr.bf16.mxu0 %v6891_v1  ;;  %2358 = vmatpush1.bf16.msra.mxu1 %v5801_v2  ;;  %v5807_v6 = vld [vmem:[%s9242_s1 + $0x30] ss:$24 sps:$4 sm:$0xff]   ;;  %v5809_v8 = vld [vmem:[%s9242_s1 + $0x64] ss:$24 sps:$4 sm:$0xff]   ;;  %v5813_v10 = vld [vmem:[%s9242_s1 + $0x60] ss:$24 sps:$4 sm:$0xff]  }
   0x4   :  { %2551 = vmatpush1.bf16.msra.mxu0 %v6899_v3  ;;  %2359 = vmatprep.subr.bf16.mxu1 %v5803_v4  ;;  %v6917_v7 = vld [vmem:[%s9242_s1 + $0x330] ss:$24 sps:$4 sm:$0xff]   ;;  %v6926_v9 = vld [vmem:[%s9242_s1 + $0x364] ss:$24 sps:$4 sm:$0xff]   ;;  %v6934_v11 = vld [vmem:[%s9242_s1 + $0x360] ss:$24 sps:$4 sm:$0xff]  }
   0x5   :  { %2552 = vmatprep.subr.bf16.mxu0 %v6909_v5  ;;  %v5815_v12 = vld [vmem:[%s9242_s1 + $0x94] ss:$24 sps:$4 sm:$0xff]   ;;  %v5819_v14 = vld [vmem:[%s9242_s1 + $0x90] ss:$24 sps:$4 sm:$0xff]   ;;  %v5821_v16 = vld [vmem:[%s9242_s1 + $0xc4] ss:$24 sps:$4 sm:$0xff]  }
   0x6   :  { %v6944_v13 = vld [vmem:[%s9242_s1 + $0x394] ss:$24 sps:$4 sm:$0xff]   ;;  %v6953_v15 = vld [vmem:[%s9242_s1 + $0x390] ss:$24 sps:$4 sm:$0xff]   ;;  %v6962_v17 = vld [vmem:[%s9242_s1 + $0x3c4] ss:$24 sps:$4 sm:$0xff]  }
   0x7   :  { %2360 = vmatpush1.bf16.msra.mxu1 %v5807_v6  ;;  %v5825_v18 = vld [vmem:[%s9242_s1 + $0xc0] ss:$24 sps:$4 sm:$0xff]   ;;  %v5827_v20 = vld [vmem:[%s9242_s1 + $0xf4] ss:$24 sps:$4 sm:$0xff]   ;;  %v5831_v22 = vld [vmem:[%s9242_s1 + $0xf0] ss:$24 sps:$4 sm:$0xff]  }
   0x8   :  { %2553 = vmatpush1.bf16.msra.mxu0 %v6917_v7  ;;  %2361 = vmatprep.subr.bf16.mxu1 %v5809_v8  ;;  %v6970_v19 = vld [vmem:[%s9242_s1 + $0x3c0] ss:$24 sps:$4 sm:$0xff]   ;;  %v6980_v21 = vld [vmem:[%s9242_s1 + $0x3f4] ss:$24 sps:$4 sm:$0xff]   ;;  %v6989_v23 = vld [vmem:[%s9242_s1 + $0x3f0] ss:$24 sps:$4 sm:$0xff]  }
   0x9   :  { %2554 = vmatprep.subr.bf16.mxu0 %v6926_v9  ;;  %v5833_v24 = vld [vmem:[%s9242_s1 + $0x124] ss:$24 sps:$4 sm:$0xff]   ;;  %v5837_v26 = vld [vmem:[%s9242_s1 + $0x120] ss:$24 sps:$4 sm:$0xff]   ;;  %v5839_v28 = vld [vmem:[%s9242_s1 + $0x154] ss:$24 sps:$4 sm:$0xff]  }
   0xa   :  { %v6998_v25 = vld [vmem:[%s9242_s1 + $0x424] ss:$24 sps:$4 sm:$0xff]   ;;  %v7006_v27 = vld [vmem:[%s9242_s1 + $0x420] ss:$24 sps:$4 sm:$0xff]   ;;  %v7016_v29 = vld [vmem:[%s9242_s1 + $0x454] ss:$24 sps:$4 sm:$0xff]  }
   0xb   :  { %2362 = vmatpush1.bf16.msra.mxu1 %v5813_v10  ;;  %v5843_v30 = vld [vmem:[%s9242_s1 + $0x150] ss:$24 sps:$4 sm:$0xff]   ;;  %v5845_v32 = vld [vmem:[%s9242_s1 + $0x184] ss:$24 sps:$4 sm:$0xff]   ;;  %v5849_v34 = vld [vmem:[%s9242_s1 + $0x180] ss:$24 sps:$4 sm:$0xff]  }
   0xc   :  { %2555 = vmatpush1.bf16.msra.mxu0 %v6934_v11  ;;  %2363 = vmatprep.subr.bf16.mxu1 %v5815_v12  ;;  %v7025_v31 = vld [vmem:[%s9242_s1 + $0x450] ss:$24 sps:$4 sm:$0xff]   ;;  %v7034_v33 = vld [vmem:[%s9242_s1 + $0x484] ss:$24 sps:$4 sm:$0xff]   ;;  %v7042_v35 = vld [vmem:[%s9242_s1 + $0x480] ss:$24 sps:$4 sm:$0xff]  }
   0xd   :  { %2556 = vmatprep.subr.bf16.mxu0 %v6944_v13  ;;  %v5851_v36 = vld [vmem:[%s9242_s1 + $0x1b4] ss:$24 sps:$4 sm:$0xff]   ;;  %v5855_v38 = vld [vmem:[%s9242_s1 + $0x1b0] ss:$24 sps:$4 sm:$0xff]   ;;  %v5857_v40 = vld [vmem:[%s9242_s1 + $0x1e4] ss:$24 sps:$4 sm:$0xff]  }
   0xe   :  { %v7052_v37 = vld [vmem:[%s9242_s1 + $0x4b4] ss:$24 sps:$4 sm:$0xff]   ;;  %v7061_v39 = vld [vmem:[%s9242_s1 + $0x4b0] ss:$24 sps:$4 sm:$0xff]   ;;  %v7070_v41 = vld [vmem:[%s9242_s1 + $0x4e4] ss:$24 sps:$4 sm:$0xff]  }
   0xf   :  { %2364 = vmatpush1.bf16.msra.mxu1 %v5819_v14  ;;  %v5861_v42 = vld [vmem:[%s9242_s1 + $0x1e0] ss:$24 sps:$4 sm:$0xff]   ;;  %v5863_v44 = vld [vmem:[%s9242_s1 + $0x214] ss:$24 sps:$4 sm:$0xff]   ;;  %v5867_v46 = vld [vmem:[%s9242_s1 + $0x210] ss:$24 sps:$4 sm:$0xff]  }
  0x10   :  { %2557 = vmatpush1.bf16.msra.mxu0 %v6953_v15  ;;  %2365 = vmatprep.subr.bf16.mxu1 %v5821_v16  ;;  %v7078_v43 = vld [vmem:[%s9242_s1 + $0x4e0] ss:$24 sps:$4 sm:$0xff]   ;;  %v7088_v45 = vld [vmem:[%s9242_s1 + $0x514] ss:$24 sps:$4 sm:$0xff]   ;;  %v7096_v47 = vld [vmem:[%s9242_s1 + $0x510] ss:$24 sps:$4 sm:$0xff]  }
  0x11   :  { %2558 = vmatprep.subr.bf16.mxu0 %v6962_v17  ;;  %v5893_v48 = vld [vmem:[%s9243_s0 + $0x4] ss:$24 sps:$4 sm:$0xff]   ;;  %v5873_v52 = vld [vmem:[%s9242_s1 + $0x240] ss:$24 sps:$4 sm:$0xff]   ;;  %v5875_v54 = vld [vmem:[%s9242_s1 + $0x274] ss:$24 sps:$4 sm:$0xff]  }
  0x12   :  { %v5869_v49 = vld [vmem:[%s9242_s1 + $0x244] ss:$24 sps:$4 sm:$0xff]   ;;  %2389 = vmatprep.mubr.bf16.mxu1 %v5893_v48  ;;  %v7120_v53 = vld [vmem:[%s9242_s1 + $0x540] ss:$24 sps:$4 sm:$0xff]   ;;  %v7130_v55 = vld [vmem:[%s9242_s1 + $0x574] ss:$24 sps:$4 sm:$0xff]  }
  0x13   :  { %2366 = vmatpush1.bf16.msra.mxu1 %v5825_v18  ;;  %v5895_v50 = vld [vmem:[%s9243_s0 + $0xc] ss:$24 sps:$4 sm:$0xff]   ;;  %v5879_v56 = vld [vmem:[%s9242_s1 + $0x270] ss:$24 sps:$4 sm:$0xff]   ;;  %v5885_v60 = vld [vmem:[%s9242_s1 + $0x2a0] ss:$24 sps:$4 sm:$0xff]  }
  0x14   :  { %2559 = vmatpush1.bf16.msra.mxu0 %v6970_v19  ;;  %2367 = vmatprep.subr.bf16.mxu1 %v5827_v20  ;;  %v7112_v51 = vld [vmem:[%s9242_s1 + $0x544] ss:$24 sps:$4 sm:$0xff]   ;;  %v7138_v57 = vld [vmem:[%s9242_s1 + $0x570] ss:$24 sps:$4 sm:$0xff]   ;;  %v7156_v61 = vld [vmem:[%s9242_s1 + $0x5a0] ss:$24 sps:$4 sm:$0xff]  }
  0x15   :  { %2560 = vmatprep.subr.bf16.mxu0 %v6980_v21  ;;  %2582 = vmatprep.mubr.bf16.mxu0 %v5895_v50  ;;  %v5881_v58 = vld [vmem:[%s9242_s1 + $0x2a4] ss:$24 sps:$4 sm:$0xff]   ;;  %v5887_v62 = vld [vmem:[%s9242_s1 + $0x2d4] ss:$24 sps:$4 sm:$0xff]   ;;  %v5891_v0 = vld [vmem:[%s9242_s1 + $0x2d0] ss:$24 sps:$4 sm:$0xff]  }
  0x16   :  { %v7148_v59 = vld [vmem:[%s9242_s1 + $0x5a4] ss:$24 sps:$4 sm:$0xff]   ;;  %v7166_v63 = vld [vmem:[%s9242_s1 + $0x5d4] ss:$24 sps:$4 sm:$0xff]   ;;  %v7175_v2 = vld [vmem:[%s9242_s1 + $0x5d0] ss:$24 sps:$4 sm:$0xff]  }
  0x17   :  { %2368 = vmatpush1.bf16.msra.mxu1 %v5831_v22  ;;  %v5901_v4 = vld [vmem:[%s9242_s1 + $0x604] ss:$24 sps:$4 sm:$0xff]   ;;  %v5897_v6 = vld [vmem:[%s9243_s0] ss:$24 sps:$4 sm:$0xff]   ;;  %v5904_v12 = vld [vmem:[%s9242_s1 + $0x634] ss:$24 sps:$4 sm:$0xff]  }
  0x18   :  { %2561 = vmatpush1.bf16.msra.mxu0 %v6989_v23  ;;  %2369 = vmatprep.subr.bf16.mxu1 %v5833_v24  ;;  %v5898_v8 = vld [vmem:[%s9243_s0 + $0x8] ss:$24 sps:$4 sm:$0xff]   ;;  %v5905_v14 = vld [vmem:[%s9243_s0 + $0x34] ss:$24 sps:$4 sm:$0xff]  }
  0x19   :  { %2562 = vmatprep.subr.bf16.mxu0 %v6998_v25  ;;  %v5899_v10 = vld [vmem:[%s9242_s1 + $0x600] ss:$24 sps:$4 sm:$0xff]   ;;  %v5907_v16 = vld [vmem:[%s9243_s0 + $0x3c] ss:$24 sps:$4 sm:$0xff]   ;;  %v5902_v18 = vld [vmem:[%s9242_s1 + $0x630] ss:$24 sps:$4 sm:$0xff]  }
  0x1a   :  { %v5909_v20 = vld [vmem:[%s9243_s0 + $0x30] ss:$24 sps:$4 sm:$0xff]   ;;  %v5911_v22 = vld [vmem:[%s9242_s1 + $0x660] ss:$24 sps:$4 sm:$0xff]   ;;  %v5916_v24 = vld [vmem:[%s9242_s1 + $0x694] ss:$24 sps:$4 sm:$0xff]  }
  0x1b   :  { %2370 = vmatpush1.bf16.msra.mxu1 %v5837_v26  ;;  %v5917_v26 = vld [vmem:[%s9243_s0 + $0x64] ss:$24 sps:$4 sm:$0xff]   ;;  %v5938_v48 = vld [vmem:[%s9242_s1 + $0x750] ss:$24 sps:$4 sm:$0xff]   ;;  %v5947_v50 = vld [vmem:[%s9242_s1 + $0x780] ss:$24 sps:$4 sm:$0xff]  }
  0x1c   :  { %2563 = vmatpush1.bf16.msra.mxu0 %v7006_v27  ;;  %2371 = vmatprep.subr.bf16.mxu1 %v5839_v28  ;;  %v5914_v28 = vld [vmem:[%s9242_s1 + $0x690] ss:$24 sps:$4 sm:$0xff]  }
  0x1d   :  { %2564 = vmatprep.subr.bf16.mxu0 %v7016_v29 }
  0x1f   :  { %2372 = vmatpush1.bf16.msra.mxu1 %v5843_v30  ;;  %v5921_v30 = vld [vmem:[%s9243_s0 + $0x60] ss:$24 sps:$4 sm:$0xff]  }
  0x20   :  { %2565 = vmatpush1.bf16.msra.mxu0 %v7025_v31  ;;  %2373 = vmatprep.subr.bf16.mxu1 %v5845_v32  ;;  %v5923_v32 = vld [vmem:[%s9242_s1 + $0x6c0] ss:$24 sps:$4 sm:$0xff]  }
  0x21   :  { %2566 = vmatprep.subr.bf16.mxu0 %v7034_v33 }
  0x23   :  { %2374 = vmatpush1.bf16.msra.mxu1 %v5849_v34  ;;  %v5928_v34 = vld [vmem:[%s9242_s1 + $0x6f4] ss:$24 sps:$4 sm:$0xff]  }
  0x24   :  { %2567 = vmatpush1.bf16.msra.mxu0 %v7042_v35  ;;  %2375 = vmatprep.subr.bf16.mxu1 %v5851_v36  ;;  %v5929_v36 = vld [vmem:[%s9243_s0 + $0x94] ss:$24 sps:$4 sm:$0xff]  }
  0x25   :  { %2568 = vmatprep.subr.bf16.mxu0 %v7052_v37 }
  0x27   :  { %2376 = vmatpush1.bf16.msra.mxu1 %v5855_v38  ;;  %v5926_v38 = vld [vmem:[%s9242_s1 + $0x6f0] ss:$24 sps:$4 sm:$0xff]  }
  0x28   :  { %2569 = vmatpush1.bf16.msra.mxu0 %v7061_v39  ;;  %2377 = vmatprep.subr.bf16.mxu1 %v5857_v40  ;;  %v5933_v40 = vld [vmem:[%s9243_s0 + $0x90] ss:$24 sps:$4 sm:$0xff]  }
  0x29   :  { %2570 = vmatprep.subr.bf16.mxu0 %v7070_v41 }
  0x2b   :  { %2378 = vmatpush1.bf16.msra.mxu1 %v5861_v42  ;;  %v5935_v42 = vld [vmem:[%s9242_s1 + $0x720] ss:$24 sps:$4 sm:$0xff]  }
  0x2c   :  { %2571 = vmatpush1.bf16.msra.mxu0 %v7078_v43  ;;  %2379 = vmatprep.subr.bf16.mxu1 %v5863_v44  ;;  %v5940_v44 = vld [vmem:[%s9242_s1 + $0x754] ss:$24 sps:$4 sm:$0xff]  }
  0x2d   :  { %2572 = vmatprep.subr.bf16.mxu0 %v7088_v45 }
  0x2f   :  { %2380 = vmatpush1.bf16.msra.mxu1 %v5867_v46  ;;  %v5941_v46 = vld [vmem:[%s9243_s0 + $0xc4] ss:$24 sps:$4 sm:$0xff]  }
  0x30   :  { %2573 = vmatpush1.bf16.msra.mxu0 %v7096_v47  ;;  %2381 = vmatprep.subr.bf16.mxu1 %v5869_v49  ;;  %v5946_v49 = vld [vmem:[%s9243_s0 + $0xc8] ss:$24 sps:$4 sm:$0xff]  }
  0x31   :  { %2574 = vmatprep.subr.bf16.mxu0 %v7112_v51 }
  0x33   :  { %2382 = vmatpush1.bf16.msra.mxu1 %v5873_v52  ;;  %v5952_v52 = vld [vmem:[%s9242_s1 + $0x7b4] ss:$24 sps:$4 sm:$0xff]  }
  0x34   :  { %2575 = vmatpush1.bf16.msra.mxu0 %v7120_v53  ;;  %2383 = vmatprep.subr.bf16.mxu1 %v5875_v54  ;;  %v5953_v54 = vld [vmem:[%s9243_s0 + $0xf4] ss:$24 sps:$4 sm:$0xff]  }
  0x35   :  { %2576 = vmatprep.subr.bf16.mxu0 %v7130_v55 }
  0x37   :  { %2384 = vmatpush1.bf16.msra.mxu1 %v5879_v56  ;;  %v5950_v56 = vld [vmem:[%s9242_s1 + $0x7b0] ss:$24 sps:$4 sm:$0xff]  }
  0x38   :  { %2577 = vmatpush1.bf16.msra.mxu0 %v7138_v57  ;;  %2385 = vmatprep.subr.bf16.mxu1 %v5881_v58  ;;  %v5957_v58 = vld [vmem:[%s9243_s0 + $0xf0] ss:$24 sps:$4 sm:$0xff]  }
  0x39   :  { %2578 = vmatprep.subr.bf16.mxu0 %v7148_v59 }
  0x3b   :  { %2386 = vmatpush1.bf16.msra.mxu1 %v5885_v60  ;;  %v5959_v60 = vld [vmem:[%s9242_s1 + $0x7e0] ss:$24 sps:$4 sm:$0xff]  }
  0x3c   :  { %2579 = vmatpush1.bf16.msra.mxu0 %v7156_v61  ;;  %2387 = vmatprep.subr.bf16.mxu1 %v5887_v62  ;;  %v5964_v62 = vld [vmem:[%s9242_s1 + $0x814] ss:$24 sps:$4 sm:$0xff]  }
  0x3d   :  { %2580 = vmatprep.subr.bf16.mxu0 %v7166_v63 }
  0x3f   :  { %2388 = vmatpush1.bf16.msra.mxu1 %v5891_v0  ;;  %v5965_v0 = vld [vmem:[%s9243_s0 + $0x124] ss:$24 sps:$4 sm:$0xff]  }
  0x40   :  { %2581 = vmatpush1.bf16.msra.mxu0 %v7175_v2  ;;  %5189 = vmatprep.subr.bf16.mxu1 %v6891_v1  ;;  %v5913_v1 = vld [vmem:[%s9242_s1 + $0x664] ss:$24 sps:$4 sm:$0xff]  }
  0x41   :  { %2743 = vmatprep.subr.bf16.mxu0 %v5901_v4  ;;  %v5962_v4 = vld [vmem:[%s9242_s1 + $0x810] ss:$24 sps:$4 sm:$0xff]  }
  0x42   :  { %2390 = vmatmul.mubr.bf16.vlgmr.msra.gmra.mrb[0].mxu1 %v5897_v6  ;;  %v5970_v6 = vld [vmem:[%s9243_s0 + $0x128] ss:$24 sps:$4 sm:$0xff]  }
  0x43   :  { %2583 = vmatmul.mubr.bf16.vlgmr.msra.gmra.mrb[0].mxu0 %v5898_v8  ;;  %5205 = vmatpush1.bf16.msra.mxu1 %v6899_v3  ;;  %v5910_v3 = vld [vmem:[%s9243_s0 + $0x38] ss:$24 sps:$4 sm:$0xff]  }
  0x44   :  { %2744 = vmatpush1.bf16.msra.mxu0 %v5899_v10  ;;  %2399 = vmatprep.mubr.bf16.mxu1 %v5905_v14  ;;  %v5971_v8 = vld [vmem:[%s9242_s1 + $0x840] ss:$24 sps:$4 sm:$0xff]   ;;  %v5976_v10 = vld [vmem:[%s9242_s1 + $0x874] ss:$24 sps:$4 sm:$0xff]   ;;  %v5974_v14 = vld [vmem:[%s9242_s1 + $0x870] ss:$24 sps:$4 sm:$0xff]  }
  0x45   :  { %2745 = vmatprep.subr.bf16.mxu0 %v5904_v12  ;;  %2592 = vmatprep.mubr.bf16.mxu0 %v5907_v16  ;;  %v5977_v12 = vld [vmem:[%s9243_s0 + $0x154] ss:$24 sps:$4 sm:$0xff]   ;;  %v5981_v16 = vld [vmem:[%s9243_s0 + $0x150] ss:$24 sps:$4 sm:$0xff]  }
  0x46   :  { %5190 = vmatprep.subr.bf16.mxu1 %v6909_v5  ;;  %v5919_v5 = vld [vmem:[%s9243_s0 + $0x6c] ss:$24 sps:$4 sm:$0xff]  }
  0x47   :  { %5206 = vmatpush1.bf16.msra.mxu1 %v6917_v7  ;;  %v5925_v7 = vld [vmem:[%s9242_s1 + $0x6c4] ss:$24 sps:$4 sm:$0xff]  }
  0x48   :  { %2746 = vmatpush1.bf16.msra.mxu0 %v5902_v18  ;;  %5191 = vmatprep.subr.bf16.mxu1 %v6926_v9  ;;  %v5922_v9 = vld [vmem:[%s9243_s0 + $0x68] ss:$24 sps:$4 sm:$0xff]  }
  0x49   :  { %2747 = vmatprep.subr.bf16.mxu0 %v5913_v1  ;;  %v5983_v18 = vld [vmem:[%s9242_s1 + $0x8a0] ss:$24 sps:$4 sm:$0xff]   ;;  %v5988_v1 = vld [vmem:[%s9242_s1 + $0x8d4] ss:$24 sps:$4 sm:$0xff]  }
  0x4a   :  { %2400 = vmatmul.mubr.bf16.gmra.mrb[4].mxu1 %v5909_v20  ;;  %v5989_v20 = vld [vmem:[%s9243_s0 + $0x184] ss:$24 sps:$4 sm:$0xff]  }
  0x4b   :  { %2593 = vmatmul.mubr.bf16.gmra.mrb[4].mxu0 %v5910_v3  ;;  %2409 = vmatprep.mubr.bf16.mxu1 %v5917_v26  ;;  %v5986_v3 = vld [vmem:[%s9242_s1 + $0x8d0] ss:$24 sps:$4 sm:$0xff]   ;;  %v5998_v26 = vld [vmem:[%s9243_s0 + $0x1b4] ss:$24 sps:$4 sm:$0xff]  }
  0x4c   :  { %2748 = vmatpush1.bf16.msra.mxu0 %v5911_v22  ;;  %2602 = vmatprep.mubr.bf16.mxu0 %v5919_v5  ;;  %v5994_v22 = vld [vmem:[%s9243_s0 + $0x180] ss:$24 sps:$4 sm:$0xff]   ;;  %v6000_v5 = vld [vmem:[%s9243_s0 + $0x44] ss:$24 sps:$4 sm:$0xff]  }
  0x4d   :  { %2749 = vmatprep.subr.bf16.mxu0 %v5916_v24  ;;  %5207 = vmatpush1.bf16.msra.mxu1 %v6934_v11  ;;  %v5931_v11 = vld [vmem:[%s9243_s0 + $0x9c] ss:$24 sps:$4 sm:$0xff]   ;;  %v5995_v24 = vld [vmem:[%s9242_s1 + $0x10] ss:$24 sps:$4 sm:$0xff]  }
  0x4e   :  { %5192 = vmatprep.subr.bf16.mxu1 %v6944_v13  ;;  %v5937_v13 = vld [vmem:[%s9242_s1 + $0x724] ss:$24 sps:$4 sm:$0xff]  }
  0x50   :  { %2750 = vmatpush1.bf16.msra.mxu0 %v5914_v28  ;;  %v6015_v28 = vld [vmem:[%s9242_s1 + $0x74] ss:$24 sps:$4 sm:$0xff]  }
  0x51   :  { %2751 = vmatprep.subr.bf16.mxu0 %v5925_v7  ;;  %5208 = vmatpush1.bf16.msra.mxu1 %v6953_v15  ;;  %v5934_v15 = vld [vmem:[%s9243_s0 + $0x98] ss:$24 sps:$4 sm:$0xff]  }
  0x52   :  { %2410 = vmatmul.mubr.bf16.gmra.mrb[8].mxu1 %v5921_v30  ;;  %5193 = vmatprep.subr.bf16.mxu1 %v6962_v17  ;;  %v5943_v17 = vld [vmem:[%s9243_s0 + $0xcc] ss:$24 sps:$4 sm:$0xff]   ;;  %v6002_v7 = vld [vmem:[%s9243_s0 + $0x1b0] ss:$24 sps:$4 sm:$0xff]  }
  0x53   :  { %2603 = vmatmul.mubr.bf16.gmra.mrb[8].mxu0 %v5922_v9  ;;  %2419 = vmatprep.mubr.bf16.mxu1 %v5929_v36  ;;  %v6007_v30 = vld [vmem:[%s9243_s0 + $0x1e4] ss:$24 sps:$4 sm:$0xff]   ;;  %v6009_v9 = vld [vmem:[%s9243_s0 + $0x74] ss:$24 sps:$4 sm:$0xff]  }
  0x54   :  { %2752 = vmatpush1.bf16.msra.mxu0 %v5923_v32  ;;  %2612 = vmatprep.mubr.bf16.mxu0 %v5931_v11  ;;  %v6024_v32 = vld [vmem:[%s9242_s1 + $0xa4] ss:$24 sps:$4 sm:$0xff]   ;;  %v6012_v11 = vld [vmem:[%s9243_s0 + $0x70] ss:$24 sps:$4 sm:$0xff]  }
  0x55   :  { %2753 = vmatprep.subr.bf16.mxu0 %v5928_v34  ;;  %5209 = vmatpush1.bf16.msra.mxu1 %v6970_v19  ;;  %v5949_v19 = vld [vmem:[%s9242_s1 + $0x784] ss:$24 sps:$4 sm:$0xff]   ;;  %v6033_v34 = vld [vmem:[%s9242_s1 + $0xd4] ss:$24 sps:$4 sm:$0xff]  }
  0x56   :  { %5194 = vmatprep.subr.bf16.mxu1 %v6980_v21  ;;  %v5945_v21 = vld [vmem:[%s9243_s0 + $0xc0] ss:$24 sps:$4 sm:$0xff]   ;;  %v6069_v36 = vld [vmem:[%s9242_s1 + $0xc] ss:$24 sps:$4 sm:$0xff]  }
  0x58   :  { %2754 = vmatpush1.bf16.msra.mxu0 %v5926_v38  ;;  %v6016_v38 = vld [vmem:[%s9243_s0 + $0x214] ss:$24 sps:$4 sm:$0xff]  }
  0x59   :  { %2755 = vmatprep.subr.bf16.mxu0 %v5937_v13  ;;  %5210 = vmatpush1.bf16.msra.mxu1 %v6989_v23  ;;  %v5955_v23 = vld [vmem:[%s9243_s0 + $0xfc] ss:$24 sps:$4 sm:$0xff]  }
  0x5a   :  { %2420 = vmatmul.mubr.bf16.gmra.mrb[12].mxu1 %v5933_v40  ;;  %5195 = vmatprep.subr.bf16.mxu1 %v6998_v25  ;;  %v5961_v25 = vld [vmem:[%s9242_s1 + $0x7e4] ss:$24 sps:$4 sm:$0xff]   ;;  %v6040_v40 = vld [vmem:[%s9242_s1 + $0x100] ss:$24 sps:$4 sm:$0xff]  }
  0x5b   :  { %2613 = vmatmul.mubr.bf16.gmra.mrb[12].mxu0 %v5934_v15  ;;  %2429 = vmatprep.mubr.bf16.mxu1 %v5941_v46  ;;  %v6042_v13 = vld [vmem:[%s9242_s1 + $0x104] ss:$24 sps:$4 sm:$0xff]   ;;  %v6020_v15 = vld [vmem:[%s9243_s0 + $0x210] ss:$24 sps:$4 sm:$0xff]   ;;  %v6027_v46 = vld [vmem:[%s9243_s0 + $0xd4] ss:$24 sps:$4 sm:$0xff]  }
  0x5c   :  { %2756 = vmatpush1.bf16.msra.mxu0 %v5935_v42  ;;  %2622 = vmatprep.mubr.bf16.mxu0 %v5943_v17  ;;  %v6021_v42 = vld [vmem:[%s9243_s0 + $0xa0] ss:$24 sps:$4 sm:$0xff]   ;;  %v6049_v17 = vld [vmem:[%s9242_s1 + $0x130] ss:$24 sps:$4 sm:$0xff]  }
  0x5d   :  { %2757 = vmatprep.subr.bf16.mxu0 %v5940_v44  ;;  %5211 = vmatpush1.bf16.msra.mxu1 %v7006_v27  ;;  %v5958_v27 = vld [vmem:[%s9243_s0 + $0xf8] ss:$24 sps:$4 sm:$0xff]   ;;  %v6025_v44 = vld [vmem:[%s9243_s0 + $0x244] ss:$24 sps:$4 sm:$0xff]  }
  0x5e   :  { %5196 = vmatprep.subr.bf16.mxu1 %v7016_v29  ;;  %v5967_v29 = vld [vmem:[%s9243_s0 + $0x12c] ss:$24 sps:$4 sm:$0xff]  }
  0x60   :  { %2758 = vmatpush1.bf16.msra.mxu0 %v5938_v48  ;;  %v6060_v48 = vld [vmem:[%s9242_s1 + $0x164] ss:$24 sps:$4 sm:$0xff]  }
  0x61   :  { %2759 = vmatprep.subr.bf16.mxu0 %v5949_v19  ;;  %5212 = vmatpush1.bf16.msra.mxu1 %v7025_v31  ;;  %v5973_v31 = vld [vmem:[%s9242_s1 + $0x844] ss:$24 sps:$4 sm:$0xff]   ;;  %v6058_v19 = vld [vmem:[%s9242_s1 + $0x160] ss:$24 sps:$4 sm:$0xff]  }
  0x62   :  { %2430 = vmatmul.mubr.bf16.gmra.mrb[16].mxu1 %v5945_v21  ;;  %5197 = vmatprep.subr.bf16.mxu1 %v7034_v33  ;;  %v5969_v33 = vld [vmem:[%s9243_s0 + $0x120] ss:$24 sps:$4 sm:$0xff]   ;;  %v6075_v21 = vld [vmem:[%s9242_s1 + $0x194] ss:$24 sps:$4 sm:$0xff]  }
  0x63   :  { %2623 = vmatmul.mubr.bf16.gmra.mrb[16].mxu0 %v5946_v49  ;;  %2439 = vmatprep.mubr.bf16.mxu1 %v5953_v54  ;;  %v6029_v49 = vld [vmem:[%s9243_s0 + $0x240] ss:$24 sps:$4 sm:$0xff]   ;;  %v6036_v54 = vld [vmem:[%s9243_s0 + $0x104] ss:$24 sps:$4 sm:$0xff]  }
  0x64   :  { %2760 = vmatpush1.bf16.msra.mxu0 %v5947_v50  ;;  %2632 = vmatprep.mubr.bf16.mxu0 %v5955_v23  ;;  %v6030_v50 = vld [vmem:[%s9243_s0 + $0xd0] ss:$24 sps:$4 sm:$0xff]  }
  0x65   :  { %2761 = vmatprep.subr.bf16.mxu0 %v5952_v52  ;;  %5213 = vmatpush1.bf16.msra.mxu1 %v7042_v35  ;;  %v5979_v35 = vld [vmem:[%s9243_s0 + $0x15c] ss:$24 sps:$4 sm:$0xff]   ;;  %v6073_v23 = vld [vmem:[%s9242_s1 + $0x190] ss:$24 sps:$4 sm:$0xff]  }
  0x66   :  { %5198 = vmatprep.subr.bf16.mxu1 %v7052_v37  ;;  %v5985_v37 = vld [vmem:[%s9242_s1 + $0x8a4] ss:$24 sps:$4 sm:$0xff]   ;;  %v6034_v52 = vld [vmem:[%s9243_s0 + $0x274] ss:$24 sps:$4 sm:$0xff]  }
  0x68   :  { %2762 = vmatpush1.bf16.msra.mxu0 %v5950_v56  ;;  %v6090_v56 = vld [vmem:[%s9242_s1 + $0x1c4] ss:$24 sps:$4 sm:$0xff]  }
  0x69   :  { %2763 = vmatprep.subr.bf16.mxu0 %v5961_v25  ;;  %5214 = vmatpush1.bf16.msra.mxu1 %v7061_v39  ;;  %v5982_v39 = vld [vmem:[%s9243_s0 + $0x158] ss:$24 sps:$4 sm:$0xff]  }
  0x6a   :  { %2440 = vmatmul.mubr.bf16.gmra.mrb[20].mxu1 %v5957_v58  ;;  %5199 = vmatprep.subr.bf16.mxu1 %v7070_v41  ;;  %v5993_v41 = vld [vmem:[%s9243_s0 + $0x14] ss:$24 sps:$4 sm:$0xff]   ;;  %v6088_v25 = vld [vmem:[%s9242_s1 + $0x1c0] ss:$24 sps:$4 sm:$0xff]   ;;  %v6038_v58 = vld [vmem:[%s9243_s0 + $0x270] ss:$24 sps:$4 sm:$0xff]  }
  0x6b   :  { %2633 = vmatmul.mubr.bf16.gmra.mrb[20].mxu0 %v5958_v27  ;;  %2449 = vmatprep.mubr.bf16.mxu1 %v5965_v0  ;;  %v6105_v27 = vld [vmem:[%s9242_s1 + $0x1f4] ss:$24 sps:$4 sm:$0xff]  }
  0x6c   :  { %2764 = vmatpush1.bf16.msra.mxu0 %v5959_v60  ;;  %2642 = vmatprep.mubr.bf16.mxu0 %v5967_v29  ;;  %v6039_v60 = vld [vmem:[%s9243_s0 + $0x100] ss:$24 sps:$4 sm:$0xff]   ;;  %v6045_v0 = vld [vmem:[%s9243_s0 + $0x134] ss:$24 sps:$4 sm:$0xff]   ;;  %v6103_v29 = vld [vmem:[%s9242_s1 + $0x1f0] ss:$24 sps:$4 sm:$0xff]  }
  0x6d   :  { %2765 = vmatprep.subr.bf16.mxu0 %v5964_v62  ;;  %5215 = vmatpush1.bf16.msra.mxu1 %v7078_v43  ;;  %v5997_v43 = vld [vmem:[%s9242_s1 + $0x14] ss:$24 sps:$4 sm:$0xff]   ;;  %v6043_v62 = vld [vmem:[%s9243_s0 + $0x2a4] ss:$24 sps:$4 sm:$0xff]  }
  0x6e   :  { %5200 = vmatprep.subr.bf16.mxu1 %v7088_v45  ;;  %v5991_v45 = vld [vmem:[%s9243_s0 + $0x10] ss:$24 sps:$4 sm:$0xff]  }
  0x70   :  { %2766 = vmatpush1.bf16.msra.mxu0 %v5962_v4  ;;  %v6120_v4 = vld [vmem:[%s9242_s1 + $0x224] ss:$24 sps:$4 sm:$0xff]  }
  0x71   :  { %2767 = vmatprep.subr.bf16.mxu0 %v5973_v31  ;;  %5216 = vmatpush1.bf16.msra.mxu1 %v7096_v47  ;;  %v6006_v47 = vld [vmem:[%s9242_s1 + $0x44] ss:$24 sps:$4 sm:$0xff]   ;;  %v6118_v31 = vld [vmem:[%s9242_s1 + $0x220] ss:$24 sps:$4 sm:$0xff]  }
  0x72   :  { %2450 = vmatmul.mubr.bf16.gmra.mrb[24].mxu1 %v5969_v33  ;;  %5201 = vmatprep.subr.bf16.mxu1 %v7112_v51  ;;  %v6004_v51 = vld [vmem:[%s9242_s1 + $0x40] ss:$24 sps:$4 sm:$0xff]  }
  0x73   :  { %2643 = vmatmul.mubr.bf16.gmra.mrb[24].mxu0 %v5970_v6  ;;  %2459 = vmatprep.mubr.bf16.mxu1 %v5977_v12  ;;  %v6047_v33 = vld [vmem:[%s9243_s0 + $0x2a0] ss:$24 sps:$4 sm:$0xff]   ;;  %v6135_v6 = vld [vmem:[%s9242_s1 + $0x254] ss:$24 sps:$4 sm:$0xff]   ;;  %v6054_v12 = vld [vmem:[%s9243_s0 + $0x164] ss:$24 sps:$4 sm:$0xff]  }
  0x74   :  { %2768 = vmatpush1.bf16.msra.mxu0 %v5971_v8  ;;  %2652 = vmatprep.mubr.bf16.mxu0 %v5979_v35  ;;  %v6048_v8 = vld [vmem:[%s9243_s0 + $0x130] ss:$24 sps:$4 sm:$0xff]  }
  0x75   :  { %2769 = vmatprep.subr.bf16.mxu0 %v5976_v10  ;;  %5217 = vmatpush1.bf16.msra.mxu1 %v7120_v53  ;;  %v6003_v53 = vld [vmem:[%s9243_s0 + $0x40] ss:$24 sps:$4 sm:$0xff]   ;;  %v6052_v10 = vld [vmem:[%s9243_s0 + $0x2d4] ss:$24 sps:$4 sm:$0xff]   ;;  %v6133_v35 = vld [vmem:[%s9242_s1 + $0x250] ss:$24 sps:$4 sm:$0xff]  }
  0x76   :  { %5202 = vmatprep.subr.bf16.mxu1 %v7130_v55  ;;  %v6013_v55 = vld [vmem:[%s9242_s1 + $0x70] ss:$24 sps:$4 sm:$0xff]  }
  0x78   :  { %2770 = vmatpush1.bf16.msra.mxu0 %v5974_v14  ;;  %v6150_v14 = vld [vmem:[%s9242_s1 + $0x284] ss:$24 sps:$4 sm:$0xff]  }
  0x79   :  { %2771 = vmatprep.subr.bf16.mxu0 %v5985_v37  ;;  %5218 = vmatpush1.bf16.msra.mxu1 %v7138_v57  ;;  %v6011_v57 = vld [vmem:[%s9243_s0 + $0x1e0] ss:$24 sps:$4 sm:$0xff]   ;;  %v6056_v37 = vld [vmem:[%s9243_s0 + $0x2d0] ss:$24 sps:$4 sm:$0xff]  }
  0x7a   :  { %2460 = vmatmul.mubr.bf16.gmra.mrb[28].mxu1 %v5981_v16  ;;  %5203 = vmatprep.subr.bf16.mxu1 %v7148_v59  ;;  %v6022_v59 = vld [vmem:[%s9242_s1 + $0xa0] ss:$24 sps:$4 sm:$0xff]  }
  0x7b   :  { %2653 = vmatmul.mubr.bf16.gmra.mrb[28].mxu0 %v5982_v39  ;;  %2469 = vmatprep.mubr.bf16.mxu1 %v5989_v20  ;;  %v6148_v16 = vld [vmem:[%s9242_s1 + $0x280] ss:$24 sps:$4 sm:$0xff]   ;;  %v6064_v20 = vld [vmem:[%s9243_s0 + $0x194] ss:$24 sps:$4 sm:$0xff]  }
  0x7c   :  { %2772 = vmatpush1.bf16.msra.mxu0 %v5983_v18  ;;  %2775 = vmatprep.mubr.bf16.mxu0 %v5993_v41  ;;  %v6057_v39 = vld [vmem:[%s9243_s0 + $0x160] ss:$24 sps:$4 sm:$0xff]   ;;  %v6165_v18 = vld [vmem:[%s9242_s1 + $0x2b4] ss:$24 sps:$4 sm:$0xff]   ;;  %v6163_v41 = vld [vmem:[%s9242_s1 + $0x2b0] ss:$24 sps:$4 sm:$0xff]  }
  0x7d   :  { %2773 = vmatprep.subr.bf16.mxu0 %v5988_v1  ;;  %5219 = vmatpush1.bf16.msra.mxu1 %v7156_v61  ;;  %v6018_v61 = vld [vmem:[%s9243_s0 + $0xa4] ss:$24 sps:$4 sm:$0xff]  }
  0x7e   :  { %5204 = vmatprep.subr.bf16.mxu1 %v7166_v63  ;;  %v6031_v63 = vld [vmem:[%s9242_s1 + $0xd0] ss:$24 sps:$4 sm:$0xff]   ;;  %v6063_v1 = vld [vmem:[%s9243_s0 + $0x18c] ss:$24 sps:$4 sm:$0xff]  }
  0x80   :  { %2774 = vmatpush1.bf16.msra.mxu0 %v5986_v3  ;;  %v6180_v3 = vld [vmem:[%s9242_s1 + $0x2e4] ss:$24 sps:$4 sm:$0xff]  }
  0x81   :  { %3515 = vmatprep.subr.bf16.mxu0 %v5997_v43  ;;  %5220 = vmatpush1.bf16.msra.mxu1 %v7175_v2  ;;  %v6051_v2 = vld [vmem:[%s9242_s1 + $0x134] ss:$24 sps:$4 sm:$0xff]   ;;  %v6061_v43 = vld [vmem:[%s9243_s0 + $0x188] ss:$24 sps:$4 sm:$0xff]  }
  0x82   :  { %2470 = vmatmul.mubr.bf16.gmra.mrb[32].mxu1 %v5994_v22  ;;  %2936 = vmatprep.subr.bf16.mxu1 %v6069_v36  ;;  %v6178_v22 = vld [vmem:[%s9242_s1 + $0x2e0] ss:$24 sps:$4 sm:$0xff]  }
  0x83   :  { %2776 = vmatmul.mubr.bf16.vlgmr.msra.gmra.mrb[0].mxu0 %v5991_v45  ;;  %2479 = vmatprep.mubr.bf16.mxu1 %v5998_v26  ;;  %v6066_v45 = vld [vmem:[%s9243_s0 + $0x190] ss:$24 sps:$4 sm:$0xff]   ;;  %v6186_v26 = vld [vmem:[%s9242_s1 + $0x314] ss:$24 sps:$4 sm:$0xff]  }
  0x84   :  { %3516 = vmatpush1.bf16.msra.mxu0 %v5995_v24  ;;  %2785 = vmatprep.mubr.bf16.mxu0 %v6000_v5  ;;  %v6067_v24 = vld [vmem:[%s9242_s1 + $0x8] ss:$24 sps:$4 sm:$0xff]   ;;  %v6072_v5 = vld [vmem:[%s9242_s1 + $0x3c] ss:$24 sps:$4 sm:$0xff]  }
  0x85   :  { %3517 = vmatprep.subr.bf16.mxu0 %v6006_v47  ;;  %v6076_v47 = vld [vmem:[%s9243_s0 + $0x1bc] ss:$24 sps:$4 sm:$0xff]   ;;  %v6095_v36 = vld [vmem:[%s9243_s0 + $0x1e8] ss:$24 sps:$4 sm:$0xff]  }
  0x88   :  { %3518 = vmatpush1.bf16.msra.mxu0 %v6004_v51  ;;  %v6078_v51 = vld [vmem:[%s9243_s0 + $0x1c4] ss:$24 sps:$4 sm:$0xff]  }
  0x89   :  { %3519 = vmatprep.subr.bf16.mxu0 %v6015_v28  ;;  %v6070_v28 = vld [vmem:[%s9242_s1 + $0x38] ss:$24 sps:$4 sm:$0xff]  }
  0x8a   :  { %2480 = vmatmul.mubr.bf16.gmra.mrb[36].mxu1 %v6002_v7  ;;  %v6084_v7 = vld [vmem:[%s9242_s1 + $0x6c] ss:$24 sps:$4 sm:$0xff]  }
  0x8b   :  { %2786 = vmatmul.mubr.bf16.gmra.mrb[4].mxu0 %v6003_v53  ;;  %2489 = vmatprep.mubr.bf16.mxu1 %v6007_v30  ;;  %v6080_v53 = vld [vmem:[%s9243_s0 + $0x1b8] ss:$24 sps:$4 sm:$0xff]  }
  0x8c   :  { %2795 = vmatprep.mubr.bf16.mxu0 %v6009_v9  ;;  %3520 = vmatpush1.bf16.msra.mxu0 %v6013_v55  ;;  %v6081_v30 = vld [vmem:[%s9243_s0 + $0x1c0] ss:$24 sps:$4 sm:$0xff]   ;;  %v6087_v55 = vld [vmem:[%s9242_s1 + $0x9c] ss:$24 sps:$4 sm:$0xff]  }
  0x8d   :  { %3521 = vmatprep.subr.bf16.mxu0 %v6024_v32  ;;  %v6082_v9 = vld [vmem:[%s9242_s1 + $0x68] ss:$24 sps:$4 sm:$0xff]   ;;  %v6091_v32 = vld [vmem:[%s9243_s0 + $0x1ec] ss:$24 sps:$4 sm:$0xff]  }
  0x90   :  { %3522 = vmatpush1.bf16.msra.mxu0 %v6022_v59  ;;  %v6085_v59 = vld [vmem:[%s9242_s1 + $0x98] ss:$24 sps:$4 sm:$0xff]  }
  0x91   :  { %3523 = vmatprep.subr.bf16.mxu0 %v6033_v34  ;;  %v6099_v34 = vld [vmem:[%s9242_s1 + $0xcc] ss:$24 sps:$4 sm:$0xff]  }
  0x92   :  { %2490 = vmatmul.mubr.bf16.gmra.mrb[40].mxu1 %v6011_v57  ;;  %v6093_v57 = vld [vmem:[%s9243_s0 + $0x1f4] ss:$24 sps:$4 sm:$0xff]  }
  0x93   :  { %2796 = vmatmul.mubr.bf16.gmra.mrb[8].mxu0 %v6012_v11  ;;  %2499 = vmatprep.mubr.bf16.mxu1 %v6016_v38  ;;  %v6096_v11 = vld [vmem:[%s9243_s0 + $0x1f0] ss:$24 sps:$4 sm:$0xff]  }
  0x94   :  { %2805 = vmatprep.mubr.bf16.mxu0 %v6018_v61  ;;  %3524 = vmatpush1.bf16.msra.mxu0 %v6031_v63  ;;  %v6097_v38 = vld [vmem:[%s9242_s1 + $0xc8] ss:$24 sps:$4 sm:$0xff]   ;;  %v6102_v61 = vld [vmem:[%s9242_s1 + $0xfc] ss:$24 sps:$4 sm:$0xff]  }
  0x95   :  { %3525 = vmatprep.subr.bf16.mxu0 %v6042_v13  ;;  %v6106_v63 = vld [vmem:[%s9243_s0 + $0x21c] ss:$24 sps:$4 sm:$0xff]  }
  0x96   :  { %v6108_v13 = vld [vmem:[%s9243_s0 + $0x224] ss:$24 sps:$4 sm:$0xff]  }
  0x98   :  { %3526 = vmatpush1.bf16.msra.mxu0 %v6040_v40  ;;  %v6100_v40 = vld [vmem:[%s9242_s1 + $0xf8] ss:$24 sps:$4 sm:$0xff]  }
  0x99   :  { %3527 = vmatprep.subr.bf16.mxu0 %v6051_v2  ;;  %v6110_v2 = vld [vmem:[%s9243_s0 + $0x218] ss:$24 sps:$4 sm:$0xff]  }
  0x9a   :  { %2500 = vmatmul.mubr.bf16.gmra.mrb[44].mxu1 %v6020_v15  ;;  %v6114_v15 = vld [vmem:[%s9242_s1 + $0x12c] ss:$24 sps:$4 sm:$0xff]  }
  0x9b   :  { %2806 = vmatmul.mubr.bf16.gmra.mrb[12].mxu0 %v6021_v42  ;;  %2509 = vmatprep.mubr.bf16.mxu1 %v6025_v44  ;;  %v6111_v42 = vld [vmem:[%s9243_s0 + $0x220] ss:$24 sps:$4 sm:$0xff]  }
  0x9c   :  { %2815 = vmatprep.mubr.bf16.mxu0 %v6027_v46  ;;  %3528 = vmatpush1.bf16.msra.mxu0 %v6049_v17  ;;  %v6112_v44 = vld [vmem:[%s9242_s1 + $0x128] ss:$24 sps:$4 sm:$0xff]   ;;  %v6121_v46 = vld [vmem:[%s9243_s0 + $0x24c] ss:$24 sps:$4 sm:$0xff]   ;;  %v6117_v17 = vld [vmem:[%s9242_s1 + $0x15c] ss:$24 sps:$4 sm:$0xff]  }
  0x9d   :  { %3529 = vmatprep.subr.bf16.mxu0 %v6060_v48  ;;  %v6123_v48 = vld [vmem:[%s9243_s0 + $0x254] ss:$24 sps:$4 sm:$0xff]  }
  0xa0   :  { %3530 = vmatpush1.bf16.msra.mxu0 %v6058_v19  ;;  %v6115_v19 = vld [vmem:[%s9242_s1 + $0x158] ss:$24 sps:$4 sm:$0xff]  }
  0xa1   :  { %3531 = vmatprep.subr.bf16.mxu0 %v6075_v21  ;;  %v6129_v21 = vld [vmem:[%s9242_s1 + $0x18c] ss:$24 sps:$4 sm:$0xff]  }
  0xa2   :  { %2510 = vmatmul.mubr.bf16.gmra.mrb[48].mxu1 %v6029_v49  ;;  %v6125_v49 = vld [vmem:[%s9243_s0 + $0x248] ss:$24 sps:$4 sm:$0xff]  }
  0xa3   :  { %2816 = vmatmul.mubr.bf16.gmra.mrb[16].mxu0 %v6030_v50  ;;  %2519 = vmatprep.mubr.bf16.mxu1 %v6034_v52  ;;  %v6126_v50 = vld [vmem:[%s9243_s0 + $0x250] ss:$24 sps:$4 sm:$0xff]  }
  0xa4   :  { %2825 = vmatprep.mubr.bf16.mxu0 %v6036_v54  ;;  %3532 = vmatpush1.bf16.msra.mxu0 %v6073_v23  ;;  %v6127_v52 = vld [vmem:[%s9242_s1 + $0x188] ss:$24 sps:$4 sm:$0xff]   ;;  %v6136_v54 = vld [vmem:[%s9243_s0 + $0x27c] ss:$24 sps:$4 sm:$0xff]  }
  0xa5   :  { %3533 = vmatprep.subr.bf16.mxu0 %v6090_v56  ;;  %v6132_v23 = vld [vmem:[%s9242_s1 + $0x1bc] ss:$24 sps:$4 sm:$0xff]  }
  0xa6   :  { %v6138_v56 = vld [vmem:[%s9243_s0 + $0x284] ss:$24 sps:$4 sm:$0xff]  }
  0xa8   :  { %3534 = vmatpush1.bf16.msra.mxu0 %v6088_v25  ;;  %v6130_v25 = vld [vmem:[%s9242_s1 + $0x1b8] ss:$24 sps:$4 sm:$0xff]  }
  0xa9   :  { %3535 = vmatprep.subr.bf16.mxu0 %v6105_v27  ;;  %v6140_v27 = vld [vmem:[%s9243_s0 + $0x278] ss:$24 sps:$4 sm:$0xff]  }
  0xaa   :  { %2520 = vmatmul.mubr.bf16.gmra.mrb[52].mxu1 %v6038_v58  ;;  %v6144_v58 = vld [vmem:[%s9242_s1 + $0x1ec] ss:$24 sps:$4 sm:$0xff]  }
  0xab   :  { %2826 = vmatmul.mubr.bf16.gmra.mrb[20].mxu0 %v6039_v60  ;;  %2529 = vmatprep.mubr.bf16.mxu1 %v6043_v62  ;;  %v6141_v60 = vld [vmem:[%s9243_s0 + $0x280] ss:$24 sps:$4 sm:$0xff]  }
  0xac   :  { %2835 = vmatprep.mubr.bf16.mxu0 %v6045_v0  ;;  %3536 = vmatpush1.bf16.msra.mxu0 %v6103_v29  ;;  %v6142_v62 = vld [vmem:[%s9242_s1 + $0x1e8] ss:$24 sps:$4 sm:$0xff]   ;;  %v6151_v0 = vld [vmem:[%s9243_s0 + $0x2ac] ss:$24 sps:$4 sm:$0xff]   ;;  %v6147_v29 = vld [vmem:[%s9242_s1 + $0x21c] ss:$24 sps:$4 sm:$0xff]  }
  0xad   :  { %3537 = vmatprep.subr.bf16.mxu0 %v6120_v4  ;;  %v6153_v4 = vld [vmem:[%s9243_s0 + $0x2b4] ss:$24 sps:$4 sm:$0xff]  }
  0xb0   :  { %3538 = vmatpush1.bf16.msra.mxu0 %v6118_v31  ;;  %v6145_v31 = vld [vmem:[%s9242_s1 + $0x218] ss:$24 sps:$4 sm:$0xff]  }
  0xb1   :  { %3539 = vmatprep.subr.bf16.mxu0 %v6135_v6  ;;  %v6155_v6 = vld [vmem:[%s9243_s0 + $0x2a8] ss:$24 sps:$4 sm:$0xff]  }
  0xb2   :  { %2530 = vmatmul.mubr.bf16.gmra.mrb[56].mxu1 %v6047_v33  ;;  %v6159_v33 = vld [vmem:[%s9242_s1 + $0x24c] ss:$24 sps:$4 sm:$0xff]  }
  0xb3   :  { %2836 = vmatmul.mubr.bf16.gmra.mrb[24].mxu0 %v6048_v8  ;;  %2539 = vmatprep.mubr.bf16.mxu1 %v6052_v10  ;;  %v6156_v8 = vld [vmem:[%s9243_s0 + $0x2b0] ss:$24 sps:$4 sm:$0xff]  }
  0xb4   :  { %2845 = vmatprep.mubr.bf16.mxu0 %v6054_v12  ;;  %3540 = vmatpush1.bf16.msra.mxu0 %v6133_v35  ;;  %v6157_v10 = vld [vmem:[%s9242_s1 + $0x248] ss:$24 sps:$4 sm:$0xff]   ;;  %v6166_v12 = vld [vmem:[%s9243_s0 + $0x2dc] ss:$24 sps:$4 sm:$0xff]  }
  0xb5   :  { %3541 = vmatprep.subr.bf16.mxu0 %v6150_v14  ;;  %v6162_v35 = vld [vmem:[%s9242_s1 + $0x27c] ss:$24 sps:$4 sm:$0xff]  }
  0xb6   :  { %v6168_v14 = vld [vmem:[%s9243_s0 + $0x2e4] ss:$24 sps:$4 sm:$0xff]  }
  0xb8   :  { %3542 = vmatpush1.bf16.msra.mxu0 %v6148_v16  ;;  %v6174_v16 = vld [vmem:[%s9242_s1 + $0x2ac] ss:$24 sps:$4 sm:$0xff]  }
  0xb9   :  { %3543 = vmatprep.subr.bf16.mxu0 %v6165_v18  ;;  %v6171_v18 = vld [vmem:[%s9243_s0 + $0x2e0] ss:$24 sps:$4 sm:$0xff]  }
  0xba   :  { %2540 = vmatmul.mubr.bf16.gmra.mrb[60].mxu1 %v6056_v37  ;;  %v6160_v37 = vld [vmem:[%s9242_s1 + $0x278] ss:$24 sps:$4 sm:$0xff]  }
  0xbb   :  { %2846 = vmatmul.mubr.bf16.gmra.mrb[28].mxu0 %v6057_v39  ;;  %2662 = vmatprep.mubr.bf16.mxu1 %v6063_v1  ;;  %v6170_v39 = vld [vmem:[%s9243_s0 + $0x2d8] ss:$24 sps:$4 sm:$0xff]   ;;  %v6172_v1 = vld [vmem:[%s9242_s1 + $0x2a8] ss:$24 sps:$4 sm:$0xff]  }
  0xbc   :  { %2855 = vmatprep.mubr.bf16.mxu0 %v6064_v20  ;;  %3544 = vmatpush1.bf16.msra.mxu0 %v6163_v41  ;;  %v6177_v20 = vld [vmem:[%s9242_s1 + $0x2dc] ss:$24 sps:$4 sm:$0xff]   ;;  %v6175_v41 = vld [vmem:[%s9242_s1 + $0x2d8] ss:$24 sps:$4 sm:$0xff]  }
  0xbd   :  { %3545 = vmatprep.subr.bf16.mxu0 %v6180_v3  ;;  %v6757_v3 = vld [vmem:[%s9243_s0 + $0x4] ss:$24 sps:$4 sm:$0xff]  }
  0xc0   :  { %3546 = vmatpush1.bf16.msra.mxu0 %v6178_v22  ;;  %v6184_v22 = vld [vmem:[%s9242_s1 + $0x310] ss:$24 sps:$4 sm:$0xff]  }
  0xc1   :  { %3708 = vmatprep.subr.bf16.mxu0 %v6186_v26  ;;  %v6192_v26 = vld [vmem:[%s9242_s1 + $0x344] ss:$24 sps:$4 sm:$0xff]  }
  0xc2   :  { %2663 = vmatmul.mubr.bf16.vlgmr.msra.gmra.mrb[32].mxu1 %v6061_v43  ;;  %v6183_v43 = vld [vmem:[%s9242_s1 + $0x30c] ss:$24 sps:$4 sm:$0xff]  }
  0xc3   :  { %2856 = vmatmul.mubr.bf16.gmra.mrb[32].mxu0 %v6066_v45  ;;  %2937 = vmatpush1.bf16.msra.mxu1 %v6067_v24  ;;  %v6181_v45 = vld [vmem:[%s9242_s1 + $0x308] ss:$24 sps:$4 sm:$0xff]   ;;  %v6189_v24 = vld [vmem:[%s9242_s1 + $0x33c] ss:$24 sps:$4 sm:$0xff]  }
  0xc4   :  { %2672 = vmatprep.mubr.bf16.mxu1 %v6076_v47  ;;  %2938 = vmatprep.subr.bf16.mxu1 %v6072_v5  ;;  %v6758_v5 = vld [vmem:[%s9243_s0] ss:$24 sps:$4 sm:$0xff]  }
  0xc5   :  { %2865 = vmatprep.mubr.bf16.mxu0 %v6078_v51  ;;  %v6187_v47 = vld [vmem:[%s9242_s1 + $0x338] ss:$24 sps:$4 sm:$0xff]  }
  0xc6   :  { %v6190_v51 = vld [vmem:[%s9242_s1 + $0x340] ss:$24 sps:$4 sm:$0xff]  }
  0xc7   :  { %2939 = vmatpush1.bf16.msra.mxu1 %v6070_v28  ;;  %v6759_v28 = vld [vmem:[%s9243_s0 + $0x34] ss:$24 sps:$4 sm:$0xff]  }
  0xc8   :  { %2940 = vmatprep.subr.bf16.mxu1 %v6084_v7  ;;  %v6195_v7 = vld [vmem:[%s9242_s1 + $0x36c] ss:$24 sps:$4 sm:$0xff]  }
  0xca   :  { %2673 = vmatmul.mubr.bf16.gmra.mrb[36].mxu1 %v6080_v53  ;;  %v6198_v53 = vld [vmem:[%s9242_s1 + $0x374] ss:$24 sps:$4 sm:$0xff]  }
  0xcb   :  { %2866 = vmatmul.mubr.bf16.gmra.mrb[36].mxu0 %v6081_v30  ;;  %2941 = vmatpush1.bf16.msra.mxu1 %v6082_v9  ;;  %v6193_v30 = vld [vmem:[%s9242_s1 + $0x368] ss:$24 sps:$4 sm:$0xff]  }
  0xcc   :  { %2682 = vmatprep.mubr.bf16.mxu1 %v6091_v32  ;;  %2942 = vmatprep.subr.bf16.mxu1 %v6087_v55  ;;  %v6196_v9 = vld [vmem:[%s9242_s1 + $0x370] ss:$24 sps:$4 sm:$0xff]   ;;  %v6201_v55 = vld [vmem:[%s9242_s1 + $0x39c] ss:$24 sps:$4 sm:$0xff]  }
  0xcd   :  { %2875 = vmatprep.mubr.bf16.mxu0 %v6093_v57  ;;  %v6204_v32 = vld [vmem:[%s9242_s1 + $0x3a4] ss:$24 sps:$4 sm:$0xff]   ;;  %v6760_v57 = vld [vmem:[%s9243_s0 + $0x30] ss:$24 sps:$4 sm:$0xff]  }
  0xcf   :  { %2943 = vmatpush1.bf16.msra.mxu1 %v6085_v59  ;;  %v6761_v59 = vld [vmem:[%s9243_s0 + $0x64] ss:$24 sps:$4 sm:$0xff]  }
  0xd0   :  { %2944 = vmatprep.subr.bf16.mxu1 %v6099_v34  ;;  %v6199_v34 = vld [vmem:[%s9242_s1 + $0x398] ss:$24 sps:$4 sm:$0xff]  }
  0xd2   :  { %2683 = vmatmul.mubr.bf16.gmra.mrb[40].mxu1 %v6095_v36  ;;  %v6202_v36 = vld [vmem:[%s9242_s1 + $0x3a0] ss:$24 sps:$4 sm:$0xff]  }
  0xd3   :  { %2876 = vmatmul.mubr.bf16.gmra.mrb[40].mxu0 %v6096_v11  ;;  %2945 = vmatpush1.bf16.msra.mxu1 %v6097_v38  ;;  %v6207_v11 = vld [vmem:[%s9242_s1 + $0x3cc] ss:$24 sps:$4 sm:$0xff]  }
  0xd4   :  { %2692 = vmatprep.mubr.bf16.mxu1 %v6106_v63  ;;  %2946 = vmatprep.subr.bf16.mxu1 %v6102_v61  ;;  %v6210_v38 = vld [vmem:[%s9242_s1 + $0x3d4] ss:$24 sps:$4 sm:$0xff]   ;;  %v6205_v61 = vld [vmem:[%s9242_s1 + $0x3c8] ss:$24 sps:$4 sm:$0xff]  }
  0xd5   :  { %2885 = vmatprep.mubr.bf16.mxu0 %v6108_v13  ;;  %v6208_v63 = vld [vmem:[%s9242_s1 + $0x3d0] ss:$24 sps:$4 sm:$0xff]   ;;  %v6213_v13 = vld [vmem:[%s9242_s1 + $0x3fc] ss:$24 sps:$4 sm:$0xff]  }
  0xd7   :  { %2947 = vmatpush1.bf16.msra.mxu1 %v6100_v40  ;;  %v6216_v40 = vld [vmem:[%s9242_s1 + $0x404] ss:$24 sps:$4 sm:$0xff]  }
  0xd8   :  { %2948 = vmatprep.subr.bf16.mxu1 %v6114_v15  ;;  %v6762_v15 = vld [vmem:[%s9243_s0 + $0x60] ss:$24 sps:$4 sm:$0xff]  }
  0xda   :  { %2693 = vmatmul.mubr.bf16.gmra.mrb[44].mxu1 %v6110_v2  ;;  %v6763_v2 = vld [vmem:[%s9243_s0 + $0x94] ss:$24 sps:$4 sm:$0xff]  }
  0xdb   :  { %2886 = vmatmul.mubr.bf16.gmra.mrb[44].mxu0 %v6111_v42  ;;  %2949 = vmatpush1.bf16.msra.mxu1 %v6112_v44  ;;  %v6211_v42 = vld [vmem:[%s9242_s1 + $0x3f8] ss:$24 sps:$4 sm:$0xff]  }
  0xdc   :  { %2702 = vmatprep.mubr.bf16.mxu1 %v6121_v46  ;;  %2950 = vmatprep.subr.bf16.mxu1 %v6117_v17  ;;  %v6214_v44 = vld [vmem:[%s9242_s1 + $0x400] ss:$24 sps:$4 sm:$0xff]   ;;  %v6219_v17 = vld [vmem:[%s9242_s1 + $0x42c] ss:$24 sps:$4 sm:$0xff]  }
  0xdd   :  { %2895 = vmatprep.mubr.bf16.mxu0 %v6123_v48  ;;  %v6222_v48 = vld [vmem:[%s9242_s1 + $0x434] ss:$24 sps:$4 sm:$0xff]  }
  0xdf   :  { %2951 = vmatpush1.bf16.msra.mxu1 %v6115_v19 }
  0xe0   :  { %2952 = vmatprep.subr.bf16.mxu1 %v6129_v21 }
  0xe2   :  { %2703 = vmatmul.mubr.bf16.gmra.mrb[48].mxu1 %v6125_v49 }
  0xe3   :  { %2896 = vmatmul.mubr.bf16.gmra.mrb[48].mxu0 %v6126_v50  ;;  %2953 = vmatpush1.bf16.msra.mxu1 %v6127_v52  ;;  %v6217_v50 = vld [vmem:[%s9242_s1 + $0x428] ss:$24 sps:$4 sm:$0xff]  }
  0xe4   :  { %2712 = vmatprep.mubr.bf16.mxu1 %v6136_v54  ;;  %2954 = vmatprep.subr.bf16.mxu1 %v6132_v23  ;;  %v6220_v52 = vld [vmem:[%s9242_s1 + $0x430] ss:$24 sps:$4 sm:$0xff]   ;;  %v6225_v54 = vld [vmem:[%s9242_s1 + $0x45c] ss:$24 sps:$4 sm:$0xff]  }
  0xe5   :  { %2905 = vmatprep.mubr.bf16.mxu0 %v6138_v56  ;;  %v6228_v23 = vld [vmem:[%s9242_s1 + $0x464] ss:$24 sps:$4 sm:$0xff]   ;;  %v6764_v56 = vld [vmem:[%s9243_s0 + $0x90] ss:$24 sps:$4 sm:$0xff]  }
  0xe7   :  { %2955 = vmatpush1.bf16.msra.mxu1 %v6130_v25  ;;  %v6765_v25 = vld [vmem:[%s9243_s0 + $0xc4] ss:$24 sps:$4 sm:$0xff]  }
  0xe8   :  { %2956 = vmatprep.subr.bf16.mxu1 %v6144_v58  ;;  %v6223_v58 = vld [vmem:[%s9242_s1 + $0x458] ss:$24 sps:$4 sm:$0xff]  }
  0xea   :  { %2713 = vmatmul.mubr.bf16.gmra.mrb[52].mxu1 %v6140_v27  ;;  %v6226_v27 = vld [vmem:[%s9242_s1 + $0x460] ss:$24 sps:$4 sm:$0xff]  }
  0xeb   :  { %2906 = vmatmul.mubr.bf16.gmra.mrb[52].mxu0 %v6141_v60  ;;  %2957 = vmatpush1.bf16.msra.mxu1 %v6142_v62  ;;  %v6231_v62 = vld [vmem:[%s9242_s1 + $0x48c] ss:$24 sps:$4 sm:$0xff]  }
  0xec   :  { %2722 = vmatprep.mubr.bf16.mxu1 %v6151_v0  ;;  %2958 = vmatprep.subr.bf16.mxu1 %v6147_v29  ;;  %v6234_v0 = vld [vmem:[%s9242_s1 + $0x494] ss:$24 sps:$4 sm:$0xff]  }
  0xed   :  { %2915 = vmatprep.mubr.bf16.mxu0 %v6153_v4 }
  0xef   :  { %2959 = vmatpush1.bf16.msra.mxu1 %v6145_v31 }
  0xf0   :  { %2960 = vmatprep.subr.bf16.mxu1 %v6159_v33  ;;  %v6229_v33 = vld [vmem:[%s9242_s1 + $0x488] ss:$24 sps:$4 sm:$0xff]  }
  0xf2   :  { %2723 = vmatmul.mubr.bf16.gmra.mrb[56].mxu1 %v6155_v6  ;;  %v6232_v6 = vld [vmem:[%s9242_s1 + $0x490] ss:$24 sps:$4 sm:$0xff]  }
  0xf3   :  { %2916 = vmatmul.mubr.bf16.gmra.mrb[56].mxu0 %v6156_v8  ;;  %2961 = vmatpush1.bf16.msra.mxu1 %v6157_v10  ;;  %v6237_v8 = vld [vmem:[%s9242_s1 + $0x4bc] ss:$24 sps:$4 sm:$0xff]  }
  0xf4   :  { %2732 = vmatprep.mubr.bf16.mxu1 %v6166_v12  ;;  %2962 = vmatprep.subr.bf16.mxu1 %v6162_v35  ;;  %v6240_v10 = vld [vmem:[%s9242_s1 + $0x4c4] ss:$24 sps:$4 sm:$0xff]   ;;  %v6766_v12 = vld [vmem:[%s9243_s0 + $0xc0] ss:$24 sps:$4 sm:$0xff]   ;;  %v6767_v35 = vld [vmem:[%s9243_s0 + $0xf4] ss:$24 sps:$4 sm:$0xff]  }
  0xf5   :  { %2925 = vmatprep.mubr.bf16.mxu0 %v6168_v14  ;;  %v6235_v14 = vld [vmem:[%s9242_s1 + $0x4b8] ss:$24 sps:$4 sm:$0xff]  }
  0xf7   :  { %2963 = vmatpush1.bf16.msra.mxu1 %v6160_v37  ;;  %v6238_v37 = vld [vmem:[%s9242_s1 + $0x4c0] ss:$24 sps:$4 sm:$0xff]  }
  0xf8   :  { %2964 = vmatprep.subr.bf16.mxu1 %v6174_v16 }
  0xfa   :  { %2733 = vmatmul.mubr.bf16.gmra.mrb[60].mxu1 %v6170_v39  ;;  %v6243_v39 = vld [vmem:[%s9242_s1 + $0x4ec] ss:$24 sps:$4 sm:$0xff]  }
  0xfb   :  { %2926 = vmatmul.mubr.bf16.gmra.mrb[60].mxu0 %v6171_v18  ;;  %2965 = vmatpush1.bf16.msra.mxu1 %v6172_v1  ;;  %v6246_v18 = vld [vmem:[%s9242_s1 + $0x4f4] ss:$24 sps:$4 sm:$0xff]  }
  0xfc   :  { %2968 = vmatprep.mubr.bf16.mxu1 %v6757_v3  ;;  %2966 = vmatprep.subr.bf16.mxu1 %v6177_v20 }
  0xfd   :  { %3547 = vmatprep.mubr.bf16.mxu0 %v6757_v3  ;;  %v6241_v3 = vld [vmem:[%s9242_s1 + $0x4e8] ss:$24 sps:$4 sm:$0xff]  }
  0xff   :  { %2967 = vmatpush1.bf16.msra.mxu1 %v6175_v41 }
 0x100   :  { %3129 = vmatprep.subr.bf16.mxu1 %v6183_v43  ;;  %v6244_v43 = vld [vmem:[%s9242_s1 + $0x4f0] ss:$24 sps:$4 sm:$0xff]  }
 0x102   :  { %2969 = vmatmul.mubr.bf16.vlgmr.msra.gmra.mrb[64].mxu1 %v6758_v5 }
 0x103   :  { %3548 = vmatmul.mubr.bf16.vlgmr.msra.gmra.mrb[64].mxu0 %v6758_v5  ;;  %3130 = vmatpush1.bf16.msra.mxu1 %v6181_v45  ;;  %v6249_v45 = vld [vmem:[%s9242_s1 + $0x51c] ss:$24 sps:$4 sm:$0xff]   ;;  %v6247_v5 = vld [vmem:[%s9242_s1 + $0x518] ss:$24 sps:$4 sm:$0xff]  }
 0x104   :  { %3709 = vmatpush1.bf16.msra.mxu0 %v6184_v22  ;;  %2978 = vmatprep.mubr.bf16.mxu1 %v6759_v28  ;;  %v6252_v22 = vld [vmem:[%s9242_s1 + $0x524] ss:$24 sps:$4 sm:$0xff]  }
 0x105   :  { %3557 = vmatprep.mubr.bf16.mxu0 %v6759_v28  ;;  %3131 = vmatprep.subr.bf16.mxu1 %v6189_v24  ;;  %v6768_v24 = vld [vmem:[%s9243_s0 + $0xf0] ss:$24 sps:$4 sm:$0xff]   ;;  %v6255_v28 = vld [vmem:[%s9242_s1 + $0x54c] ss:$24 sps:$4 sm:$0xff]  }
 0x106   :  { %3710 = vmatprep.subr.bf16.mxu0 %v6192_v26  ;;  %v6769_v26 = vld [vmem:[%s9243_s0 + $0x124] ss:$24 sps:$4 sm:$0xff]  }
 0x107   :  { %3132 = vmatpush1.bf16.msra.mxu1 %v6187_v47  ;;  %v6250_v47 = vld [vmem:[%s9242_s1 + $0x520] ss:$24 sps:$4 sm:$0xff]  }
 0x108   :  { %3711 = vmatpush1.bf16.msra.mxu0 %v6190_v51  ;;  %3133 = vmatprep.subr.bf16.mxu1 %v6195_v7  ;;  %v6258_v7 = vld [vmem:[%s9242_s1 + $0x554] ss:$24 sps:$4 sm:$0xff]  }
 0x109   :  { %3712 = vmatprep.subr.bf16.mxu0 %v6198_v53 }
 0x10a   :  { %2979 = vmatmul.mubr.bf16.gmra.mrb[68].mxu1 %v6760_v57 }
 0x10b   :  { %3558 = vmatmul.mubr.bf16.gmra.mrb[68].mxu0 %v6760_v57  ;;  %2988 = vmatprep.mubr.bf16.mxu1 %v6761_v59  ;;  %v6261_v57 = vld [vmem:[%s9242_s1 + $0x57c] ss:$24 sps:$4 sm:$0xff]  }
 0x10c   :  { %3567 = vmatprep.mubr.bf16.mxu0 %v6761_v59  ;;  %3134 = vmatpush1.bf16.msra.mxu1 %v6193_v30  ;;  %v6264_v59 = vld [vmem:[%s9242_s1 + $0x584] ss:$24 sps:$4 sm:$0xff]  }
 0x10d   :  { %3713 = vmatpush1.bf16.msra.mxu0 %v6196_v9  ;;  %3135 = vmatprep.subr.bf16.mxu1 %v6201_v55  ;;  %v6253_v55 = vld [vmem:[%s9242_s1 + $0x548] ss:$24 sps:$4 sm:$0xff]  }
 0x10e   :  { %3714 = vmatprep.subr.bf16.mxu0 %v6204_v32  ;;  %v6256_v32 = vld [vmem:[%s9242_s1 + $0x550] ss:$24 sps:$4 sm:$0xff]  }
 0x110   :  { %3136 = vmatpush1.bf16.msra.mxu1 %v6199_v34  ;;  %v6770_v34 = vld [vmem:[%s9243_s0 + $0x120] ss:$24 sps:$4 sm:$0xff]  }
 0x111   :  { %3715 = vmatpush1.bf16.msra.mxu0 %v6202_v36  ;;  %3137 = vmatprep.subr.bf16.mxu1 %v6207_v11  ;;  %v6771_v36 = vld [vmem:[%s9243_s0 + $0x154] ss:$24 sps:$4 sm:$0xff]   ;;  %v6259_v11 = vld [vmem:[%s9242_s1 + $0x578] ss:$24 sps:$4 sm:$0xff]  }
 0x112   :  { %3716 = vmatprep.subr.bf16.mxu0 %v6210_v38  ;;  %2989 = vmatmul.mubr.bf16.gmra.mrb[72].mxu1 %v6762_v15  ;;  %v6262_v38 = vld [vmem:[%s9242_s1 + $0x580] ss:$24 sps:$4 sm:$0xff]  }
 0x113   :  { %3568 = vmatmul.mubr.bf16.gmra.mrb[72].mxu0 %v6762_v15  ;;  %2998 = vmatprep.mubr.bf16.mxu1 %v6763_v2 }
 0x114   :  { %3577 = vmatprep.mubr.bf16.mxu0 %v6763_v2  ;;  %3138 = vmatpush1.bf16.msra.mxu1 %v6205_v61 }
 0x115   :  { %3717 = vmatpush1.bf16.msra.mxu0 %v6208_v63  ;;  %v7874_v46 = vpop.f32.mrb[0].mxu1  ;;  %3139 = vmatprep.subr.bf16.mxu1 %v6213_v13  ;;  %v6267_v63 = vld [vmem:[%s9242_s1 + $0x5ac] ss:$24 sps:$4 sm:$0xff]  }
 0x116   :  { %3718 = vmatprep.subr.bf16.mxu0 %v6216_v40  ;;  %v7882_v19 = vpop.f32.mrb[1].mxu1  ;;  %v6270_v13 = vld [vmem:[%s9242_s1 + $0x5b4] ss:$24 sps:$4 sm:$0xff]  }
 0x117   :  { %v7884_v21 = vpop.f32.mrb[2].mxu1 }
 0x118   :  { %v7886_v49 = vpop.f32.mrb[3].mxu1  ;;  %3140 = vmatpush1.bf16.msra.mxu1 %v6211_v42  ;;  %v6265_v42 = vld [vmem:[%s9242_s1 + $0x5a8] ss:$24 sps:$4 sm:$0xff]  }
 0x119   :  { %3719 = vmatpush1.bf16.msra.mxu0 %v6214_v44  ;;  %3141 = vmatprep.subr.bf16.mxu1 %v6219_v17  ;;  %v6268_v44 = vld [vmem:[%s9242_s1 + $0x5b0] ss:$24 sps:$4 sm:$0xff]   ;;  %v6273_v17 = vld [vmem:[%s9242_s1 + $0x5dc] ss:$24 sps:$4 sm:$0xff]  }
 0x11a   :  { %3720 = vmatprep.subr.bf16.mxu0 %v6222_v48  ;;  %2999 = vmatmul.mubr.bf16.gmra.mrb[76].mxu1 %v6764_v56  ;;  %v6276_v48 = vld [vmem:[%s9242_s1 + $0x5e4] ss:$24 sps:$4 sm:$0xff]  }
 0x11b   :  { %3578 = vmatmul.mubr.bf16.gmra.mrb[76].mxu0 %v6764_v56  ;;  %3008 = vmatprep.mubr.bf16.mxu1 %v6765_v25 }
 0x11c   :  { %3587 = vmatprep.mubr.bf16.mxu0 %v6765_v25  ;;  %3142 = vmatpush1.bf16.msra.mxu1 %v6217_v50  ;;  %v6772_v50 = vld [vmem:[%s9243_s0 + $0x150] ss:$24 sps:$4 sm:$0xff]   ;;  %v6279_v25 = vld [vmem:[%s9242_s1 + $0x60c] ss:$24 sps:$4 sm:$0xff]  }
 0x11d   :  { %3721 = vmatpush1.bf16.msra.mxu0 %v6220_v52  ;;  %v7912_v60 = vpop.f32.mrb[4].mxu1  ;;  %3143 = vmatprep.subr.bf16.mxu1 %v6225_v54  ;;  %v6773_v52 = vld [vmem:[%s9243_s0 + $0x184] ss:$24 sps:$4 sm:$0xff]   ;;  %v6271_v54 = vld [vmem:[%s9242_s1 + $0x5d8] ss:$24 sps:$4 sm:$0xff]  }
 0x11e   :  { %3722 = vmatprep.subr.bf16.mxu0 %v6228_v23  ;;  %v7920_v29 = vpop.f32.mrb[5].mxu1  ;;  %v6274_v23 = vld [vmem:[%s9242_s1 + $0x5e0] ss:$24 sps:$4 sm:$0xff]  }
 0x11f   :  { %v7922_v4 = vpop.f32.mrb[6].mxu1 }
 0x120   :  { %v7924_v31 = vpop.f32.mrb[7].mxu1  ;;  %3144 = vmatpush1.bf16.msra.mxu1 %v6223_v58  ;;  %v6282_v58 = vld [vmem:[%s9242_s1 + $0x614] ss:$24 sps:$4 sm:$0xff]  }
 0x121   :  { %3723 = vmatpush1.bf16.msra.mxu0 %v6226_v27  ;;  %3145 = vmatprep.subr.bf16.mxu1 %v6231_v62 }
 0x122   :  { %3724 = vmatprep.subr.bf16.mxu0 %v6234_v0  ;;  %3009 = vmatmul.mubr.bf16.gmra.mrb[80].mxu1 %v6766_v12 }
 0x123   :  { %3588 = vmatmul.mubr.bf16.gmra.mrb[80].mxu0 %v6766_v12  ;;  %3018 = vmatprep.mubr.bf16.mxu1 %v6767_v35 }
 0x124   :  { %3597 = vmatprep.mubr.bf16.mxu0 %v6767_v35  ;;  %3146 = vmatpush1.bf16.msra.mxu1 %v6229_v33  ;;  %v6774_v33 = vld [vmem:[%s9243_s0 + $0x180] ss:$24 sps:$4 sm:$0xff]  }
 0x125   :  { %3725 = vmatpush1.bf16.msra.mxu0 %v6232_v6  ;;  %v7950_v16 = vpop.f32.mrb[8].mxu1  ;;  %3147 = vmatprep.subr.bf16.mxu1 %v6237_v8  ;;  %v6775_v6 = vld [vmem:[%s9243_s0 + $0x1b4] ss:$24 sps:$4 sm:$0xff]   ;;  %v407_v8 = vlaneseq }
 0x126   :  { %3726 = vmatprep.subr.bf16.mxu0 %v6240_v10  ;;  %v7958_v1 = vpop.f32.mrb[9].mxu1 }
 0x127   :  { %v7960_v20 = vpop.f32.mrb[10].mxu1 }
 0x128   :  { %v7962_v41 = vpop.f32.mrb[11].mxu1  ;;  %3148 = vmatpush1.bf16.msra.mxu1 %v6235_v14  ;;  %v8090_v14 = vshrl.u32 %v407_v8, 7 }
 0x129   :  { %3727 = vmatpush1.bf16.msra.mxu0 %v6238_v37  ;;  %3149 = vmatprep.subr.bf16.mxu1 %v6243_v39  ;;  %v6776_v39 = vld [vmem:[%s9243_s0 + $0x1b0] ss:$24 sps:$4 sm:$0xff]  }
 0x12a   :  { %3728 = vmatprep.subr.bf16.mxu0 %v6246_v18  ;;  %3019 = vmatmul.mubr.bf16.gmra.mrb[84].mxu1 %v6768_v24  ;;  %v6777_v18 = vld [vmem:[%s9243_s0 + $0x1e4] ss:$24 sps:$4 sm:$0xff]  }
 0x12b   :  { %3598 = vmatmul.mubr.bf16.gmra.mrb[84].mxu0 %v6768_v24  ;;  %3028 = vmatprep.mubr.bf16.mxu1 %v6769_v26 }
 0x12c   :  { %3607 = vmatprep.mubr.bf16.mxu0 %v6769_v26  ;;  %3150 = vmatpush1.bf16.msra.mxu1 %v6241_v3  ;;  %v409_v3 = vsub.s32 0, %v8090_v14 }
 0x12d   :  { %3729 = vmatpush1.bf16.msra.mxu0 %v6244_v43  ;;  %v7988_v51 = vpop.f32.mrb[12].mxu1  ;;  %3151 = vmatprep.subr.bf16.mxu1 %v6249_v45  ;;  %v405_v43 = vld [vmem:[%s9244_s2] sm:$0x3f]  ;;  %v413_v45 = vsub.s32 1, %v8090_v14 }
 0x12e   :  { %3730 = vmatprep.subr.bf16.mxu0 %v6252_v22  ;;  %v7996_v53 = vpop.f32.mrb[13].mxu1 }
 0x12f   :  { %v7998_v30 = vpop.f32.mrb[14].mxu1 }
 0x130   :  { %v8000_v9 = vpop.f32.mrb[15].mxu1  ;;  %3152 = vmatpush1.bf16.msra.mxu1 %v6247_v5  ;;  %v8111_v5 = vrot.slane %v405_v43, %v409_v3 }
 0x131   :  { %3731 = vmatpush1.bf16.msra.mxu0 %v6250_v47  ;;  %3153 = vmatprep.subr.bf16.mxu1 %v6255_v28  ;;  %v8115_v28 = vrot.slane %v405_v43, %v413_v45 }
 0x132   :  { %3732 = vmatprep.subr.bf16.mxu0 %v6258_v7  ;;  %3029 = vmatmul.mubr.bf16.gmra.mrb[88].mxu1 %v6770_v34  ;;  %v6778_v7 = vld [vmem:[%s9243_s0 + $0x1e0] ss:$24 sps:$4 sm:$0xff]  }
 0x133   :  { %3608 = vmatmul.mubr.bf16.gmra.mrb[88].mxu0 %v6770_v34  ;;  %3038 = vmatprep.mubr.bf16.mxu1 %v6771_v36  ;;  %v2396_v34 = vadd.f32 %v7884_v21, %v8111_v5  ;;  %v2402_v21 = vadd.f32 %v7912_v60, %v8111_v5 }
 0x134   :  { %3617 = vmatprep.mubr.bf16.mxu0 %v6771_v36  ;;  %3154 = vmatpush1.bf16.msra.mxu1 %v6253_v55  ;;  %v6779_v55 = vld [vmem:[%s9243_s0 + $0x214] ss:$24 sps:$4 sm:$0xff]  }
 0x135   :  { %3733 = vmatpush1.bf16.msra.mxu0 %v6256_v32  ;;  %v8026_v61 = vpop.f32.mrb[16].mxu1  ;;  %3155 = vmatprep.subr.bf16.mxu1 %v6261_v57  ;;  %v2392_v32 = vadd.f32 %v7874_v46, %v8111_v5  ;;  %v2394_v57 = vadd.f32 %v7882_v19, %v8115_v28  ;;  %v6780_v46 = vld [vmem:[%s9243_s0 + $0x210] ss:$24 sps:$4 sm:$0xff]   ;;  %v6781_v19 = vld [vmem:[%s9243_s0 + $0x244] ss:$24 sps:$4 sm:$0xff]  }
 0x136   :  { %3734 = vmatprep.subr.bf16.mxu0 %v6264_v59  ;;  %v8034_v40 = vpop.f32.mrb[17].mxu1 }
 0x137   :  { %v8036_v15 = vpop.f32.mrb[18].mxu1 }
 0x138   :  { %v8038_v2 = vpop.f32.mrb[19].mxu1  ;;  %3156 = vmatpush1.bf16.msra.mxu1 %v6259_v11 }
 0x139   :  { %3735 = vmatpush1.bf16.msra.mxu0 %v6262_v38  ;;  %3157 = vmatprep.subr.bf16.mxu1 %v6267_v63  ;;  %v2398_v38 = vadd.f32 %v7886_v49, %v8115_v28  ;;  %v4286_v49 = vld [vmem:[%s9245_s3] sm:$0x3f] }
 0x13a   :  { %3736 = vmatprep.subr.bf16.mxu0 %v6270_v13  ;;  %3039 = vmatmul.mubr.bf16.gmra.mrb[92].mxu1 %v6772_v50 }
 0x13b   :  { %3618 = vmatmul.mubr.bf16.gmra.mrb[92].mxu0 %v6772_v50  ;;  %3048 = vmatprep.mubr.bf16.mxu1 %v6773_v52 }
 0x13c   :  { %3627 = vmatprep.mubr.bf16.mxu0 %v6773_v52  ;;  %3158 = vmatpush1.bf16.msra.mxu1 %v6265_v42  ;;  %v2406_v52 = vadd.f32 %v7922_v4, %v8111_v5  ;;  %v6782_v4 = vld [vmem:[%s9243_s0 + $0x240] ss:$24 sps:$4 sm:$0xff]  }
 0x13d   :  { %3737 = vmatpush1.bf16.msra.mxu0 %v6268_v44  ;;  %v8064_v56 = vpop.f32.mrb[20].mxu1  ;;  %3159 = vmatprep.subr.bf16.mxu1 %v6273_v17 }
 0x13e   :  { %3738 = vmatprep.subr.bf16.mxu0 %v6276_v48  ;;  %v8072_v27 = vpop.f32.mrb[21].mxu1  ;;  %v2404_v48 = vadd.f32 %v7920_v29, %v8115_v28 }
 0x13f   :  { %v8074_v62 = vpop.f32.mrb[22].mxu1 }
 0x140   :  { %v8076_v0 = vpop.f32.mrb[23].mxu1  ;;  %3160 = vmatpush1.bf16.msra.mxu1 %v6271_v54 }
 0x141   :  { %3739 = vmatpush1.bf16.msra.mxu0 %v6274_v23  ;;  %3322 = vmatprep.subr.bf16.mxu1 %v6279_v25  ;;  %v2408_v25 = vadd.f32 %v7924_v31, %v8115_v28 }
 0x142   :  { %3901 = vmatprep.subr.bf16.mxu0 %v6282_v58  ;;  %3049 = vmatmul.mubr.bf16.gmra.mrb[96].mxu1 %v6774_v33 }
 0x143   :  { %3628 = vmatmul.mubr.bf16.gmra.mrb[96].mxu0 %v6774_v33  ;;  %3058 = vmatprep.mubr.bf16.mxu1 %v6775_v6 }
 0x144   :  { %3637 = vmatprep.mubr.bf16.mxu0 %v6775_v6  ;;  %v8148_v6 = vrot.slane %v4286_v49, %v409_v3  ;;  %v6783_v3 = vld [vmem:[%s9243_s0 + $0x274] ss:$24 sps:$4 sm:$0xff]  }
 0x145   :  { %v8084_v10 = vpop.f32.mrb[24].mxu1 }
 0x146   :  { %v8086_v12 = vpop.f32.mrb[25].mxu1 }
 0x147   :  { %v8088_v35 = vpop.f32.mrb[26].mxu1 }
 0x148   :  { %v8092_v37 = vpop.f32.mrb[27].mxu1 }
 0x14a   :  { %3059 = vmatmul.mubr.bf16.gmra.mrb[100].mxu1 %v6776_v39 }
 0x14b   :  { %3638 = vmatmul.mubr.bf16.gmra.mrb[100].mxu0 %v6776_v39  ;;  %3068 = vmatprep.mubr.bf16.mxu1 %v6777_v18  ;;  %v8150_v39 = vrot.slane %v4286_v49, %v413_v45 }
 0x14c   :  { %3647 = vmatprep.mubr.bf16.mxu0 %v6777_v18 }
 0x14d   :  { %v8105_v22 = vpop.f32.mrb[28].mxu1 }
 0x14e   :  { %v8107_v24 = vpop.f32.mrb[29].mxu1 }
 0x14f   :  { %v8109_v26 = vpop.f32.mrb[30].mxu1 }
 0x150   :  { %v8113_v47 = vpop.f32.mrb[31].mxu1 }
 0x152   :  { %3069 = vmatmul.mubr.bf16.gmra.mrb[104].mxu1 %v6778_v7 }
 0x153   :  { %3648 = vmatmul.mubr.bf16.gmra.mrb[104].mxu0 %v6778_v7  ;;  %3078 = vmatprep.mubr.bf16.mxu1 %v6779_v55  ;;  %v2412_v7 = vadd.f32 %v7950_v16, %v8111_v5  ;;  %v2418_v16 = vadd.f32 %v7962_v41, %v8115_v28  ;;  %v6785_v41 = vld [vmem:[%s9243_s0 + $0x2a4] ss:$24 sps:$4 sm:$0xff]  }
 0x154   :  { %3657 = vmatprep.mubr.bf16.mxu0 %v6779_v55 }
 0x156   :  { %v2777_v59 = vpop.f32.mrb[0].mxu0 }
 0x157   :  { %v5222_v36 = vadd.f32 %v2777_v59, %v2392_v32  ;;  %v2779_v11 = vpop.f32.mrb[1].mxu0 }
 0x158   :  { %v5224_v63 = vadd.f32 %v2779_v11, %v2394_v57  ;;  %v2781_v13 = vpop.f32.mrb[2].mxu0  ;;  %v2414_v57 = vadd.f32 %v7958_v1, %v8115_v28 }
 0x159   :  { %6373 = vtanh.f32 %v5222_v36  ;;  %v5226_v42 = vadd.f32 %v2781_v13, %v2396_v34  ;;  %v2783_v44 = vpop.f32.mrb[3].mxu0  ;;  %v2416_v36 = vadd.f32 %v7960_v20, %v8111_v5  ;;  %v6784_v20 = vld [vmem:[%s9243_s0 + $0x270] ss:$24 sps:$4 sm:$0xff]  }
 0x15a   :  { %6375 = vtanh.f32 %v5224_v63  ;;  %v5228_v17 = vadd.f32 %v2783_v44, %v2398_v38  ;;  %3079 = vmatmul.mubr.bf16.gmra.mrb[108].mxu1 %v6780_v46 }
 0x15b   :  { %6377 = vtanh.f32 %v5226_v42  ;;  %3658 = vmatmul.mubr.bf16.gmra.mrb[108].mxu0 %v6780_v46  ;;  %3088 = vmatprep.mubr.bf16.mxu1 %v6781_v19 }
 0x15c   :  { %6379 = vtanh.f32 %v5228_v17  ;;  %3667 = vmatprep.mubr.bf16.mxu0 %v6781_v19 }
 0x15e   :  { %v2787_v50 = vpop.f32.mrb[4].mxu0 }
 0x15f   :  { %v5230_v54 = vadd.f32 %v2787_v50, %v2402_v21  ;;  %v2789_v23 = vpop.f32.mrb[5].mxu0 }
 0x160   :  { %v5232_v58 = vadd.f32 %v2789_v23, %v2404_v48  ;;  %v2791_v33 = vpop.f32.mrb[6].mxu0 }
 0x161   :  { %6381 = vtanh.f32 %v5230_v54  ;;  %v5234_v60 = vadd.f32 %v2791_v33, %v2406_v52  ;;  %v2793_v8 = vpop.f32.mrb[7].mxu0  ;;  %v2422_v52 = vadd.f32 %v7988_v51, %v8111_v5  ;;  %v2428_v51 = vadd.f32 %v8000_v9, %v8115_v28  ;;  %v6787_v9 = vld [vmem:[%s9243_s0 + $0x2d4] ss:$24 sps:$4 sm:$0xff]  }
 0x162   :  { %6383 = vtanh.f32 %v5232_v58  ;;  %v5236_v29 = vadd.f32 %v2793_v8, %v2408_v25  ;;  %3089 = vmatmul.mubr.bf16.gmra.mrb[112].mxu1 %v6782_v4  ;;  %v2424_v25 = vadd.f32 %v7996_v53, %v8115_v28 }
 0x163   :  { %v6374_v18 = vpop.eup %6373  ;;  %6385 = vtanh.f32 %v5234_v60  ;;  %3668 = vmatmul.mubr.bf16.gmra.mrb[112].mxu0 %v6782_v4  ;;  %3098 = vmatprep.mubr.bf16.mxu1 %v6783_v3  ;;  %v2426_v60 = vadd.f32 %v7998_v30, %v8111_v5  ;;  %v6786_v30 = vld [vmem:[%s9243_s0 + $0x2a0] ss:$24 sps:$4 sm:$0xff]  }
 0x164   :  { %v6376_v31 = vpop.eup %6375  ;;  %6387 = vtanh.f32 %v5236_v29  ;;  %3677 = vmatprep.mubr.bf16.mxu0 %v6783_v3  ;;  %v4318_v43 = vmul.f32 %v6374_v18, %v8148_v6 }
 0x165   :  { %v6378_v45 = vpop.eup %6377  ;;  %v4319_v55 = vmul.f32 %v6376_v31, %v8150_v39 }
 0x166   :  { %v6380_v32 = vpop.eup %6379  ;;  %v2797_v59 = vpop.f32.mrb[8].mxu0  ;;  %v4324_v34 = vmul.f32 %v6378_v45, %v8148_v6 }
 0x167   :  { %v5238_v11 = vadd.f32 %v2797_v59, %v2412_v7  ;;  %v2799_v38 = vpop.f32.mrb[9].mxu0  ;;  %v8167_v63 = vadd.f32 %v4319_v55, %v4318_v43  ;;  %v4325_v13 = vmul.f32 %v6380_v32, %v8150_v39 }
 0x168   :  { %v5240_v42 = vadd.f32 %v2799_v38, %v2414_v57  ;;  %v2801_v44 = vpop.f32.mrb[10].mxu0  ;;  %v2434_v38 = vadd.f32 %v8034_v40, %v8115_v28 }
 0x169   :  { %6389 = vtanh.f32 %v5238_v11  ;;  %v5242_v17 = vadd.f32 %v2801_v44, %v2416_v36  ;;  %v2803_v1 = vpop.f32.mrb[11].mxu0  ;;  %v8172_v46 = vadd.f32 %v4325_v13, %v4324_v34  ;;  %v2432_v34 = vadd.f32 %v8026_v61, %v8111_v5 }
 0x16a   :  { %6391 = vtanh.f32 %v5240_v42  ;;  %v5244_v19 = vadd.f32 %v2803_v1, %v2418_v16  ;;  %3099 = vmatmul.mubr.bf16.gmra.mrb[116].mxu1 %v6784_v20  ;;  %v2436_v42 = vadd.f32 %v8036_v15, %v8111_v5  ;;  %v2438_v61 = vadd.f32 %v8038_v2, %v8115_v28  ;;  %v6788_v15 = vld [vmem:[%s9243_s0 + $0x2d0] ss:$24 sps:$4 sm:$0xff]   ;;  %v6789_v2 = vld [vmem:[%s9243_s0 + $0xc] ss:$24 sps:$4 sm:$0xff]  }
 0x16b   :  { %v6382_v21 = vpop.eup %6381  ;;  %6393 = vtanh.f32 %v5242_v17  ;;  %3678 = vmatmul.mubr.bf16.gmra.mrb[116].mxu0 %v6784_v20  ;;  %3108 = vmatprep.mubr.bf16.mxu1 %v6785_v41 }
 0x16c   :  { %v6384_v49 = vpop.eup %6383  ;;  %6395 = vtanh.f32 %v5244_v19  ;;  %3687 = vmatprep.mubr.bf16.mxu0 %v6785_v41  ;;  %v4330_v48 = vmul.f32 %v6382_v21, %v8148_v6 }
 0x16d   :  { %v6386_v50 = vpop.eup %6385  ;;  %v4331_v54 = vmul.f32 %v6384_v49, %v8150_v39 }
 0x16e   :  { %v6388_v23 = vpop.eup %6387  ;;  %v2807_v58 = vpop.f32.mrb[12].mxu0  ;;  %v4336_v33 = vmul.f32 %v6386_v50, %v8148_v6 }
 0x16f   :  { %v5246_v8 = vadd.f32 %v2807_v58, %v2422_v52  ;;  %v2809_v29 = vpop.f32.mrb[13].mxu0  ;;  %v8189_v18 = vadd.f32 %v4331_v54, %v4330_v48  ;;  %v4337_v4 = vmul.f32 %v6388_v23, %v8150_v39 }
 0x170   :  { %v5248_v31 = vadd.f32 %v2809_v29, %v2424_v25  ;;  %v2811_v3 = vpop.f32.mrb[14].mxu0  ;;  %v2442_v25 = vadd.f32 %v8064_v56, %v8111_v5  ;;  %v2448_v56 = vadd.f32 %v8076_v0, %v8115_v28  ;;  %v6285_v0 = vld [vmem:[%s9242_s1 + $0x63c] ss:$24 sps:$4 sm:$0xff]  }
 0x171   :  { %6397 = vtanh.f32 %v5246_v8  ;;  %v5250_v43 = vadd.f32 %v2811_v3, %v2426_v60  ;;  %v2813_v53 = vpop.f32.mrb[15].mxu0  ;;  %v8194_v45 = vadd.f32 %v4337_v4, %v4336_v33  ;;  %v2444_v60 = vadd.f32 %v8072_v27, %v8115_v28  ;;  %v6277_v27 = vld [vmem:[%s9242_s1 + $0x608] ss:$24 sps:$4 sm:$0xff]  }
 0x172   :  { %6399 = vtanh.f32 %v5248_v31  ;;  %v5252_v7 = vadd.f32 %v2813_v53, %v2428_v51  ;;  %3109 = vmatmul.mubr.bf16.gmra.mrb[120].mxu1 %v6786_v30  ;;  %v2446_v4 = vadd.f32 %v8074_v62, %v8111_v5 }
 0x173   :  { %v6390_v55 = vpop.eup %6389  ;;  %6401 = vtanh.f32 %v5250_v43  ;;  %3688 = vmatmul.mubr.bf16.gmra.mrb[120].mxu0 %v6786_v30  ;;  %3118 = vmatprep.mubr.bf16.mxu1 %v6787_v9 }
 0x174   :  { %v6392_v32 = vpop.eup %6391  ;;  %6403 = vtanh.f32 %v5252_v7  ;;  %3697 = vmatprep.mubr.bf16.mxu0 %v6787_v9  ;;  %v4342_v57 = vmul.f32 %v6390_v55, %v8148_v6  ;;  %v6280_v55 = vld [vmem:[%s9242_s1 + $0x610] ss:$24 sps:$4 sm:$0xff]  }
 0x175   :  { %v6394_v59 = vpop.eup %6393  ;;  %v4343_v36 = vmul.f32 %v6392_v32, %v8150_v39 }
 0x176   :  { %v6396_v11 = vpop.eup %6395  ;;  %v2817_v13 = vpop.f32.mrb[16].mxu0  ;;  %v4348_v16 = vmul.f32 %v6394_v59, %v8148_v6 }
 0x177   :  { %v5254_v44 = vadd.f32 %v2817_v13, %v2432_v34  ;;  %v2819_v17 = vpop.f32.mrb[17].mxu0  ;;  %v8211_v1 = vadd.f32 %v4343_v36, %v4342_v57  ;;  %v4349_v19 = vmul.f32 %v6396_v11, %v8150_v39  ;;  %v6288_v57 = vld [vmem:[%s9242_s1 + $0x644] ss:$24 sps:$4 sm:$0xff]   ;;  %v6790_v34 = vld [vmem:[%s9243_s0 + $0x8] ss:$24 sps:$4 sm:$0xff]  }
 0x178   :  { %v5256_v21 = vadd.f32 %v2819_v17, %v2434_v38  ;;  %v2821_v20 = vpop.f32.mrb[18].mxu0  ;;  %v6283_v11 = vld [vmem:[%s9242_s1 + $0x638] ss:$24 sps:$4 sm:$0xff]   ;;  %v6291_v17 = vld [vmem:[%s9242_s1 + $0x66c] ss:$24 sps:$4 sm:$0xff]  }
 0x179   :  { %6405 = vtanh.f32 %v5254_v44  ;;  %v5258_v49 = vadd.f32 %v2821_v20, %v2436_v42  ;;  %v2823_v40 = vpop.f32.mrb[19].mxu0  ;;  %v8216_v41 = vadd.f32 %v4349_v19, %v4348_v16  ;;  %v6286_v38 = vld [vmem:[%s9242_s1 + $0x640] ss:$24 sps:$4 sm:$0xff]   ;;  %v2452_v42 = vadd.f32 %v8084_v10, %v8111_v5  ;;  %v6791_v44 = vld [vmem:[%s9243_s0 + $0x3c] ss:$24 sps:$4 sm:$0xff]  }
 0x17a   :  { %6407 = vtanh.f32 %v5256_v21  ;;  %v5260_v48 = vadd.f32 %v2823_v40, %v2438_v61  ;;  %3119 = vmatmul.mubr.bf16.gmra.mrb[124].mxu1 %v6788_v15  ;;  %v6294_v19 = vld [vmem:[%s9242_s1 + $0x674] ss:$24 sps:$4 sm:$0xff]   ;;  %v2454_v10 = vadd.f32 %v8086_v12, %v8115_v28  ;;  %v2456_v40 = vadd.f32 %v8088_v35, %v8111_v5  ;;  %v6289_v35 = vld [vmem:[%s9242_s1 + $0x668] ss:$24 sps:$4 sm:$0xff]  }
 0x17b   :  { %v6398_v50 = vpop.eup %6397  ;;  %6409 = vtanh.f32 %v5258_v49  ;;  %3698 = vmatmul.mubr.bf16.gmra.mrb[124].mxu0 %v6788_v15  ;;  %3161 = vmatprep.mubr.bf16.mxu1 %v6789_v2 }
 0x17c   :  { %v6400_v52 = vpop.eup %6399  ;;  %6411 = vtanh.f32 %v5260_v48  ;;  %3740 = vmatprep.mubr.bf16.mxu0 %v6789_v2  ;;  %v4354_v54 = vmul.f32 %v6398_v50, %v8148_v6  ;;  %v2458_v2 = vadd.f32 %v8092_v37, %v8115_v28 }
 0x17d   :  { %v6402_v23 = vpop.eup %6401  ;;  %v4355_v58 = vmul.f32 %v6400_v52, %v8150_v39 }
 0x17e   :  { %v6404_v33 = vpop.eup %6403  ;;  %v2827_v8 = vpop.f32.mrb[20].mxu0  ;;  %v4360_v29 = vmul.f32 %v6402_v23, %v8148_v6 }
 0x17f   :  { %v5262_v51 = vadd.f32 %v2827_v8, %v2442_v25  ;;  %v2829_v31 = vpop.f32.mrb[21].mxu0  ;;  %v8233_v3 = vadd.f32 %v4355_v58, %v4354_v54  ;;  %v4361_v43 = vmul.f32 %v6404_v33, %v8150_v39  ;;  %v6292_v58 = vld [vmem:[%s9242_s1 + $0x670] ss:$24 sps:$4 sm:$0xff]   ;;  %v6300_v8 = vld [vmem:[%s9242_s1 + $0x6a4] ss:$24 sps:$4 sm:$0xff]  }
 0x180   :  { %v5264_v53 = vadd.f32 %v2829_v31, %v2444_v60  ;;  %v2831_v7 = vpop.f32.mrb[22].mxu0  ;;  %v6297_v60 = vld [vmem:[%s9242_s1 + $0x69c] ss:$24 sps:$4 sm:$0xff]   ;;  %v6793_v31 = vld [vmem:[%s9243_s0 + $0x6c] ss:$24 sps:$4 sm:$0xff]  }
 0x181   :  { %6413 = vtanh.f32 %v5262_v51  ;;  %v5266_v62 = vadd.f32 %v2831_v7, %v2446_v4  ;;  %v2833_v30 = vpop.f32.mrb[23].mxu0  ;;  %v8244_v32 = vadd.f32 %v4361_v43, %v4360_v29  ;;  %v6792_v4 = vld [vmem:[%s9243_s0 + $0x38] ss:$24 sps:$4 sm:$0xff]  }
 0x182   :  { %6415 = vtanh.f32 %v5264_v53  ;;  %v5268_v9 = vadd.f32 %v2833_v30, %v2448_v56  ;;  %3162 = vmatmul.mubr.bf16.vlgmr.msra.gmra.mrb[64].mxu1 %v6790_v34  ;;  %v2462_v53 = vadd.f32 %v8105_v22, %v8111_v5  ;;  %v6295_v7 = vld [vmem:[%s9242_s1 + $0x698] ss:$24 sps:$4 sm:$0xff]   ;;  %v2464_v30 = vadd.f32 %v8107_v24, %v8115_v28  ;;  %v6303_v22 = vld [vmem:[%s9242_s1 + $0x6cc] ss:$24 sps:$4 sm:$0xff]  }
 0x183   :  { %v6406_v59 = vpop.eup %6405  ;;  %6417 = vtanh.f32 %v5266_v62  ;;  %3741 = vmatmul.mubr.bf16.vlgmr.msra.gmra.mrb[64].mxu0 %v6790_v34  ;;  %3323 = vmatpush1.bf16.msra.mxu1 %v6277_v27  ;;  %v6298_v27 = vld [vmem:[%s9242_s1 + $0x6a0] ss:$24 sps:$4 sm:$0xff]  }
 0x184   :  { %v6408_v36 = vpop.eup %6407  ;;  %6419 = vtanh.f32 %v5268_v9  ;;  %3902 = vmatpush1.bf16.msra.mxu0 %v6280_v55  ;;  %v4366_v13 = vmul.f32 %v6406_v59, %v8148_v6  ;;  %3171 = vmatprep.mubr.bf16.mxu1 %v6791_v44  ;;  %v2466_v59 = vadd.f32 %v8109_v26, %v8111_v5  ;;  %v6301_v26 = vld [vmem:[%s9242_s1 + $0x6c8] ss:$24 sps:$4 sm:$0xff]  }
 0x185   :  { %v6410_v16 = vpop.eup %6409  ;;  %3750 = vmatprep.mubr.bf16.mxu0 %v6791_v44  ;;  %v4367_v61 = vmul.f32 %v6408_v36, %v8150_v39  ;;  %3324 = vmatprep.subr.bf16.mxu1 %v6285_v0  ;;  %v6306_v0 = vld [vmem:[%s9242_s1 + $0x6d4] ss:$24 sps:$4 sm:$0xff]  }
 0x186   :  { %v6412_v21 = vpop.eup %6411  ;;  %v2837_v20 = vpop.f32.mrb[24].mxu0  ;;  %3903 = vmatprep.subr.bf16.mxu0 %v6288_v57  ;;  %v4372_v49 = vmul.f32 %v6410_v16, %v8148_v6 }
 0x187   :  { %v5270_v48 = vadd.f32 %v2837_v20, %v2452_v42  ;;  %v2839_v50 = vpop.f32.mrb[25].mxu0  ;;  %v8279_v15 = vadd.f32 %v4367_v61, %v4366_v13  ;;  %v4373_v52 = vmul.f32 %v6412_v21, %v8150_v39  ;;  %3325 = vmatpush1.bf16.msra.mxu1 %v6283_v11  ;;  %v6312_v21 = vld [vmem:[%s9242_s1 + $0x704] ss:$24 sps:$4 sm:$0xff]   ;;  %v6794_v20 = vld [vmem:[%s9243_s0 + $0x68] ss:$24 sps:$4 sm:$0xff]  }
 0x188   :  { %v5272_v54 = vadd.f32 %v2839_v50, %v2454_v10  ;;  %v2841_v23 = vpop.f32.mrb[26].mxu0  ;;  %3904 = vmatpush1.bf16.msra.mxu0 %v6286_v38  ;;  %3326 = vmatprep.subr.bf16.mxu1 %v6291_v17  ;;  %v2468_v38 = vadd.f32 %v8113_v47, %v8115_v28  ;;  %v6304_v17 = vld [vmem:[%s9242_s1 + $0x6d0] ss:$24 sps:$4 sm:$0xff]   ;;  %v6309_v47 = vld [vmem:[%s9242_s1 + $0x6fc] ss:$24 sps:$4 sm:$0xff]  }
 0x189   :  { %6421 = vtanh.f32 %v5270_v48  ;;  %v5274_v12 = vadd.f32 %v2841_v23, %v2456_v40  ;;  %v2843_v25 = vpop.f32.mrb[27].mxu0  ;;  %3905 = vmatprep.subr.bf16.mxu0 %v6294_v19  ;;  %v8290_v33 = vadd.f32 %v4373_v52, %v4372_v49  ;;  %v6795_v40 = vld [vmem:[%s9243_s0 + $0x9c] ss:$24 sps:$4 sm:$0xff]   ;;  %v6307_v52 = vld [vmem:[%s9242_s1 + $0x6f8] ss:$24 sps:$4 sm:$0xff]  }
 0x18a   :  { %6423 = vtanh.f32 %v5272_v54  ;;  %v5276_v37 = vadd.f32 %v2843_v25, %v2458_v2  ;;  %3172 = vmatmul.mubr.bf16.gmra.mrb[68].mxu1 %v6792_v4  ;;  %v6310_v2 = vld [vmem:[%s9242_s1 + $0x700] ss:$24 sps:$4 sm:$0xff]  }
 0x18b   :  { %v6414_v29 = vpop.eup %6413  ;;  %6425 = vtanh.f32 %v5274_v12  ;;  %3751 = vmatmul.mubr.bf16.gmra.mrb[68].mxu0 %v6792_v4  ;;  %3181 = vmatprep.mubr.bf16.mxu1 %v6793_v31 }
 0x18c   :  { %v6416_v51 = vpop.eup %6415  ;;  %6427 = vtanh.f32 %v5276_v37  ;;  %3760 = vmatprep.mubr.bf16.mxu0 %v6793_v31  ;;  %v4378_v43 = vmul.f32 %v6414_v29, %v8148_v6  ;;  %3327 = vmatpush1.bf16.msra.mxu1 %v6289_v35  ;;  %v6315_v35 = vld [vmem:[%s9242_s1 + $0x72c] ss:$24 sps:$4 sm:$0xff]  }
 0x18d   :  { %v6418_v56 = vpop.eup %6417  ;;  %3906 = vmatpush1.bf16.msra.mxu0 %v6292_v58  ;;  %v4379_v55 = vmul.f32 %v6416_v51, %v8150_v39  ;;  %3328 = vmatprep.subr.bf16.mxu1 %v6297_v60  ;;  %v6318_v58 = vld [vmem:[%s9242_s1 + $0x734] ss:$24 sps:$4 sm:$0xff]  }
 0x18e   :  { %v6420_v62 = vpop.eup %6419  ;;  %v2847_v9 = vpop.f32.mrb[28].mxu0  ;;  %3907 = vmatprep.subr.bf16.mxu0 %v6300_v8  ;;  %v4384_v57 = vmul.f32 %v6418_v56, %v8148_v6 }
 0x18f   :  { %v5278_v34 = vadd.f32 %v2847_v9, %v2462_v53  ;;  %v2849_v36 = vpop.f32.mrb[29].mxu0  ;;  %v8325_v11 = vadd.f32 %v4379_v55, %v4378_v43  ;;  %v4385_v24 = vmul.f32 %v6420_v62, %v8150_v39  ;;  %v6313_v62 = vld [vmem:[%s9242_s1 + $0x728] ss:$24 sps:$4 sm:$0xff]  }
 0x190   :  { %v5280_v13 = vadd.f32 %v2849_v36, %v2464_v30  ;;  %v2851_v16 = vpop.f32.mrb[30].mxu0  ;;  %3329 = vmatpush1.bf16.msra.mxu1 %v6295_v7  ;;  %v6316_v30 = vld [vmem:[%s9242_s1 + $0x730] ss:$24 sps:$4 sm:$0xff]  }
 0x191   :  { %6429 = vtanh.f32 %v5278_v34  ;;  %v5282_v42 = vadd.f32 %v2851_v16, %v2466_v59  ;;  %v2853_v44 = vpop.f32.mrb[31].mxu0  ;;  %3908 = vmatpush1.bf16.msra.mxu0 %v6298_v27  ;;  %v8336_v19 = vadd.f32 %v4385_v24, %v4384_v57  ;;  %3330 = vmatprep.subr.bf16.mxu1 %v6303_v22  ;;  %v6321_v57 = vld [vmem:[%s9242_s1 + $0x75c] ss:$24 sps:$4 sm:$0xff]   ;;  %v6796_v24 = vld [vmem:[%s9243_s0 + $0x98] ss:$24 sps:$4 sm:$0xff]  }
 0x192   :  { %6431 = vtanh.f32 %v5280_v13  ;;  %v5284_v61 = vadd.f32 %v2853_v44, %v2468_v38  ;;  %3909 = vmatprep.subr.bf16.mxu0 %v6306_v0  ;;  %3182 = vmatmul.mubr.bf16.gmra.mrb[72].mxu1 %v6794_v20  ;;  %v6324_v59 = vld [vmem:[%s9242_s1 + $0x764] ss:$24 sps:$4 sm:$0xff]  }
 0x193   :  { %v6422_v10 = vpop.eup %6421  ;;  %6433 = vtanh.f32 %v5282_v42  ;;  %3761 = vmatmul.mubr.bf16.gmra.mrb[72].mxu0 %v6794_v20  ;;  %3191 = vmatprep.mubr.bf16.mxu1 %v6795_v40  ;;  %v6797_v16 = vld [vmem:[%s9243_s0 + $0xcc] ss:$24 sps:$4 sm:$0xff]  }
 0x194   :  { %v6424_v49 = vpop.eup %6423  ;;  %6435 = vtanh.f32 %v5284_v61  ;;  %3770 = vmatprep.mubr.bf16.mxu0 %v6795_v40  ;;  %v4390_v48 = vmul.f32 %v6422_v10, %v8148_v6  ;;  %3331 = vmatpush1.bf16.msra.mxu1 %v6301_v26  ;;  %v6319_v26 = vld [vmem:[%s9242_s1 + $0x758] ss:$24 sps:$4 sm:$0xff]   ;;  %v6327_v20 = vld [vmem:[%s9242_s1 + $0x78c] ss:$24 sps:$4 sm:$0xff]  }
 0x195   :  { %v6426_v50 = vpop.eup %6425  ;;  %3910 = vmatpush1.bf16.msra.mxu0 %v6304_v17  ;;  %v4391_v54 = vmul.f32 %v6424_v49, %v8150_v39  ;;  %v2664_v12 = vpop.f32.mrb[32].mxu1  ;;  %3332 = vmatprep.subr.bf16.mxu1 %v6309_v47  ;;  %v6322_v17 = vld [vmem:[%s9242_s1 + $0x760] ss:$24 sps:$4 sm:$0xff]   ;;  %v6330_v49 = vld [vmem:[%s9242_s1 + $0x794] ss:$24 sps:$4 sm:$0xff]  }
 0x196   :  { %v6428_v23 = vpop.eup %6427  ;;  %v2857_v25 = vpop.f32.mrb[32].mxu0  ;;  %3911 = vmatprep.subr.bf16.mxu0 %v6312_v21  ;;  %v4396_v37 = vmul.f32 %v6426_v50, %v8148_v6  ;;  %v5285_v60 = vadd.f32 %v2664_v12, %v8111_v5 }
 0x197   :  { %v2666_v8 = vpop.f32.mrb[33].mxu1  ;;  %v2859_v29 = vpop.f32.mrb[33].mxu0  ;;  %v8366_v4 = vadd.f32 %v4391_v54, %v4390_v48  ;;  %v4397_v51 = vmul.f32 %v6428_v23, %v8150_v39 }
 0x198   :  { %v5287_v31 = vadd.f32 %v2666_v8, %v8115_v28  ;;  %v2668_v43 = vpop.f32.mrb[34].mxu1  ;;  %v2861_v56 = vpop.f32.mrb[34].mxu0  ;;  %v5286_v7 = vadd.f32 %v5285_v60, %v2857_v25  ;;  %3333 = vmatpush1.bf16.msra.mxu1 %v6307_v52  ;;  %v6325_v8 = vld [vmem:[%s9242_s1 + $0x788] ss:$24 sps:$4 sm:$0xff]  }
 0x199   :  { %v5289_v53 = vadd.f32 %v2668_v43, %v8111_v5  ;;  %v2670_v27 = vpop.f32.mrb[35].mxu1  ;;  %v2863_v55 = vpop.f32.mrb[35].mxu0  ;;  %3912 = vmatpush1.bf16.msra.mxu0 %v6310_v2  ;;  %v8377_v9 = vadd.f32 %v4397_v51, %v4396_v37  ;;  %3334 = vmatprep.subr.bf16.mxu1 %v6315_v35 }
 0x19a   :  { %v5291_v22 = vadd.f32 %v2670_v27, %v8115_v28  ;;  %v5288_v0 = vadd.f32 %v5287_v31, %v2859_v29  ;;  %3913 = vmatprep.subr.bf16.mxu0 %v6318_v58  ;;  %6437 = vtanh.f32 %v5286_v7  ;;  %3192 = vmatmul.mubr.bf16.gmra.mrb[76].mxu1 %v6796_v24  ;;  %v6328_v29 = vld [vmem:[%s9242_s1 + $0x790] ss:$24 sps:$4 sm:$0xff]  }
 0x19b   :  { %v6430_v34 = vpop.eup %6429  ;;  %v5290_v36 = vadd.f32 %v5289_v53, %v2861_v56  ;;  %3771 = vmatmul.mubr.bf16.gmra.mrb[76].mxu0 %v6796_v24  ;;  %3201 = vmatprep.mubr.bf16.mxu1 %v6797_v16  ;;  %v6333_v56 = vld [vmem:[%s9242_s1 + $0x7bc] ss:$24 sps:$4 sm:$0xff]   ;;  %v6798_v27 = vld [vmem:[%s9243_s0 + $0xc8] ss:$24 sps:$4 sm:$0xff]  }
 0x19c   :  { %v6432_v38 = vpop.eup %6431  ;;  %6439 = vtanh.f32 %v5288_v0  ;;  %v5292_v13 = vadd.f32 %v5291_v22, %v2863_v55  ;;  %3780 = vmatprep.mubr.bf16.mxu0 %v6797_v16  ;;  %v4402_v42 = vmul.f32 %v6430_v34, %v8148_v6  ;;  %3335 = vmatpush1.bf16.msra.mxu1 %v6313_v62  ;;  %v6336_v53 = vld [vmem:[%s9242_s1 + $0x7c4] ss:$24 sps:$4 sm:$0xff]   ;;  %v6331_v22 = vld [vmem:[%s9242_s1 + $0x7b8] ss:$24 sps:$4 sm:$0xff]   ;;  %v6342_v24 = vld [vmem:[%s9242_s1 + $0x7f4] ss:$24 sps:$4 sm:$0xff]  }
 0x19d   :  { %v6434_v44 = vpop.eup %6433  ;;  %6441 = vtanh.f32 %v5290_v36  ;;  %3914 = vmatpush1.bf16.msra.mxu0 %v6316_v30  ;;  %v4403_v61 = vmul.f32 %v6432_v38, %v8150_v39  ;;  %v2674_v21 = vpop.f32.mrb[36].mxu1  ;;  %3336 = vmatprep.subr.bf16.mxu1 %v6321_v57  ;;  %v6799_v62 = vld [vmem:[%s9243_s0 + $0xfc] ss:$24 sps:$4 sm:$0xff]   ;;  %v6334_v0 = vld [vmem:[%s9242_s1 + $0x7c0] ss:$24 sps:$4 sm:$0xff]  }
 0x19e   :  { %v6436_v47 = vpop.eup %6435  ;;  %6443 = vtanh.f32 %v5292_v13  ;;  %v2867_v10 = vpop.f32.mrb[36].mxu0  ;;  %3915 = vmatprep.subr.bf16.mxu0 %v6324_v59  ;;  %v4408_v40 = vmul.f32 %v6434_v44, %v8148_v6  ;;  %v5293_v48 = vadd.f32 %v2674_v21, %v8111_v5  ;;  %v6339_v36 = vld [vmem:[%s9242_s1 + $0x7ec] ss:$24 sps:$4 sm:$0xff]  }
 0x19f   :  { %v2676_v50 = vpop.f32.mrb[37].mxu1  ;;  %v2869_v52 = vpop.f32.mrb[37].mxu0  ;;  %v8408_v2 = vadd.f32 %v4403_v61, %v4402_v42  ;;  %v4409_v54 = vmul.f32 %v6436_v47, %v8150_v39 }
 0x1a0   :  { %v5295_v23 = vadd.f32 %v2676_v50, %v8115_v28  ;;  %v2678_v12 = vpop.f32.mrb[38].mxu1  ;;  %v2871_v25 = vpop.f32.mrb[38].mxu0  ;;  %v5294_v58 = vadd.f32 %v5293_v48, %v2867_v10  ;;  %3337 = vmatpush1.bf16.msra.mxu1 %v6319_v26  ;;  %v6337_v50 = vld [vmem:[%s9242_s1 + $0x7e8] ss:$24 sps:$4 sm:$0xff]  }
 0x1a1   :  { %v5297_v35 = vadd.f32 %v2678_v12, %v8111_v5  ;;  %v2680_v37 = vpop.f32.mrb[39].mxu1  ;;  %v2873_v60 = vpop.f32.mrb[39].mxu0  ;;  %3916 = vmatpush1.bf16.msra.mxu0 %v6322_v17  ;;  %v8419_v51 = vadd.f32 %v4409_v54, %v4408_v40  ;;  %3338 = vmatprep.subr.bf16.mxu1 %v6327_v20 }
 0x1a2   :  { %v5299_v31 = vadd.f32 %v2680_v37, %v8115_v28  ;;  %v5296_v43 = vadd.f32 %v5295_v23, %v2869_v52  ;;  %3917 = vmatprep.subr.bf16.mxu0 %v6330_v49  ;;  %6445 = vtanh.f32 %v5294_v58  ;;  %3202 = vmatmul.mubr.bf16.gmra.mrb[80].mxu1 %v6798_v27  ;;  %v6340_v52 = vld [vmem:[%s9242_s1 + $0x7f0] ss:$24 sps:$4 sm:$0xff]  }
 0x1a3   :  { %v5298_v7 = vadd.f32 %v5297_v35, %v2871_v25  ;;  %3781 = vmatmul.mubr.bf16.gmra.mrb[80].mxu0 %v6798_v27  ;;  %3211 = vmatprep.mubr.bf16.mxu1 %v6799_v62  ;;  %v6345_v25 = vld [vmem:[%s9242_s1 + $0x81c] ss:$24 sps:$4 sm:$0xff]  }
 0x1a4   :  { %6447 = vtanh.f32 %v5296_v43  ;;  %v5300_v55 = vadd.f32 %v5299_v31, %v2873_v60  ;;  %3790 = vmatprep.mubr.bf16.mxu0 %v6799_v62  ;;  %v6438_v30 = vpop.eup %6437  ;;  %3339 = vmatpush1.bf16.msra.mxu1 %v6325_v8  ;;  %v6348_v35 = vld [vmem:[%s9242_s1 + $0x824] ss:$24 sps:$4 sm:$0xff]   ;;  %v6800_v60 = vld [vmem:[%s9243_s0 + $0xf8] ss:$24 sps:$4 sm:$0xff]  }
 0x1a5   :  { %6449 = vtanh.f32 %v5298_v7  ;;  %3918 = vmatpush1.bf16.msra.mxu0 %v6328_v29  ;;  %v2684_v59 = vpop.f32.mrb[40].mxu1  ;;  %3340 = vmatprep.subr.bf16.mxu1 %v6333_v56  ;;  %v4414_v38 = vmul.f32 %v6438_v30, %v8148_v6  ;;  %v6801_v29 = vld [vmem:[%s9243_s0 + $0x12c] ss:$24 sps:$4 sm:$0xff]   ;;  %v6343_v56 = vld [vmem:[%s9242_s1 + $0x818] ss:$24 sps:$4 sm:$0xff]  }
 0x1a6   :  { %v6440_v57 = vpop.eup %6439  ;;  %6451 = vtanh.f32 %v5300_v55  ;;  %v2877_v34 = vpop.f32.mrb[40].mxu0  ;;  %3919 = vmatprep.subr.bf16.mxu0 %v6336_v53  ;;  %v5301_v16 = vadd.f32 %v2684_v59, %v8111_v5  ;;  %v6346_v53 = vld [vmem:[%s9242_s1 + $0x820] ss:$24 sps:$4 sm:$0xff]   ;;  %v6351_v62 = vld [vmem:[%s9242_s1 + $0x84c] ss:$24 sps:$4 sm:$0xff]  }
 0x1a7   :  { %v6442_v13 = vpop.eup %6441  ;;  %v2686_v42 = vpop.f32.mrb[41].mxu1  ;;  %v4415_v26 = vmul.f32 %v6440_v57, %v8150_v39  ;;  %v6354_v30 = vld [vmem:[%s9242_s1 + $0x854] ss:$24 sps:$4 sm:$0xff]  }
 0x1a8   :  { %v2879_v44 = vpop.f32.mrb[41].mxu0  ;;  %v6444_v17 = vpop.eup %6443  ;;  %v5303_v61 = vadd.f32 %v2686_v42, %v8115_v28  ;;  %v4420_v10 = vmul.f32 %v6442_v13, %v8148_v6  ;;  %v5302_v49 = vadd.f32 %v5301_v16, %v2877_v34  ;;  %3341 = vmatpush1.bf16.msra.mxu1 %v6331_v22 }
 0x1a9   :  { %v2688_v47 = vpop.f32.mrb[42].mxu1  ;;  %v2881_v21 = vpop.f32.mrb[42].mxu0  ;;  %3920 = vmatpush1.bf16.msra.mxu0 %v6334_v0  ;;  %v8458_v54 = vadd.f32 %v4415_v26, %v4414_v38  ;;  %3342 = vmatprep.subr.bf16.mxu1 %v6339_v36  ;;  %v4421_v58 = vmul.f32 %v6444_v17, %v8150_v39 }
 0x1aa   :  { %v5305_v20 = vadd.f32 %v2688_v47, %v8111_v5  ;;  %v2690_v40 = vpop.f32.mrb[43].mxu1  ;;  %v2883_v48 = vpop.f32.mrb[43].mxu0  ;;  %v5304_v12 = vadd.f32 %v5303_v61, %v2879_v44  ;;  %3921 = vmatprep.subr.bf16.mxu0 %v6342_v24  ;;  %6453 = vtanh.f32 %v5302_v49  ;;  %3212 = vmatmul.mubr.bf16.gmra.mrb[84].mxu1 %v6800_v60  ;;  %v6349_v47 = vld [vmem:[%s9242_s1 + $0x848] ss:$24 sps:$4 sm:$0xff]  }
 0x1ab   :  { %v5307_v23 = vadd.f32 %v2690_v40, %v8115_v28  ;;  %3791 = vmatmul.mubr.bf16.gmra.mrb[84].mxu0 %v6800_v60  ;;  %3221 = vmatprep.mubr.bf16.mxu1 %v6801_v29  ;;  %v8474_v31 = vadd.f32 %v4421_v58, %v4420_v10  ;;  %v6357_v40 = vld [vmem:[%s9242_s1 + $0x87c] ss:$24 sps:$4 sm:$0xff]   ;;  %v6358_v60 = vld [vmem:[%s9242_s1 + $0x880] ss:$24 sps:$4 sm:$0xff]  }
 0x1ac   :  { %v5306_v37 = vadd.f32 %v5305_v20, %v2881_v21  ;;  %6455 = vtanh.f32 %v5304_v12  ;;  %3800 = vmatprep.mubr.bf16.mxu0 %v6801_v29  ;;  %v6446_v43 = vpop.eup %6445  ;;  %3343 = vmatpush1.bf16.msra.mxu1 %v6337_v50  ;;  %v6352_v21 = vld [vmem:[%s9242_s1 + $0x850] ss:$24 sps:$4 sm:$0xff]  }
 0x1ad   :  { %v5308_v8 = vadd.f32 %v5307_v23, %v2883_v48  ;;  %3922 = vmatpush1.bf16.msra.mxu0 %v6340_v52  ;;  %v2694_v27 = vpop.f32.mrb[44].mxu1  ;;  %3344 = vmatprep.subr.bf16.mxu1 %v6345_v25  ;;  %v4426_v22 = vmul.f32 %v6446_v43, %v8148_v6  ;;  %v6360_v48 = vld [vmem:[%s9242_s1 + $0x884] ss:$24 sps:$4 sm:$0xff]   ;;  %v6802_v23 = vld [vmem:[%s9243_s0 + $0x128] ss:$24 sps:$4 sm:$0xff]  }
 0x1ae   :  { %6457 = vtanh.f32 %v5306_v37  ;;  %v6448_v7 = vpop.eup %6447  ;;  %v2887_v55 = vpop.f32.mrb[44].mxu0  ;;  %3923 = vmatprep.subr.bf16.mxu0 %v6348_v35  ;;  %v5309_v57 = vadd.f32 %v2694_v27, %v8111_v5  ;;  %v6803_v25 = vld [vmem:[%s9243_s0 + $0x15c] ss:$24 sps:$4 sm:$0xff]   ;;  %v6355_v37 = vld [vmem:[%s9242_s1 + $0x878] ss:$24 sps:$4 sm:$0xff]  }
 0x1af   :  { %6459 = vtanh.f32 %v5308_v8  ;;  %v6450_v0 = vpop.eup %6449  ;;  %v2696_v59 = vpop.f32.mrb[45].mxu1  ;;  %v4427_v36 = vmul.f32 %v6448_v7, %v8150_v39 }
 0x1b0   :  { %v2889_v34 = vpop.f32.mrb[45].mxu0  ;;  %v6452_v24 = vpop.eup %6451  ;;  %v5311_v38 = vadd.f32 %v2696_v59, %v8115_v28  ;;  %v4432_v42 = vmul.f32 %v6450_v0, %v8148_v6  ;;  %v5310_v26 = vadd.f32 %v5309_v57, %v2887_v55  ;;  %3345 = vmatpush1.bf16.msra.mxu1 %v6343_v56  ;;  %v6363_v56 = vld [vmem:[%s9242_s1 + $0x8ac] ss:$24 sps:$4 sm:$0xff]  }
 0x1b1   :  { %v2698_v13 = vpop.f32.mrb[46].mxu1  ;;  %v2891_v16 = vpop.f32.mrb[46].mxu0  ;;  %3924 = vmatpush1.bf16.msra.mxu0 %v6346_v53  ;;  %v8500_v10 = vadd.f32 %v4427_v36, %v4426_v22  ;;  %3346 = vmatprep.subr.bf16.mxu1 %v6351_v62  ;;  %v4433_v50 = vmul.f32 %v6452_v24, %v8150_v39  ;;  %v6366_v53 = vld [vmem:[%s9242_s1 + $0x8b4] ss:$24 sps:$4 sm:$0xff]  }
 0x1b2   :  { %v5313_v44 = vadd.f32 %v2698_v13, %v8111_v5  ;;  %v2700_v17 = vpop.f32.mrb[47].mxu1  ;;  %v2893_v61 = vpop.f32.mrb[47].mxu0  ;;  %v5312_v49 = vadd.f32 %v5311_v38, %v2889_v34  ;;  %3925 = vmatprep.subr.bf16.mxu0 %v6354_v30  ;;  %6461 = vtanh.f32 %v5310_v26  ;;  %3222 = vmatmul.mubr.bf16.gmra.mrb[88].mxu1 %v6802_v23 }
 0x1b3   :  { %v5315_v20 = vadd.f32 %v2700_v17, %v8115_v28  ;;  %3801 = vmatmul.mubr.bf16.gmra.mrb[88].mxu0 %v6802_v23  ;;  %3231 = vmatprep.mubr.bf16.mxu1 %v6803_v25  ;;  %v8516_v35 = vadd.f32 %v4433_v50, %v4432_v42  ;;  %v6361_v42 = vld [vmem:[%s9242_s1 + $0x8a8] ss:$24 sps:$4 sm:$0xff]   ;;  %v6805_v50 = vld [vmem:[%s9243_s0 + $0x18c] ss:$24 sps:$4 sm:$0xff]  }
 0x1b4   :  { %v5314_v52 = vadd.f32 %v5313_v44, %v2891_v16  ;;  %6463 = vtanh.f32 %v5312_v49  ;;  %3810 = vmatprep.mubr.bf16.mxu0 %v6803_v25  ;;  %v6454_v58 = vpop.eup %6453  ;;  %3347 = vmatpush1.bf16.msra.mxu1 %v6349_v47  ;;  %v6364_v44 = vld [vmem:[%s9242_s1 + $0x8b0] ss:$24 sps:$4 sm:$0xff]   ;;  %v6369_v47 = vld [vmem:[%s9242_s1 + $0x8dc] ss:$24 sps:$4 sm:$0xff]   ;;  %v6370_v25 = vld [vmem:[%s9242_s1 + $0x8e0] ss:$24 sps:$4 sm:$0xff]  }
 0x1b5   :  { %v5316_v12 = vadd.f32 %v5315_v20, %v2893_v61  ;;  %3926 = vmatpush1.bf16.msra.mxu0 %v6352_v21  ;;  %v2704_v29 = vpop.f32.mrb[48].mxu1  ;;  %3348 = vmatprep.subr.bf16.mxu1 %v6357_v40  ;;  %v4438_v7 = vmul.f32 %v6454_v58, %v8148_v6  ;;  %v6372_v21 = vld [vmem:[%s9242_s1 + $0x8e4] ss:$24 sps:$4 sm:$0xff]   ;;  %v6804_v40 = vld [vmem:[%s9243_s0 + $0x158] ss:$24 sps:$4 sm:$0xff]  }
 0x1b6   :  { %6465 = vtanh.f32 %v5314_v52  ;;  %v6456_v8 = vpop.eup %6455  ;;  %v2897_v43 = vpop.f32.mrb[48].mxu0  ;;  %3927 = vmatprep.subr.bf16.mxu0 %v6360_v48  ;;  %v5317_v55 = vadd.f32 %v2704_v29, %v8111_v5 }
 0x1b7   :  { %6467 = vtanh.f32 %v5316_v12  ;;  %v2706_v62 = vpop.f32.mrb[49].mxu1  ;;  %v2899_v30 = vpop.f32.mrb[49].mxu0  ;;  %v4439_v22 = vmul.f32 %v6456_v8, %v8150_v39  ;;  %v6367_v12 = vld [vmem:[%s9242_s1 + $0x8d8] ss:$24 sps:$4 sm:$0xff]  }
 0x1b8   :  { %v6458_v27 = vpop.eup %6457  ;;  %v5319_v57 = vadd.f32 %v2706_v62, %v8115_v28  ;;  %v2708_v59 = vpop.f32.mrb[50].mxu1  ;;  %v5318_v38 = vadd.f32 %v5317_v55, %v2897_v43  ;;  %3349 = vmatpush1.bf16.msra.mxu1 %v6355_v37 }
 0x1b9   :  { %v6460_v0 = vpop.eup %6459  ;;  %v2901_v34 = vpop.f32.mrb[50].mxu0  ;;  %v4444_v36 = vmul.f32 %v6458_v27, %v8148_v6  ;;  %v5321_v24 = vadd.f32 %v2708_v59, %v8111_v5  ;;  %3928 = vmatpush1.bf16.msra.mxu0 %v6358_v60  ;;  %v8542_v26 = vadd.f32 %v4439_v22, %v4438_v7  ;;  %3350 = vmatprep.subr.bf16.mxu1 %v6363_v56 }
 0x1ba   :  { %v2710_v13 = vpop.f32.mrb[51].mxu1  ;;  %v2903_v16 = vpop.f32.mrb[51].mxu0  ;;  %v5320_v61 = vadd.f32 %v5319_v57, %v2899_v30  ;;  %3929 = vmatprep.subr.bf16.mxu0 %v6366_v53  ;;  %v4445_v20 = vmul.f32 %v6460_v0, %v8150_v39  ;;  %6469 = vtanh.f32 %v5318_v38  ;;  %3232 = vmatmul.mubr.bf16.gmra.mrb[92].mxu1 %v6804_v40 }
 0x1bb   :  { %v5323_v17 = vadd.f32 %v2710_v13, %v8115_v28  ;;  %v5322_v49 = vadd.f32 %v5321_v24, %v2901_v34  ;;  %3811 = vmatmul.mubr.bf16.gmra.mrb[92].mxu0 %v6804_v40  ;;  %3241 = vmatprep.mubr.bf16.mxu1 %v6805_v50 }
 0x1bc   :  { %6471 = vtanh.f32 %v5320_v61  ;;  %3820 = vmatprep.mubr.bf16.mxu0 %v6805_v50  ;;  %v8558_v52 = vadd.f32 %v4445_v20, %v4444_v36  ;;  %v6462_v23 = vpop.eup %6461  ;;  %3351 = vmatpush1.bf16.msra.mxu1 %v6361_v42  ;;  %v6806_v42 = vld [vmem:[%s9243_s0 + $0x188] ss:$24 sps:$4 sm:$0xff]  }
 0x1bd   :  { %v5324_v48 = vadd.f32 %v5323_v17, %v2903_v16  ;;  %6473 = vtanh.f32 %v5322_v49  ;;  %3930 = vmatpush1.bf16.msra.mxu0 %v6364_v44  ;;  %v2714_v37 = vpop.f32.mrb[52].mxu1  ;;  %3352 = vmatprep.subr.bf16.mxu1 %v6369_v47  ;;  %v4450_v8 = vmul.f32 %v6462_v23, %v8148_v6  ;;  %v6807_v17 = vld [vmem:[%s9243_s0 + $0x1bc] ss:$24 sps:$4 sm:$0xff]  }
 0x1be   :  { %v6464_v58 = vpop.eup %6463  ;;  %v2907_v60 = vpop.f32.mrb[52].mxu0  ;;  %3931 = vmatprep.subr.bf16.mxu0 %v6372_v21  ;;  %v5325_v43 = vadd.f32 %v2714_v37, %v8111_v5 }
 0x1bf   :  { %6475 = vtanh.f32 %v5324_v48  ;;  %v2716_v56 = vpop.f32.mrb[53].mxu1  ;;  %v2909_v53 = vpop.f32.mrb[53].mxu0  ;;  %v4451_v7 = vmul.f32 %v6464_v58, %v8150_v39 }
 0x1c0   :  { %v6466_v29 = vpop.eup %6465  ;;  %v5327_v55 = vadd.f32 %v2716_v56, %v8115_v28  ;;  %v2718_v62 = vpop.f32.mrb[54].mxu1  ;;  %v5326_v57 = vadd.f32 %v5325_v43, %v2907_v60  ;;  %3353 = vmatpush1.bf16.msra.mxu1 %v6367_v12 }
 0x1c1   :  { %v6468_v27 = vpop.eup %6467  ;;  %v2911_v30 = vpop.f32.mrb[54].mxu0  ;;  %v4456_v22 = vmul.f32 %v6466_v29, %v8148_v6  ;;  %v5329_v0 = vadd.f32 %v2718_v62, %v8111_v5  ;;  %3932 = vmatpush1.bf16.msra.mxu0 %v6370_v25  ;;  %v8572_v36 = vadd.f32 %v4451_v7, %v4450_v8 }
 0x1c2   :  { %v2720_v59 = vpop.f32.mrb[55].mxu1  ;;  %v2913_v34 = vpop.f32.mrb[55].mxu0  ;;  %v5328_v38 = vadd.f32 %v5327_v55, %v2909_v53  ;;  %v4457_v13 = vmul.f32 %v6468_v27, %v8150_v39  ;;  %6477 = vtanh.f32 %v5326_v57  ;;  %3242 = vmatmul.mubr.bf16.gmra.mrb[96].mxu1 %v6806_v42 }
 0x1c3   :  { %v5331_v24 = vadd.f32 %v2720_v59, %v8115_v28  ;;  %v5330_v16 = vadd.f32 %v5329_v0, %v2911_v30  ;;  %3821 = vmatmul.mubr.bf16.gmra.mrb[96].mxu0 %v6806_v42  ;;  %3251 = vmatprep.mubr.bf16.mxu1 %v6807_v17  ;;  %v6808_v0 = vld [vmem:[%s9243_s0 + $0x1b8] ss:$24 sps:$4 sm:$0xff]  }
 0x1c4   :  { %6479 = vtanh.f32 %v5328_v38  ;;  %3830 = vmatprep.mubr.bf16.mxu0 %v6807_v17  ;;  %v8582_v61 = vadd.f32 %v4457_v13, %v4456_v22  ;;  %v6470_v47 = vpop.eup %6469 }
 0x1c5   :  { %v5332_v44 = vadd.f32 %v5331_v24, %v2913_v34  ;;  %6481 = vtanh.f32 %v5330_v16  ;;  %v2724_v20 = vpop.f32.mrb[56].mxu1  ;;  %v4462_v40 = vmul.f32 %v6470_v47, %v8148_v6  ;;  %v6809_v34 = vld [vmem:[%s9243_s0 + $0x1ec] ss:$24 sps:$4 sm:$0xff]  }
 0x1c6   :  { %v6472_v21 = vpop.eup %6471  ;;  %v2917_v49 = vpop.f32.mrb[56].mxu0  ;;  %v5333_v50 = vadd.f32 %v2724_v20, %v8111_v5 }
 0x1c7   :  { %6483 = vtanh.f32 %v5332_v44  ;;  %v6474_v48 = vpop.eup %6473  ;;  %v2726_v23 = vpop.f32.mrb[57].mxu1  ;;  %v4463_v25 = vmul.f32 %v6472_v21, %v8150_v39 }
 0x1c8   :  { %v2919_v12 = vpop.f32.mrb[57].mxu0  ;;  %v5335_v37 = vadd.f32 %v2726_v23, %v8115_v28  ;;  %v2728_v60 = vpop.f32.mrb[58].mxu1  ;;  %v4468_v29 = vmul.f32 %v6474_v48, %v8148_v6  ;;  %v5334_v56 = vadd.f32 %v5333_v50, %v2917_v49 }
 0x1c9   :  { %v6476_v58 = vpop.eup %6475  ;;  %v2921_v8 = vpop.f32.mrb[58].mxu0  ;;  %v5337_v43 = vadd.f32 %v2728_v60, %v8111_v5  ;;  %v8590_v27 = vadd.f32 %v4463_v25, %v4462_v40 }
 0x1ca   :  { %v2730_v53 = vpop.f32.mrb[59].mxu1  ;;  %v2923_v7 = vpop.f32.mrb[59].mxu0  ;;  %v4469_v55 = vmul.f32 %v6476_v58, %v8150_v39  ;;  %v5336_v30 = vadd.f32 %v5335_v37, %v2919_v12  ;;  %6485 = vtanh.f32 %v5334_v56  ;;  %3252 = vmatmul.mubr.bf16.gmra.mrb[100].mxu1 %v6808_v0 }
 0x1cb   :  { %v5339_v62 = vadd.f32 %v2730_v53, %v8115_v28  ;;  %v5338_v22 = vadd.f32 %v5337_v43, %v2921_v8  ;;  %3831 = vmatmul.mubr.bf16.gmra.mrb[100].mxu0 %v6808_v0  ;;  %3261 = vmatprep.mubr.bf16.mxu1 %v6809_v34  ;;  %v6810_v53 = vld [vmem:[%s9243_s0 + $0x1e8] ss:$24 sps:$4 sm:$0xff]  }
 0x1cc   :  { %v8597_v57 = vadd.f32 %v4469_v55, %v4468_v29  ;;  %6487 = vtanh.f32 %v5336_v30  ;;  %3840 = vmatprep.mubr.bf16.mxu0 %v6809_v34  ;;  %v6478_v24 = vpop.eup %6477  ;;  %v6811_v55 = vld [vmem:[%s9243_s0 + $0x21c] ss:$24 sps:$4 sm:$0xff]  }
 0x1cd   :  { %v5340_v59 = vadd.f32 %v5339_v62, %v2923_v7  ;;  %6489 = vtanh.f32 %v5338_v22  ;;  %v2734_v13 = vpop.f32.mrb[60].mxu1  ;;  %v4474_v42 = vmul.f32 %v6478_v24, %v8148_v6 }
 0x1ce   :  { %v6480_v38 = vpop.eup %6479  ;;  %v2927_v16 = vpop.f32.mrb[60].mxu0  ;;  %v5341_v17 = vadd.f32 %v2734_v13, %v8111_v5  ;;  %v6812_v13 = vld [vmem:[%s9243_s0 + $0x218] ss:$24 sps:$4 sm:$0xff]  }
 0x1cf   :  { %6491 = vtanh.f32 %v5340_v59  ;;  %v6482_v44 = vpop.eup %6481  ;;  %v2736_v47 = vpop.f32.mrb[61].mxu1  ;;  %v4475_v20 = vmul.f32 %v6480_v38, %v8150_v39 }
 0x1d0   :  { %v2929_v21 = vpop.f32.mrb[61].mxu0  ;;  %v5343_v40 = vadd.f32 %v2736_v47, %v8115_v28  ;;  %v2738_v48 = vpop.f32.mrb[62].mxu1  ;;  %v4480_v23 = vmul.f32 %v6482_v44, %v8148_v6  ;;  %v5342_v25 = vadd.f32 %v5341_v17, %v2927_v16 }
 0x1d1   :  { %v6484_v49 = vpop.eup %6483  ;;  %v2931_v50 = vpop.f32.mrb[62].mxu0  ;;  %v5345_v12 = vadd.f32 %v2738_v48, %v8111_v5  ;;  %v8608_v60 = vadd.f32 %v4475_v20, %v4474_v42  ;;  %v6813_v42 = vld [vmem:[%s9243_s0 + $0x24c] ss:$24 sps:$4 sm:$0xff]  }
 0x1d2   :  { %v2740_v58 = vpop.f32.mrb[63].mxu1  ;;  %v2933_v37 = vpop.f32.mrb[63].mxu0  ;;  %v4481_v8 = vmul.f32 %v6484_v49, %v8150_v39  ;;  %v5344_v43 = vadd.f32 %v5343_v40, %v2929_v21  ;;  %6493 = vtanh.f32 %v5342_v25  ;;  %3262 = vmatmul.mubr.bf16.gmra.mrb[104].mxu1 %v6810_v53  ;;  %v6815_v25 = vld [vmem:[%s9243_s0 + $0x27c] ss:$24 sps:$4 sm:$0xff]  }
 0x1d3   :  { %v5347_v29 = vadd.f32 %v2740_v58, %v8115_v28  ;;  %v5346_v56 = vadd.f32 %v5345_v12, %v2931_v50  ;;  %3841 = vmatmul.mubr.bf16.gmra.mrb[104].mxu0 %v6810_v53  ;;  %3271 = vmatprep.mubr.bf16.mxu1 %v6811_v55  ;;  %v6818_v58 = vld [vmem:[%s9243_s0 + $0x2a8] ss:$24 sps:$4 sm:$0xff]  }
 0x1d4   :  { %v8615_v7 = vadd.f32 %v4481_v8, %v4480_v23  ;;  %6495 = vtanh.f32 %v5344_v43  ;;  %3850 = vmatprep.mubr.bf16.mxu0 %v6811_v55  ;;  %v6486_v28 = vpop.eup %6485  ;;  %v6814_v23 = vld [vmem:[%s9243_s0 + $0x248] ss:$24 sps:$4 sm:$0xff]   ;;  %v6820_v8 = vld [vmem:[%s9243_s0 + $0x2d8] ss:$24 sps:$4 sm:$0xff]  }
 0x1d5   :  { %v5348_v5 = vadd.f32 %v5347_v29, %v2933_v37  ;;  %6497 = vtanh.f32 %v5346_v56  ;;  %v4486_v30 = vmul.f32 %v6486_v28, %v8148_v6  ;;  %v6819_v37 = vld [vmem:[%s9243_s0 + $0x2dc] ss:$24 sps:$4 sm:$0xff]   ;;  %v6822_v43 = vld [vmem:[%s9243_s0 + $0x10] ss:$24 sps:$4 sm:$0xff]   ;;  %v6824_v53 = vld [vmem:[%s9243_s0 + $0x40] ss:$24 sps:$4 sm:$0xff]  }
 0x1d6   :  { %v6488_v62 = vpop.eup %6487  ;;  %v6821_v29 = vld [vmem:[%s9243_s0 + $0x14] ss:$24 sps:$4 sm:$0xff]   ;;  %v6823_v56 = vld [vmem:[%s9243_s0 + $0x44] ss:$24 sps:$4 sm:$0xff]   ;;  %v6826_v55 = vld [vmem:[%s9243_s0 + $0x70] ss:$24 sps:$4 sm:$0xff]  }
 0x1d7   :  { %6499 = vtanh.f32 %v5348_v5  ;;  %v6490_v22 = vpop.eup %6489  ;;  %v4487_v0 = vmul.f32 %v6488_v62, %v8150_v39  ;;  %v6825_v5 = vld [vmem:[%s9243_s0 + $0x74] ss:$24 sps:$4 sm:$0xff]   ;;  %v6827_v28 = vld [vmem:[%s9243_s0 + $0xa4] ss:$24 sps:$4 sm:$0xff]   ;;  %v6828_v62 = vld [vmem:[%s9243_s0 + $0xa0] ss:$24 sps:$4 sm:$0xff]  }
 0x1d8   :  { %v4492_v34 = vmul.f32 %v6490_v22, %v8148_v6  ;;  %v6830_v22 = vld [vmem:[%s9243_s0 + $0xd0] ss:$24 sps:$4 sm:$0xff]  }
 0x1d9   :  { %v6492_v59 = vpop.eup %6491  ;;  %v8623_v24 = vadd.f32 %v4487_v0, %v4486_v30  ;;  %v6829_v30 = vld [vmem:[%s9243_s0 + $0xd4] ss:$24 sps:$4 sm:$0xff]   ;;  %v6831_v0 = vld [vmem:[%s9243_s0 + $0x104] ss:$24 sps:$4 sm:$0xff]  }
 0x1da   :  { %v4493_v38 = vmul.f32 %v6492_v59, %v8150_v39  ;;  %3272 = vmatmul.mubr.bf16.gmra.mrb[108].mxu1 %v6812_v13  ;;  %v6832_v59 = vld [vmem:[%s9243_s0 + $0x100] ss:$24 sps:$4 sm:$0xff]  }
 0x1db   :  { %3851 = vmatmul.mubr.bf16.gmra.mrb[108].mxu0 %v6812_v13  ;;  %3281 = vmatprep.mubr.bf16.mxu1 %v6813_v42  ;;  %v6835_v13 = vld [vmem:[%s9243_s0 + $0x164] ss:$24 sps:$4 sm:$0xff]  }
 0x1dc   :  { %v8629_v16 = vadd.f32 %v4493_v38, %v4492_v34  ;;  %3860 = vmatprep.mubr.bf16.mxu0 %v6813_v42  ;;  %v6494_v44 = vpop.eup %6493  ;;  %v6833_v34 = vld [vmem:[%s9243_s0 + $0x134] ss:$24 sps:$4 sm:$0xff]   ;;  %v6834_v38 = vld [vmem:[%s9243_s0 + $0x130] ss:$24 sps:$4 sm:$0xff]   ;;  %v6836_v42 = vld [vmem:[%s9243_s0 + $0x160] ss:$24 sps:$4 sm:$0xff]  }
 0x1dd   :  { %v4498_v47 = vmul.f32 %v6494_v44, %v8148_v6  ;;  %v6837_v44 = vld [vmem:[%s9243_s0 + $0x194] ss:$24 sps:$4 sm:$0xff]  }
 0x1de   :  { %v6496_v17 = vpop.eup %6495 }
 0x1df   :  { %v6498_v21 = vpop.eup %6497  ;;  %v4499_v20 = vmul.f32 %v6496_v17, %v8150_v39  ;;  %v6838_v17 = vld [vmem:[%s9243_s0 + $0x190] ss:$24 sps:$4 sm:$0xff]  }
 0x1e0   :  { %v4504_v40 = vmul.f32 %v6498_v21, %v8148_v6  ;;  %v6816_v6 = vld [vmem:[%s9243_s0 + $0x278] ss:$24 sps:$4 sm:$0xff]  }
 0x1e1   :  { %v6500_v49 = vpop.eup %6499  ;;  %v8637_v48 = vadd.f32 %v4499_v20, %v4498_v47  ;;  %v6839_v47 = vld [vmem:[%s9243_s0 + $0x1c4] ss:$24 sps:$4 sm:$0xff]   ;;  %v6840_v21 = vld [vmem:[%s9243_s0 + $0x1c0] ss:$24 sps:$4 sm:$0xff]   ;;  %v6841_v20 = vld [vmem:[%s9243_s0 + $0x1f4] ss:$24 sps:$4 sm:$0xff]  }
 0x1e2   :  { %v4505_v50 = vmul.f32 %v6500_v49, %v8150_v39  ;;  %3282 = vmatmul.mubr.bf16.gmra.mrb[112].mxu1 %v6814_v23  ;;  %v6817_v39 = vld [vmem:[%s9243_s0 + $0x2ac] ss:$24 sps:$4 sm:$0xff]   ;;  %v6842_v49 = vld [vmem:[%s9243_s0 + $0x1f0] ss:$24 sps:$4 sm:$0xff]  }
 0x1e3   :  { %3861 = vmatmul.mubr.bf16.gmra.mrb[112].mxu0 %v6814_v23  ;;  %3291 = vmatprep.mubr.bf16.mxu1 %v6815_v25  ;;  %v6845_v23 = vld [vmem:[%s9243_s0 + $0x254] ss:$24 sps:$4 sm:$0xff]  }
 0x1e4   :  { %v8643_v12 = vadd.f32 %v4505_v50, %v4504_v40  ;;  %3870 = vmatprep.mubr.bf16.mxu0 %v6815_v25  ;;  %v6843_v40 = vld [vmem:[%s9243_s0 + $0x224] ss:$24 sps:$4 sm:$0xff]   ;;  %v6844_v50 = vld [vmem:[%s9243_s0 + $0x220] ss:$24 sps:$4 sm:$0xff]   ;;  %v6846_v25 = vld [vmem:[%s9243_s0 + $0x250] ss:$24 sps:$4 sm:$0xff]  }
 0x1e6   :  { %9248 = vst [vmem:[#allocation3_spill] sm:$0xff] %v8643_v12 }
 0x1ea   :  { %3292 = vmatmul.mubr.bf16.gmra.mrb[116].mxu1 %v6816_v6 }
 0x1eb   :  { %3871 = vmatmul.mubr.bf16.gmra.mrb[116].mxu0 %v6816_v6  ;;  %3301 = vmatprep.mubr.bf16.mxu1 %v6817_v39  ;;  %v6847_v6 = vld [vmem:[%s9243_s0 + $0x284] ss:$24 sps:$4 sm:$0xff]  }
 0x1ec   :  { %3880 = vmatprep.mubr.bf16.mxu0 %v6817_v39  ;;  %v6848_v39 = vld [vmem:[%s9243_s0 + $0x280] ss:$24 sps:$4 sm:$0xff]  }
 0x1f2   :  { %3302 = vmatmul.mubr.bf16.gmra.mrb[120].mxu1 %v6818_v58 }
 0x1f3   :  { %3881 = vmatmul.mubr.bf16.gmra.mrb[120].mxu0 %v6818_v58  ;;  %3311 = vmatprep.mubr.bf16.mxu1 %v6819_v37  ;;  %v6849_v58 = vld [vmem:[%s9243_s0 + $0x2b4] ss:$24 sps:$4 sm:$0xff]  }
 0x1f4   :  { %3890 = vmatprep.mubr.bf16.mxu0 %v6819_v37  ;;  %v6850_v37 = vld [vmem:[%s9243_s0 + $0x2b0] ss:$24 sps:$4 sm:$0xff]  }
 0x1fa   :  { %3312 = vmatmul.mubr.bf16.gmra.mrb[124].mxu1 %v6820_v8 }
 0x1fb   :  { %3891 = vmatmul.mubr.bf16.gmra.mrb[124].mxu0 %v6820_v8  ;;  %3354 = vmatprep.mubr.bf16.mxu1 %v6821_v29  ;;  %v6851_v8 = vld [vmem:[%s9243_s0 + $0x2e4] ss:$24 sps:$4 sm:$0xff]  }
 0x1fc   :  { %3933 = vmatprep.mubr.bf16.mxu0 %v6821_v29  ;;  %v6852_v29 = vld [vmem:[%s9243_s0 + $0x2e0] ss:$24 sps:$4 sm:$0xff]  }
 0x202   :  { %3355 = vmatmul.mubr.bf16.vlgmr.msra.gmra.mrb[64].mxu1 %v6822_v43 }
 0x203   :  { %3934 = vmatmul.mubr.bf16.vlgmr.msra.gmra.mrb[64].mxu0 %v6822_v43  ;;  %3364 = vmatprep.mubr.bf16.mxu1 %v6823_v56  ;;  %v417_v43 = vsub.s32 2, %v8090_v14 }
 0x204   :  { %3943 = vmatprep.mubr.bf16.mxu0 %v6823_v56  ;;  %v425_v56 = vsub.s32 4, %v8090_v14 }
 0x20a   :  { %3365 = vmatmul.mubr.bf16.gmra.mrb[68].mxu1 %v6824_v53 }
 0x20b   :  { %3944 = vmatmul.mubr.bf16.gmra.mrb[68].mxu0 %v6824_v53  ;;  %3374 = vmatprep.mubr.bf16.mxu1 %v6825_v5  ;;  %v421_v53 = vsub.s32 3, %v8090_v14 }
 0x20c   :  { %3953 = vmatprep.mubr.bf16.mxu0 %v6825_v5  ;;  %v429_v5 = vsub.s32 5, %v8090_v14 }
 0x212   :  { %3375 = vmatmul.mubr.bf16.gmra.mrb[72].mxu1 %v6826_v55 }
 0x213   :  { %3954 = vmatmul.mubr.bf16.gmra.mrb[72].mxu0 %v6826_v55  ;;  %3384 = vmatprep.mubr.bf16.mxu1 %v6827_v28  ;;  %v6853_v55 = vld [vmem:[%s9244_s2] sm:$0x3f] }
 0x214   :  { %3963 = vmatprep.mubr.bf16.mxu0 %v6827_v28  ;;  %v8766_v28 = vrot.slane %v6853_v55, %v417_v43 }
 0x21a   :  { %3385 = vmatmul.mubr.bf16.gmra.mrb[76].mxu1 %v6828_v62 }
 0x21b   :  { %3964 = vmatmul.mubr.bf16.gmra.mrb[76].mxu0 %v6828_v62  ;;  %3394 = vmatprep.mubr.bf16.mxu1 %v6829_v30  ;;  %v8768_v62 = vrot.slane %v6853_v55, %v425_v56 }
 0x21c   :  { %3973 = vmatprep.mubr.bf16.mxu0 %v6829_v30  ;;  %v8770_v30 = vrot.slane %v6853_v55, %v421_v53 }
 0x222   :  { %3395 = vmatmul.mubr.bf16.gmra.mrb[80].mxu1 %v6830_v22 }
 0x223   :  { %3974 = vmatmul.mubr.bf16.gmra.mrb[80].mxu0 %v6830_v22  ;;  %3404 = vmatprep.mubr.bf16.mxu1 %v6831_v0  ;;  %v8774_v22 = vrot.slane %v6853_v55, %v429_v5 }
 0x224   :  { %3983 = vmatprep.mubr.bf16.mxu0 %v6831_v0 }
 0x22a   :  { %3405 = vmatmul.mubr.bf16.gmra.mrb[84].mxu1 %v6832_v59 }
 0x22b   :  { %3984 = vmatmul.mubr.bf16.gmra.mrb[84].mxu0 %v6832_v59  ;;  %3414 = vmatprep.mubr.bf16.mxu1 %v6833_v34 }
 0x22c   :  { %3993 = vmatprep.mubr.bf16.mxu0 %v6833_v34 }
 0x232   :  { %3415 = vmatmul.mubr.bf16.gmra.mrb[88].mxu1 %v6834_v38 }
 0x233   :  { %3994 = vmatmul.mubr.bf16.gmra.mrb[88].mxu0 %v6834_v38  ;;  %3424 = vmatprep.mubr.bf16.mxu1 %v6835_v13 }
 0x234   :  { %4003 = vmatprep.mubr.bf16.mxu0 %v6835_v13 }
 0x23a   :  { %3425 = vmatmul.mubr.bf16.gmra.mrb[92].mxu1 %v6836_v42 }
 0x23b   :  { %4004 = vmatmul.mubr.bf16.gmra.mrb[92].mxu0 %v6836_v42  ;;  %3434 = vmatprep.mubr.bf16.mxu1 %v6837_v44 }
 0x23c   :  { %4013 = vmatprep.mubr.bf16.mxu0 %v6837_v44 }
 0x242   :  { %3435 = vmatmul.mubr.bf16.gmra.mrb[96].mxu1 %v6838_v17 }
 0x243   :  { %4014 = vmatmul.mubr.bf16.gmra.mrb[96].mxu0 %v6838_v17  ;;  %3444 = vmatprep.mubr.bf16.mxu1 %v6839_v47 }
 0x244   :  { %4023 = vmatprep.mubr.bf16.mxu0 %v6839_v47 }
 0x24a   :  { %3445 = vmatmul.mubr.bf16.gmra.mrb[100].mxu1 %v6840_v21 }
 0x24b   :  { %4024 = vmatmul.mubr.bf16.gmra.mrb[100].mxu0 %v6840_v21  ;;  %3454 = vmatprep.mubr.bf16.mxu1 %v6841_v20 }
 0x24c   :  { %4033 = vmatprep.mubr.bf16.mxu0 %v6841_v20 }
 0x252   :  { %3455 = vmatmul.mubr.bf16.gmra.mrb[104].mxu1 %v6842_v49 }
 0x253   :  { %4034 = vmatmul.mubr.bf16.gmra.mrb[104].mxu0 %v6842_v49  ;;  %3464 = vmatprep.mubr.bf16.mxu1 %v6843_v40 }
 0x254   :  { %4043 = vmatprep.mubr.bf16.mxu0 %v6843_v40 }
 0x25a   :  { %3465 = vmatmul.mubr.bf16.gmra.mrb[108].mxu1 %v6844_v50 }
 0x25b   :  { %4044 = vmatmul.mubr.bf16.gmra.mrb[108].mxu0 %v6844_v50  ;;  %3474 = vmatprep.mubr.bf16.mxu1 %v6845_v23 }
 0x25c   :  { %4053 = vmatprep.mubr.bf16.mxu0 %v6845_v23 }
 0x262   :  { %3475 = vmatmul.mubr.bf16.gmra.mrb[112].mxu1 %v6846_v25 }
 0x263   :  { %4054 = vmatmul.mubr.bf16.gmra.mrb[112].mxu0 %v6846_v25  ;;  %3484 = vmatprep.mubr.bf16.mxu1 %v6847_v6 }
 0x264   :  { %4063 = vmatprep.mubr.bf16.mxu0 %v6847_v6 }
 0x26a   :  { %3485 = vmatmul.mubr.bf16.gmra.mrb[116].mxu1 %v6848_v39 }
 0x26b   :  { %4064 = vmatmul.mubr.bf16.gmra.mrb[116].mxu0 %v6848_v39  ;;  %3494 = vmatprep.mubr.bf16.mxu1 %v6849_v58 }
 0x26c   :  { %4073 = vmatprep.mubr.bf16.mxu0 %v6849_v58 }
 0x272   :  { %3495 = vmatmul.mubr.bf16.gmra.mrb[120].mxu1 %v6850_v37 }
 0x273   :  { %4074 = vmatmul.mubr.bf16.gmra.mrb[120].mxu0 %v6850_v37  ;;  %3504 = vmatprep.mubr.bf16.mxu1 %v6851_v8 }
 0x274   :  { %4083 = vmatprep.mubr.bf16.mxu0 %v6851_v8 }
 0x27a   :  { %3505 = vmatmul.mubr.bf16.gmra.mrb[124].mxu1 %v6852_v29 }
 0x27b   :  { %4084 = vmatmul.mubr.bf16.gmra.mrb[124].mxu0 %v6852_v29 }
 0x2d5   :  { %v3356_v0 = vpop.f32.mrb[64].mxu1 }
 0x2d6   :  { %v3935_v59 = vpop.f32.mrb[64].mxu0  ;;  %v5349_v34 = vadd.f32 %v3356_v0, %v8766_v28  ;;  %v3358_v13 = vpop.f32.mrb[65].mxu1 }
 0x2d7   :  { %v5413_v38 = vadd.f32 %v3935_v59, %v8768_v62  ;;  %v3937_v42 = vpop.f32.mrb[65].mxu0  ;;  %v5350_v44 = vadd.f32 %v3358_v13, %v8770_v30  ;;  %v3360_v47 = vpop.f32.mrb[66].mxu1 }
 0x2d8   :  { %v5414_v17 = vadd.f32 %v3937_v42, %v8774_v22  ;;  %v3939_v21 = vpop.f32.mrb[66].mxu0  ;;  %6501 = vtanh.f32 %v5349_v34  ;;  %v5351_v20 = vadd.f32 %v3360_v47, %v8766_v28  ;;  %v3362_v49 = vpop.f32.mrb[67].mxu1 }
 0x2d9   :  { %v3941_v40 = vpop.f32.mrb[67].mxu0  ;;  %6503 = vtanh.f32 %v5413_v38  ;;  %v5415_v50 = vadd.f32 %v3939_v21, %v8768_v62  ;;  %v5352_v23 = vadd.f32 %v3362_v49, %v8770_v30  ;;  %v6854_v38 = vld [vmem:[%s9245_s3] sm:$0x3f] }
 0x2da   :  { %6505 = vtanh.f32 %v5350_v44  ;;  %v5416_v25 = vadd.f32 %v3941_v40, %v8774_v22  ;;  %v8791_v13 = vrot.slane %v6854_v38, %v417_v43  ;;  %v8795_v21 = vrot.slane %v6854_v38, %v421_v53 }
 0x2db   :  { %6507 = vtanh.f32 %v5414_v17  ;;  %v8798_v40 = vrot.slane %v6854_v38, %v425_v56  ;;  %v8804_v53 = vrot.slane %v6854_v38, %v429_v5 }
 0x2dc   :  { %6509 = vtanh.f32 %v5351_v20 }
 0x2dd   :  { %6511 = vtanh.f32 %v5415_v50  ;;  %v3366_v6 = vpop.f32.mrb[68].mxu1 }
 0x2de   :  { %v3945_v39 = vpop.f32.mrb[68].mxu0  ;;  %6513 = vtanh.f32 %v5352_v23  ;;  %v5353_v58 = vadd.f32 %v3366_v6, %v8766_v28  ;;  %v3368_v8 = vpop.f32.mrb[69].mxu1 }
 0x2df   :  { %v5417_v37 = vadd.f32 %v3945_v39, %v8768_v62  ;;  %v3947_v29 = vpop.f32.mrb[69].mxu0  ;;  %6515 = vtanh.f32 %v5416_v25  ;;  %v5354_v55 = vadd.f32 %v3368_v8, %v8770_v30  ;;  %v3370_v59 = vpop.f32.mrb[70].mxu1 }
 0x2e0   :  { %v5418_v0 = vadd.f32 %v3947_v29, %v8774_v22  ;;  %v3949_v34 = vpop.f32.mrb[70].mxu0  ;;  %6517 = vtanh.f32 %v5353_v58  ;;  %v5355_v42 = vadd.f32 %v3370_v59, %v8766_v28  ;;  %v3372_v44 = vpop.f32.mrb[71].mxu1 }
 0x2e1   :  { %v3951_v17 = vpop.f32.mrb[71].mxu0  ;;  %6519 = vtanh.f32 %v5417_v37  ;;  %v5419_v47 = vadd.f32 %v3949_v34, %v8768_v62  ;;  %v5356_v49 = vadd.f32 %v3372_v44, %v8770_v30 }
 0x2e2   :  { %v6502_v20 = vpop.eup %6501  ;;  %6521 = vtanh.f32 %v5354_v55  ;;  %v5420_v43 = vadd.f32 %v3951_v17, %v8774_v22 }
 0x2e3   :  { %v6504_v50 = vpop.eup %6503  ;;  %6523 = vtanh.f32 %v5418_v0  ;;  %v4320_v23 = vmul.f32 %v6502_v20, %v8791_v13 }
 0x2e4   :  { %v6506_v25 = vpop.eup %6505  ;;  %6525 = vtanh.f32 %v5355_v42  ;;  %v4322_v34 = vmul.f32 %v6504_v50, %v8798_v40 }
 0x2e5   :  { %v6508_v6 = vpop.eup %6507  ;;  %6527 = vtanh.f32 %v5419_v47  ;;  %v3376_v39 = vpop.f32.mrb[72].mxu1  ;;  %v4321_v37 = vmul.f32 %v6506_v25, %v8795_v21  ;;  %v4511_v56 = vadd.f32 %v8167_v63, %v4320_v23 }
 0x2e6   :  { %v3955_v58 = vpop.f32.mrb[72].mxu0  ;;  %v6510_v8 = vpop.eup %6509  ;;  %6529 = vtanh.f32 %v5356_v49  ;;  %v5357_v29 = vadd.f32 %v3376_v39, %v8766_v28 }
 0x2e7   :  { %v5421_v55 = vadd.f32 %v3955_v58, %v8768_v62  ;;  %v3378_v0 = vpop.f32.mrb[73].mxu1  ;;  %v3957_v59 = vpop.f32.mrb[73].mxu0  ;;  %6531 = vtanh.f32 %v5420_v43  ;;  %v4512_v17 = vadd.f32 %v4511_v56, %v4321_v37  ;;  %v4326_v23 = vmul.f32 %v6510_v8, %v8791_v13 }
 0x2e8   :  { %v6512_v42 = vpop.eup %6511  ;;  %v5358_v14 = vadd.f32 %v3378_v0, %v8770_v30  ;;  %v5422_v5 = vadd.f32 %v3957_v59, %v8774_v22  ;;  %v3380_v38 = vpop.f32.mrb[74].mxu1  ;;  %6533 = vtanh.f32 %v5357_v29  ;;  %v4323_v43 = vmul.f32 %v6508_v6, %v8804_v53 }
 0x2e9   :  { %v3959_v44 = vpop.f32.mrb[74].mxu0  ;;  %v6514_v63 = vpop.eup %6513  ;;  %v5359_v47 = vadd.f32 %v3380_v38, %v8766_v28  ;;  %6535 = vtanh.f32 %v5421_v55  ;;  %v4513_v39 = vadd.f32 %v4512_v17, %v4322_v34  ;;  %v4518_v8 = vadd.f32 %v8172_v46, %v4326_v23 }
 0x2ea   :  { %v3382_v20 = vpop.f32.mrb[75].mxu1  ;;  %v3961_v49 = vpop.f32.mrb[75].mxu0  ;;  %v5423_v50 = vadd.f32 %v3959_v44, %v8768_v62  ;;  %6537 = vtanh.f32 %v5358_v14  ;;  %v4327_v56 = vmul.f32 %v6514_v63, %v8795_v21  ;;  %v4328_v6 = vmul.f32 %v6512_v42, %v8798_v40 }
 0x2eb   :  { %v6516_v25 = vpop.eup %6515  ;;  %v5360_v0 = vadd.f32 %v3382_v20, %v8770_v30  ;;  %v5424_v37 = vadd.f32 %v3961_v49, %v8774_v22  ;;  %6539 = vtanh.f32 %v5422_v5  ;;  %v4514_v59 = vadd.f32 %v4513_v39, %v4323_v43 }
 0x2ec   :  { %v6518_v58 = vpop.eup %6517  ;;  %6541 = vtanh.f32 %v5359_v47  ;;  %v4329_v34 = vmul.f32 %v6516_v25, %v8804_v53  ;;  %v4519_v20 = vadd.f32 %v4518_v8, %v4327_v56 }
 0x2ed   :  { %v6520_v29 = vpop.eup %6519  ;;  %v4332_v55 = vmul.f32 %v6518_v58, %v8791_v13  ;;  %6543 = vtanh.f32 %v5423_v50  ;;  %v3386_v44 = vpop.f32.mrb[76].mxu1  ;;  %4515 = vadd.xlane.f32.xlu0 %v4514_v59 }
 0x2ee   :  { %v6522_v38 = vpop.eup %6521  ;;  %v3965_v17 = vpop.f32.mrb[76].mxu0  ;;  %6545 = vtanh.f32 %v5360_v0  ;;  %v5361_v46 = vadd.f32 %v3386_v44, %v8766_v28  ;;  %v4334_v25 = vmul.f32 %v6520_v29, %v8798_v40  ;;  %v4520_v59 = vadd.f32 %v4519_v20, %v4328_v6 }
 0x2ef   :  { %v6524_v14 = vpop.eup %6523  ;;  %v4333_v63 = vmul.f32 %v6522_v38, %v8795_v21  ;;  %v4525_v5 = vadd.f32 %v8189_v18, %v4332_v55  ;;  %v5425_v47 = vadd.f32 %v3965_v17, %v8768_v62  ;;  %v3388_v23 = vpop.f32.mrb[77].mxu1  ;;  %6547 = vtanh.f32 %v5424_v37 }
 0x2f0   :  { %v6526_v49 = vpop.eup %6525  ;;  %v3967_v42 = vpop.f32.mrb[77].mxu0  ;;  %v5362_v50 = vadd.f32 %v3388_v23, %v8770_v30  ;;  %6549 = vtanh.f32 %v5361_v46  ;;  %v4335_v38 = vmul.f32 %v6524_v14, %v8804_v53  ;;  %v4521_v23 = vadd.f32 %v4520_v59, %v4329_v34 }
 0x2f1   :  { %v6528_v43 = vpop.eup %6527  ;;  %v5426_v39 = vadd.f32 %v3967_v42, %v8774_v22  ;;  %v3390_v58 = vpop.f32.mrb[78].mxu1  ;;  %v4526_v44 = vadd.f32 %v4525_v5, %v4333_v63  ;;  %6551 = vtanh.f32 %v5425_v47  ;;  %v4338_v6 = vmul.f32 %v6526_v49, %v8791_v13 }
 0x2f2   :  { %v3969_v56 = vpop.f32.mrb[78].mxu0  ;;  %v6530_v18 = vpop.eup %6529  ;;  %v5363_v0 = vadd.f32 %v3390_v58, %v8766_v28  ;;  %6553 = vtanh.f32 %v5362_v50  ;;  %4522 = vadd.xlane.f32.xlu0 %v4521_v23  ;;  %v4340_v49 = vmul.f32 %v6528_v43, %v8798_v40 }
 0x2f3   :  { %v3392_v8 = vpop.f32.mrb[79].mxu1  ;;  %v3971_v55 = vpop.f32.mrb[79].mxu0  ;;  %v5427_v37 = vadd.f32 %v3969_v56, %v8768_v62  ;;  %v4527_v12 = vadd.f32 %v4526_v44, %v4334_v25  ;;  %v4339_v20 = vmul.f32 %v6530_v18, %v8795_v21  ;;  %6555 = vtanh.f32 %v5426_v39 }
 0x2f4   :  { %v6532_v17 = vpop.eup %6531  ;;  %v5364_v29 = vadd.f32 %v3392_v8, %v8770_v30  ;;  %v5428_v58 = vadd.f32 %v3971_v55, %v8774_v22  ;;  %6557 = vtanh.f32 %v5363_v0  ;;  %v4532_v47 = vadd.f32 %v8194_v45, %v4338_v6 }
 0x2f5   :  { %v6534_v42 = vpop.eup %6533  ;;  %v4528_v5 = vadd.f32 %v4527_v12, %v4335_v38  ;;  %6559 = vtanh.f32 %v5427_v37  ;;  %v3396_v50 = vpop.f32.mrb[80].mxu1 }
 0x2f6   :  { %v6536_v46 = vpop.eup %6535  ;;  %v4344_v14 = vmul.f32 %v6534_v42, %v8791_v13  ;;  %v3975_v25 = vpop.f32.mrb[80].mxu0  ;;  %6561 = vtanh.f32 %v5364_v29  ;;  %v5365_v18 = vadd.f32 %v3396_v50, %v8766_v28  ;;  %v4533_v45 = vadd.f32 %v4532_v47, %v4339_v20 }
 0x2f7   :  { %v6538_v63 = vpop.eup %6537  ;;  %v5429_v8 = vadd.f32 %v3975_v25, %v8768_v62  ;;  %4529 = vadd.xlane.f32.xlu1 %v4528_v5  ;;  %v3398_v12 = vpop.f32.mrb[81].mxu1  ;;  %6563 = vtanh.f32 %v5428_v58 }
 0x2f8   :  { %v6540_v34 = vpop.eup %6539  ;;  %v4345_v56 = vmul.f32 %v6538_v63, %v8795_v21  ;;  %v4539_v39 = vadd.f32 %v8211_v1, %v4344_v14  ;;  %v3977_v0 = vpop.f32.mrb[81].mxu0  ;;  %v5366_v38 = vadd.f32 %v3398_v12, %v8770_v30  ;;  %v4341_v1 = vmul.f32 %v6532_v17, %v8804_v53 }
 0x2f9   :  { %v6542_v59 = vpop.eup %6541  ;;  %v5430_v43 = vadd.f32 %v3977_v0, %v8774_v22  ;;  %v3400_v44 = vpop.f32.mrb[82].mxu1  ;;  %6565 = vtanh.f32 %v5365_v18  ;;  %v4534_v14 = vadd.f32 %v4533_v45, %v4340_v49  ;;  %v4346_v63 = vmul.f32 %v6536_v46, %v8798_v40 }
 0x2fa   :  { %v6544_v55 = vpop.eup %6543  ;;  %v3979_v37 = vpop.f32.mrb[82].mxu0  ;;  %v5367_v29 = vadd.f32 %v3400_v44, %v8766_v28  ;;  %6567 = vtanh.f32 %v5429_v8  ;;  %v4540_v47 = vadd.f32 %v4539_v39, %v4345_v56  ;;  %v4350_v17 = vmul.f32 %v6542_v59, %v8791_v13 }
 0x2fb   :  { %v6546_v23 = vpop.eup %6545  ;;  %v3402_v42 = vpop.f32.mrb[83].mxu1  ;;  %v5431_v58 = vadd.f32 %v3979_v37, %v8768_v62  ;;  %6569 = vtanh.f32 %v5366_v38  ;;  %v4535_v25 = vadd.f32 %v4534_v14, %v4341_v1  ;;  %v4347_v46 = vmul.f32 %v6540_v34, %v8804_v53 }
 0x2fc   :  { %v3981_v6 = vpop.f32.mrb[83].mxu0  ;;  %v6548_v20 = vpop.eup %6547  ;;  %v5368_v5 = vadd.f32 %v3402_v42, %v8770_v30  ;;  %v4351_v18 = vmul.f32 %v6546_v23, %v8795_v21  ;;  %6571 = vtanh.f32 %v5430_v43  ;;  %v4541_v0 = vadd.f32 %v4540_v47, %v4346_v63 }
 0x2fd   :  { %v6550_v50 = vpop.eup %6549  ;;  %v5432_v49 = vadd.f32 %v3981_v6, %v8774_v22  ;;  %6573 = vtanh.f32 %v5367_v29  ;;  %4536 = vadd.xlane.f32.xlu1 %v4535_v25  ;;  %v4546_v45 = vadd.f32 %v8216_v41, %v4350_v17  ;;  %v3406_v39 = vpop.f32.mrb[84].mxu1  ;;  %v4352_v59 = vmul.f32 %v6544_v55, %v8798_v40 }
 0x2fe   :  { %v6552_v12 = vpop.eup %6551  ;;  %6575 = vtanh.f32 %v5431_v58  ;;  %v3985_v38 = vpop.f32.mrb[84].mxu0  ;;  %v4542_v44 = vadd.f32 %v4541_v0, %v4347_v46  ;;  %v4356_v37 = vmul.f32 %v6550_v50, %v8791_v13  ;;  %v5369_v1 = vadd.f32 %v3406_v39, %v8766_v28 }
 0x2ff   :  { %v6554_v8 = vpop.eup %6553  ;;  %6577 = vtanh.f32 %v5368_v5  ;;  %v5433_v34 = vadd.f32 %v3985_v38, %v8768_v62  ;;  %v3408_v23 = vpop.f32.mrb[85].mxu1  ;;  %v4547_v42 = vadd.f32 %v4546_v45, %v4351_v18  ;;  %v4353_v50 = vmul.f32 %v6548_v20, %v8804_v53 }
 0x300   :  { %v6556_v56 = vpop.eup %6555  ;;  %v3987_v29 = vpop.f32.mrb[85].mxu0  ;;  %6579 = vtanh.f32 %v5432_v49  ;;  %4543 = vadd.xlane.f32.xlu0 %v4542_v44  ;;  %v5370_v41 = vadd.f32 %v3408_v23, %v8770_v30  ;;  %v4357_v58 = vmul.f32 %v6554_v8, %v8795_v21  ;;  %v4553_v45 = vadd.f32 %v8233_v3, %v4356_v37 }
 0x301   :  { %v6558_v43 = vpop.eup %6557  ;;  %v5434_v14 = vadd.f32 %v3987_v29, %v8774_v22  ;;  %v3410_v63 = vpop.f32.mrb[86].mxu1  ;;  %6581 = vtanh.f32 %v5369_v1  ;;  %v4548_v25 = vadd.f32 %v4547_v42, %v4352_v59  ;;  %v4358_v59 = vmul.f32 %v6552_v12, %v8798_v40 }
 0x302   :  { %v6560_v6 = vpop.eup %6559  ;;  %v3989_v55 = vpop.f32.mrb[86].mxu0  ;;  %v5371_v5 = vadd.f32 %v3410_v63, %v8766_v28  ;;  %6583 = vtanh.f32 %v5433_v34  ;;  %v4362_v38 = vmul.f32 %v6558_v43, %v8791_v13  ;;  %v4554_v34 = vadd.f32 %v4553_v45, %v4357_v58 }
 0x303   :  { %v6562_v47 = vpop.eup %6561  ;;  %v3412_v17 = vpop.f32.mrb[87].mxu1  ;;  %v5435_v49 = vadd.f32 %v3989_v55, %v8768_v62  ;;  %6585 = vtanh.f32 %v5370_v41  ;;  %v4549_v8 = vadd.f32 %v4548_v25, %v4353_v50  ;;  %v4359_v29 = vmul.f32 %v6556_v56, %v8804_v53 }
 0x304   :  { %v3991_v18 = vpop.f32.mrb[87].mxu0  ;;  %v6564_v46 = vpop.eup %6563  ;;  %v5372_v0 = vadd.f32 %v3412_v17, %v8770_v30  ;;  %v4363_v44 = vmul.f32 %v6562_v47, %v8795_v21  ;;  %6587 = vtanh.f32 %v5434_v14  ;;  %v4364_v3 = vmul.f32 %v6560_v6, %v8798_v40 }
 0x305   :  { %v6566_v39 = vpop.eup %6565  ;;  %v5436_v20 = vadd.f32 %v3991_v18, %v8774_v22  ;;  %6589 = vtanh.f32 %v5371_v5  ;;  %4550 = vadd.xlane.f32.xlu1 %v4549_v8  ;;  %v4560_v37 = vadd.f32 %v8244_v32, %v4362_v38  ;;  %v3416_v43 = vpop.f32.mrb[88].mxu1  ;;  %v4555_v63 = vadd.f32 %v4554_v34, %v4358_v59 }
 0x306   :  { %v6568_v1 = vpop.eup %6567  ;;  %6591 = vtanh.f32 %v5435_v49  ;;  %v3995_v41 = vpop.f32.mrb[88].mxu0  ;;  %v4365_v14 = vmul.f32 %v6564_v46, %v8804_v53  ;;  %v4368_v55 = vmul.f32 %v6566_v39, %v8791_v13  ;;  %v5373_v58 = vadd.f32 %v3416_v43, %v8766_v28 }
 0x307   :  { %v6570_v23 = vpop.eup %6569  ;;  %6593 = vtanh.f32 %v5372_v0  ;;  %v5437_v47 = vadd.f32 %v3995_v41, %v8768_v62  ;;  %v3418_v56 = vpop.f32.mrb[89].mxu1  ;;  %v4561_v6 = vadd.f32 %v4560_v37, %v4363_v44  ;;  %v4556_v32 = vadd.f32 %v4555_v63, %v4359_v29 }
 0x308   :  { %v6572_v42 = vpop.eup %6571  ;;  %v3997_v5 = vpop.f32.mrb[89].mxu0  ;;  %6595 = vtanh.f32 %v5436_v20  ;;  %v5374_v25 = vadd.f32 %v3418_v56, %v8770_v30  ;;  %v4369_v38 = vmul.f32 %v6570_v23, %v8795_v21  ;;  %v4567_v37 = vadd.f32 %v8279_v15, %v4368_v55 }
 0x309   :  { %v6574_v12 = vpop.eup %6573  ;;  %v5438_v17 = vadd.f32 %v3997_v5, %v8774_v22  ;;  %v3420_v18 = vpop.f32.mrb[90].mxu1  ;;  %6597 = vtanh.f32 %v5373_v58  ;;  %v4562_v45 = vadd.f32 %v4561_v6, %v4364_v3  ;;  %4557 = vadd.xlane.f32.xlu0 %v4556_v32  ;;  %v4370_v58 = vmul.f32 %v6568_v1, %v8798_v40 }
 0x30a   :  { %v6576_v50 = vpop.eup %6575  ;;  %v3999_v46 = vpop.f32.mrb[90].mxu0  ;;  %v5375_v0 = vadd.f32 %v3420_v18, %v8766_v28  ;;  %6599 = vtanh.f32 %v5437_v47  ;;  %v4374_v43 = vmul.f32 %v6574_v12, %v8791_v13  ;;  %v4568_v47 = vadd.f32 %v4567_v37, %v4369_v38 }
 0x30b   :  { %v6578_v49 = vpop.eup %6577  ;;  %v3422_v39 = vpop.f32.mrb[91].mxu1  ;;  %v5439_v44 = vadd.f32 %v3999_v46, %v8768_v62  ;;  %6601 = vtanh.f32 %v5374_v25  ;;  %v4563_v29 = vadd.f32 %v4562_v45, %v4365_v14  ;;  %v4371_v55 = vmul.f32 %v6572_v42, %v8804_v53 }
 0x30c   :  { %v4001_v8 = vpop.f32.mrb[91].mxu0  ;;  %v6580_v59 = vpop.eup %6579  ;;  %v5376_v20 = vadd.f32 %v3422_v39, %v8770_v30  ;;  %6603 = vtanh.f32 %v5438_v17  ;;  %v4375_v23 = vmul.f32 %v6578_v49, %v8795_v21  ;;  %v4574_v56 = vadd.f32 %v8290_v33, %v4374_v43 }
 0x30d   :  { %v6582_v34 = vpop.eup %6581  ;;  %v5440_v3 = vadd.f32 %v4001_v8, %v8774_v22  ;;  %6605 = vtanh.f32 %v5375_v0  ;;  %4564 = vadd.xlane.f32.xlu1 %v4563_v29  ;;  %v3426_v14 = vpop.f32.mrb[92].mxu1  ;;  %v4376_v12 = vmul.f32 %v6576_v50, %v8798_v40  ;;  %v4569_v1 = vadd.f32 %v4568_v47, %v4370_v58 }
 0x30e   :  { %v6584_v41 = vpop.eup %6583  ;;  %6607 = vtanh.f32 %v5439_v44  ;;  %v4005_v15 = vpop.f32.mrb[92].mxu0  ;;  %v4380_v6 = vmul.f32 %v6582_v34, %v8791_v13  ;;  %v5377_v25 = vadd.f32 %v3426_v14, %v8766_v28  ;;  %v4575_v50 = vadd.f32 %v4574_v56, %v4375_v23 }
 0x30f   :  { %v6586_v63 = vpop.eup %6585  ;;  %6609 = vtanh.f32 %v5376_v20  ;;  %v5441_v17 = vadd.f32 %v4005_v15, %v8768_v62  ;;  %v3428_v18 = vpop.f32.mrb[93].mxu1  ;;  %v4570_v8 = vadd.f32 %v4569_v1, %v4371_v55  ;;  %v4377_v43 = vmul.f32 %v6580_v59, %v8804_v53 }
 0x310   :  { %v6588_v5 = vpop.eup %6587  ;;  %v4007_v46 = vpop.f32.mrb[93].mxu0  ;;  %6611 = vtanh.f32 %v5440_v3  ;;  %v5378_v49 = vadd.f32 %v3428_v18, %v8770_v30  ;;  %v4381_v34 = vmul.f32 %v6586_v63, %v8795_v21  ;;  %v4576_v3 = vadd.f32 %v4575_v50, %v4376_v12 }
 0x311   :  { %v6590_v32 = vpop.eup %6589  ;;  %v5442_v0 = vadd.f32 %v4007_v46, %v8774_v22  ;;  %v3430_v42 = vpop.f32.mrb[94].mxu1  ;;  %6613 = vtanh.f32 %v5377_v25  ;;  %4571 = vadd.xlane.f32.xlu0 %v4570_v8  ;;  %v4581_v47 = vadd.f32 %v8325_v11, %v4380_v6  ;;  %v4382_v59 = vmul.f32 %v6584_v41, %v8798_v40 }
 0x312   :  { %v6592_v33 = vpop.eup %6591  ;;  %v4009_v45 = vpop.f32.mrb[94].mxu0  ;;  %v5379_v38 = vadd.f32 %v3430_v42, %v8766_v28  ;;  %6615 = vtanh.f32 %v5441_v17  ;;  %v4386_v56 = vmul.f32 %v6590_v32, %v8791_v13  ;;  %v4577_v15 = vadd.f32 %v4576_v3, %v4377_v43 }
 0x313   :  { %v6594_v39 = vpop.eup %6593  ;;  %v3432_v44 = vpop.f32.mrb[95].mxu1  ;;  %v5443_v37 = vadd.f32 %v4009_v45, %v8768_v62  ;;  %6617 = vtanh.f32 %v5378_v49  ;;  %v4582_v12 = vadd.f32 %v4581_v47, %v4381_v34  ;;  %v4383_v32 = vmul.f32 %v6588_v5, %v8804_v53 }
 0x314   :  { %v4011_v20 = vpop.f32.mrb[95].mxu0  ;;  %v6596_v29 = vpop.eup %6595  ;;  %v5380_v23 = vadd.f32 %v3432_v44, %v8770_v30  ;;  %6619 = vtanh.f32 %v5442_v0  ;;  %v4387_v55 = vmul.f32 %v6594_v39, %v8795_v21  ;;  %v4588_v17 = vadd.f32 %v8336_v19, %v4386_v56  ;;  %4578 = vadd.xlane.f32.xlu1 %v4577_v15 }
 0x315   :  { %v6598_v58 = vpop.eup %6597  ;;  %v5444_v63 = vadd.f32 %v4011_v20, %v8774_v22  ;;  %6621 = vtanh.f32 %v5379_v38  ;;  %v3436_v11 = vpop.f32.mrb[96].mxu1  ;;  %v4388_v18 = vmul.f32 %v6592_v33, %v8798_v40  ;;  %v4583_v42 = vadd.f32 %v4582_v12, %v4382_v59 }
 0x316   :  { %v6600_v14 = vpop.eup %6599  ;;  %6623 = vtanh.f32 %v5443_v37  ;;  %v4015_v6 = vpop.f32.mrb[96].mxu0  ;;  %v4392_v46 = vmul.f32 %v6598_v58, %v8791_v13  ;;  %v5381_v0 = vadd.f32 %v3436_v11, %v8766_v28  ;;  %v4589_v33 = vadd.f32 %v4588_v17, %v4387_v55 }
 0x317   :  { %v6602_v25 = vpop.eup %6601  ;;  %6625 = vtanh.f32 %v5380_v23  ;;  %v5445_v41 = vadd.f32 %v4015_v6, %v8768_v62  ;;  %v3438_v45 = vpop.f32.mrb[97].mxu1  ;;  %v4584_v20 = vadd.f32 %v4583_v42, %v4383_v32  ;;  %v4389_v47 = vmul.f32 %v6596_v29, %v8804_v53 }
 0x318   :  { %v6604_v1 = vpop.eup %6603  ;;  %v4017_v19 = vpop.f32.mrb[97].mxu0  ;;  %6627 = vtanh.f32 %v5444_v63  ;;  %v5382_v39 = vadd.f32 %v3438_v45, %v8770_v30  ;;  %v4393_v3 = vmul.f32 %v6602_v25, %v8795_v21  ;;  %v4590_v56 = vadd.f32 %v4589_v33, %v4388_v18 }
 0x319   :  { %v6606_v49 = vpop.eup %6605  ;;  %v5446_v8 = vadd.f32 %v4017_v19, %v8774_v22  ;;  %v3440_v5 = vpop.f32.mrb[98].mxu1  ;;  %6629 = vtanh.f32 %v5381_v0  ;;  %4585 = vadd.xlane.f32.xlu0 %v4584_v20  ;;  %v4595_v55 = vadd.f32 %v8366_v4, %v4392_v46  ;;  %v4394_v29 = vmul.f32 %v6600_v14, %v8798_v40 }
 0x31a   :  { %v6608_v50 = vpop.eup %6607  ;;  %v4019_v38 = vpop.f32.mrb[98].mxu0  ;;  %v5383_v34 = vadd.f32 %v3440_v5, %v8766_v28  ;;  %6631 = vtanh.f32 %v5445_v41  ;;  %v4398_v59 = vmul.f32 %v6606_v49, %v8791_v13  ;;  %v4591_v17 = vadd.f32 %v4590_v56, %v4389_v47 }
 0x31b   :  { %v6610_v44 = vpop.eup %6609  ;;  %v3442_v37 = vpop.f32.mrb[99].mxu1  ;;  %v5447_v23 = vadd.f32 %v4019_v38, %v8768_v62  ;;  %6633 = vtanh.f32 %v5382_v39  ;;  %v4596_v32 = vadd.f32 %v4595_v55, %v4393_v3  ;;  %v4395_v49 = vmul.f32 %v6604_v1, %v8804_v53 }
 0x31c   :  { %v4021_v43 = vpop.f32.mrb[99].mxu0  ;;  %v6612_v58 = vpop.eup %6611  ;;  %v5384_v63 = vadd.f32 %v3442_v37, %v8770_v30  ;;  %6635 = vtanh.f32 %v5446_v8  ;;  %v4399_v11 = vmul.f32 %v6610_v44, %v8795_v21  ;;  %v4602_v18 = vadd.f32 %v8377_v9, %v4398_v59  ;;  %4592 = vadd.xlane.f32.xlu1 %v4591_v17 }
 0x31d   :  { %v6614_v15 = vpop.eup %6613  ;;  %v5448_v25 = vadd.f32 %v4021_v43, %v8774_v22  ;;  %6637 = vtanh.f32 %v5383_v34  ;;  %v3446_v4 = vpop.f32.mrb[100].mxu1  ;;  %v4400_v41 = vmul.f32 %v6608_v50, %v8798_v40  ;;  %v4597_v39 = vadd.f32 %v4596_v32, %v4394_v29 }
 0x31e   :  { %v6616_v12 = vpop.eup %6615  ;;  %6639 = vtanh.f32 %v5447_v23  ;;  %v4025_v46 = vpop.f32.mrb[100].mxu0  ;;  %v4404_v42 = vmul.f32 %v6614_v15, %v8791_v13  ;;  %v5385_v19 = vadd.f32 %v3446_v4, %v8766_v28  ;;  %v4603_v50 = vadd.f32 %v4602_v18, %v4399_v11 }
 0x31f   :  { %v6618_v6 = vpop.eup %6617  ;;  %6641 = vtanh.f32 %v5384_v63  ;;  %v5449_v14 = vadd.f32 %v4025_v46, %v8768_v62  ;;  %v3448_v8 = vpop.f32.mrb[101].mxu1  ;;  %v4598_v34 = vadd.f32 %v4597_v39, %v4395_v49  ;;  %v4401_v15 = vmul.f32 %v6612_v58, %v8804_v53 }
 0x320   :  { %v6620_v0 = vpop.eup %6619  ;;  %v4027_v9 = vpop.f32.mrb[101].mxu0  ;;  %6643 = vtanh.f32 %v5448_v25  ;;  %v5386_v38 = vadd.f32 %v3448_v8, %v8770_v30  ;;  %v4405_v23 = vmul.f32 %v6618_v6, %v8795_v21  ;;  %v4604_v63 = vadd.f32 %v4603_v50, %v4400_v41 }
 0x321   :  { %v6622_v45 = vpop.eup %6621  ;;  %v5450_v33 = vadd.f32 %v4027_v9, %v8774_v22  ;;  %v3450_v1 = vpop.f32.mrb[102].mxu1  ;;  %6645 = vtanh.f32 %v5385_v19  ;;  %4599 = vadd.xlane.f32.xlu0 %v4598_v34  ;;  %v4609_v17 = vadd.f32 %v8408_v2, %v4404_v42  ;;  %v4406_v58 = vmul.f32 %v6616_v12, %v8798_v40 }
 0x322   :  { %v6624_v5 = vpop.eup %6623  ;;  %v4029_v44 = vpop.f32.mrb[102].mxu0  ;;  %v5387_v37 = vadd.f32 %v3450_v1, %v8766_v28  ;;  %6647 = vtanh.f32 %v5449_v14  ;;  %v4410_v25 = vmul.f32 %v6622_v45, %v8791_v13  ;;  %v4605_v29 = vadd.f32 %v4604_v63, %v4401_v15 }
 0x323   :  { %v6626_v20 = vpop.eup %6625  ;;  %v3452_v43 = vpop.f32.mrb[103].mxu1  ;;  %v5451_v56 = vadd.f32 %v4029_v44, %v8768_v62  ;;  %6649 = vtanh.f32 %v5386_v38  ;;  %v4610_v4 = vadd.f32 %v4609_v17, %v4405_v23  ;;  %v4407_v42 = vmul.f32 %v6620_v0, %v8804_v53 }
 0x324   :  { %v4031_v3 = vpop.f32.mrb[103].mxu0  ;;  %v6628_v47 = vpop.eup %6627  ;;  %v5388_v59 = vadd.f32 %v3452_v43, %v8770_v30  ;;  %6651 = vtanh.f32 %v5450_v33  ;;  %v4411_v32 = vmul.f32 %v6626_v20, %v8795_v21  ;;  %v4616_v46 = vadd.f32 %v8419_v51, %v4410_v25  ;;  %4606 = vadd.xlane.f32.xlu1 %v4605_v29 }
 0x325   :  { %v6630_v55 = vpop.eup %6629  ;;  %v5452_v6 = vadd.f32 %v4031_v3, %v8774_v22  ;;  %6653 = vtanh.f32 %v5387_v37  ;;  %v3456_v2 = vpop.f32.mrb[104].mxu1  ;;  %v4412_v45 = vmul.f32 %v6624_v5, %v8798_v40  ;;  %v4611_v8 = vadd.f32 %v4610_v4, %v4406_v58 }
 0x326   :  { %v6632_v11 = vpop.eup %6631  ;;  %6655 = vtanh.f32 %v5451_v56  ;;  %v4035_v41 = vpop.f32.mrb[104].mxu0  ;;  %v4416_v19 = vmul.f32 %v6630_v55, %v8791_v13  ;;  %v5389_v39 = vadd.f32 %v3456_v2, %v8766_v28  ;;  %v4617_v5 = vadd.f32 %v4616_v46, %v4411_v32 }
 0x327   :  { %v6634_v18 = vpop.eup %6633  ;;  %6657 = vtanh.f32 %v5388_v59  ;;  %v5453_v12 = vadd.f32 %v4035_v41, %v8768_v62  ;;  %v3458_v9 = vpop.f32.mrb[105].mxu1  ;;  %v4612_v20 = vadd.f32 %v4611_v8, %v4407_v42  ;;  %v4413_v15 = vmul.f32 %v6628_v47, %v8804_v53 }
 0x328   :  { %v6636_v49 = vpop.eup %6635  ;;  %v4037_v51 = vpop.f32.mrb[105].mxu0  ;;  %6659 = vtanh.f32 %v5452_v6  ;;  %v5390_v33 = vadd.f32 %v3458_v9, %v8770_v30  ;;  %v4417_v3 = vmul.f32 %v6634_v18, %v8795_v21  ;;  %v4618_v63 = vadd.f32 %v4617_v5, %v4412_v45 }
 0x329   :  { %v6638_v14 = vpop.eup %6637  ;;  %v5454_v1 = vadd.f32 %v4037_v51, %v8774_v22  ;;  %v3460_v0 = vpop.f32.mrb[106].mxu1  ;;  %6661 = vtanh.f32 %v5389_v39  ;;  %4613 = vadd.xlane.f32.xlu0 %v4612_v20  ;;  %v4623_v17 = vadd.f32 %v8458_v54, %v4416_v19  ;;  %v4418_v47 = vmul.f32 %v6632_v11, %v8798_v40 }
 0x32a   :  { %v6640_v38 = vpop.eup %6639  ;;  %v4039_v44 = vpop.f32.mrb[106].mxu0  ;;  %v5391_v34 = vadd.f32 %v3460_v0, %v8766_v28  ;;  %6663 = vtanh.f32 %v5453_v12  ;;  %v4422_v25 = vmul.f32 %v6638_v14, %v8791_v13  ;;  %v4619_v6 = vadd.f32 %v4618_v63, %v4413_v15 }
 0x32b   :  { %v6642_v50 = vpop.eup %6641  ;;  %v3462_v37 = vpop.f32.mrb[107].mxu1  ;;  %v5455_v56 = vadd.f32 %v4039_v44, %v8768_v62  ;;  %6665 = vtanh.f32 %v5390_v33  ;;  %v4624_v4 = vadd.f32 %v4623_v17, %v4417_v3  ;;  %v4419_v42 = vmul.f32 %v6636_v49, %v8804_v53 }
 0x32c   :  { %v4041_v43 = vpop.f32.mrb[107].mxu0  ;;  %v6644_v23 = vpop.eup %6643  ;;  %v5392_v59 = vadd.f32 %v3462_v37, %v8770_v30  ;;  %6667 = vtanh.f32 %v5454_v1  ;;  %v4423_v18 = vmul.f32 %v6642_v50, %v8795_v21  ;;  %v4630_v46 = vadd.f32 %v8474_v31, %v4422_v25  ;;  %4620 = vadd.xlane.f32.xlu1 %v4619_v6 }
 0x32d   :  { %v6646_v55 = vpop.eup %6645  ;;  %v5456_v32 = vadd.f32 %v4041_v43, %v8774_v22  ;;  %6669 = vtanh.f32 %v5391_v34  ;;  %v3466_v54 = vpop.f32.mrb[108].mxu1  ;;  %v4424_v45 = vmul.f32 %v6640_v38, %v8798_v40  ;;  %v4625_v12 = vadd.f32 %v4624_v4, %v4418_v47 }
 0x32e   :  { %v6648_v29 = vpop.eup %6647  ;;  %6671 = vtanh.f32 %v5455_v56  ;;  %v4045_v41 = vpop.f32.mrb[108].mxu0  ;;  %v4428_v19 = vmul.f32 %v6646_v55, %v8791_v13  ;;  %v5393_v39 = vadd.f32 %v3466_v54, %v8766_v28  ;;  %v4631_v38 = vadd.f32 %v4630_v46, %v4423_v18 }
 0x32f   :  { %v6650_v58 = vpop.eup %6649  ;;  %6673 = vtanh.f32 %v5392_v59  ;;  %v5457_v11 = vadd.f32 %v4045_v41, %v8768_v62  ;;  %v3468_v8 = vpop.f32.mrb[109].mxu1  ;;  %v4626_v44 = vadd.f32 %v4625_v12, %v4419_v42  ;;  %v4425_v3 = vmul.f32 %v6644_v23, %v8804_v53 }
 0x330   :  { %v6652_v2 = vpop.eup %6651  ;;  %v4047_v31 = vpop.f32.mrb[109].mxu0  ;;  %6675 = vtanh.f32 %v5456_v32  ;;  %v5394_v51 = vadd.f32 %v3468_v8, %v8770_v30  ;;  %v4429_v34 = vmul.f32 %v6650_v58, %v8795_v21  ;;  %v4632_v56 = vadd.f32 %v4631_v38, %v4424_v45 }
 0x331   :  { %v6654_v14 = vpop.eup %6653  ;;  %v5458_v33 = vadd.f32 %v4047_v31, %v8774_v22  ;;  %v3470_v49 = vpop.f32.mrb[110].mxu1  ;;  %6677 = vtanh.f32 %v5393_v39  ;;  %4627 = vadd.xlane.f32.xlu0 %v4626_v44  ;;  %v4637_v55 = vadd.f32 %v8500_v10, %v4428_v19  ;;  %v4430_v23 = vmul.f32 %v6648_v29, %v8798_v40 }
 0x332   :  { %v6656_v9 = vpop.eup %6655  ;;  %v4049_v1 = vpop.f32.mrb[110].mxu0  ;;  %v5395_v5 = vadd.f32 %v3470_v49, %v8766_v28  ;;  %6679 = vtanh.f32 %v5457_v11  ;;  %v4434_v59 = vmul.f32 %v6654_v14, %v8791_v13  ;;  %v4633_v25 = vadd.f32 %v4632_v56, %v4425_v3 }
 0x333   :  { %v6658_v0 = vpop.eup %6657  ;;  %v3472_v50 = vpop.f32.mrb[111].mxu1  ;;  %v5459_v43 = vadd.f32 %v4049_v1, %v8768_v62  ;;  %6681 = vtanh.f32 %v5394_v51  ;;  %v4638_v58 = vadd.f32 %v4637_v55, %v4429_v34  ;;  %v4431_v54 = vmul.f32 %v6652_v2, %v8804_v53 }
 0x334   :  { %v4051_v20 = vpop.f32.mrb[111].mxu0  ;;  %v6660_v37 = vpop.eup %6659  ;;  %v5396_v63 = vadd.f32 %v3472_v50, %v8770_v30  ;;  %6683 = vtanh.f32 %v5458_v33  ;;  %v4435_v32 = vmul.f32 %v6658_v0, %v8795_v21  ;;  %v4644_v47 = vadd.f32 %v8516_v35, %v4434_v59  ;;  %4634 = vadd.xlane.f32.xlu1 %v4633_v25 }
 0x335   :  { %v6662_v15 = vpop.eup %6661  ;;  %v5460_v6 = vadd.f32 %v4051_v20, %v8774_v22  ;;  %6685 = vtanh.f32 %v5395_v5  ;;  %v3476_v10 = vpop.f32.mrb[112].mxu1  ;;  %v4436_v41 = vmul.f32 %v6656_v9, %v8798_v40  ;;  %v4639_v14 = vadd.f32 %v4638_v58, %v4430_v23 }
 0x336   :  { %v6664_v17 = vpop.eup %6663  ;;  %6687 = vtanh.f32 %v5459_v43  ;;  %v4055_v46 = vpop.f32.mrb[112].mxu0  ;;  %v4440_v42 = vmul.f32 %v6662_v15, %v8791_v13  ;;  %v5397_v19 = vadd.f32 %v3476_v10, %v8766_v28  ;;  %v4645_v9 = vadd.f32 %v4644_v47, %v4435_v32 }
 0x337   :  { %v6666_v18 = vpop.eup %6665  ;;  %6689 = vtanh.f32 %v5396_v63  ;;  %v5461_v29 = vadd.f32 %v4055_v46, %v8768_v62  ;;  %v3478_v39 = vpop.f32.mrb[113].mxu1  ;;  %v4640_v33 = vadd.f32 %v4639_v14, %v4431_v54  ;;  %v4437_v50 = vmul.f32 %v6660_v37, %v8804_v53 }
 0x338   :  { %v6668_v4 = vpop.eup %6667  ;;  %v4057_v35 = vpop.f32.mrb[113].mxu0  ;;  %6691 = vtanh.f32 %v5460_v6  ;;  %v5398_v12 = vadd.f32 %v3478_v39, %v8770_v30  ;;  %v4441_v0 = vmul.f32 %v6666_v18, %v8795_v21  ;;  %v4646_v20 = vadd.f32 %v4645_v9, %v4436_v41 }
 0x339   :  { %v6670_v45 = vpop.eup %6669  ;;  %v5462_v8 = vadd.f32 %v4057_v35, %v8774_v22  ;;  %v3480_v2 = vpop.f32.mrb[114].mxu1  ;;  %6693 = vtanh.f32 %v5397_v19  ;;  %4641 = vadd.xlane.f32.xlu0 %v4640_v33  ;;  %v4651_v3 = vadd.f32 %v8542_v26, %v4440_v42  ;;  %v4442_v37 = vmul.f32 %v6664_v17, %v8798_v40 }
 0x33a   :  { %v6672_v11 = vpop.eup %6671  ;;  %v4059_v31 = vpop.f32.mrb[114].mxu0  ;;  %v5399_v49 = vadd.f32 %v3480_v2, %v8766_v28  ;;  %6695 = vtanh.f32 %v5461_v29  ;;  %v4446_v56 = vmul.f32 %v6670_v45, %v8791_v13  ;;  %v4647_v63 = vadd.f32 %v4646_v20, %v4437_v50 }
 0x33b   :  { %v6674_v51 = vpop.eup %6673  ;;  %v3482_v1 = vpop.f32.mrb[115].mxu1  ;;  %v5463_v5 = vadd.f32 %v4059_v31, %v8768_v62  ;;  %6697 = vtanh.f32 %v5398_v12  ;;  %v4652_v6 = vadd.f32 %v4651_v3, %v4441_v0  ;;  %v4443_v58 = vmul.f32 %v6668_v4, %v8804_v53 }
 0x33c   :  { %v4061_v38 = vpop.f32.mrb[115].mxu0  ;;  %v6676_v44 = vpop.eup %6675  ;;  %v5400_v43 = vadd.f32 %v3482_v1, %v8770_v30  ;;  %6699 = vtanh.f32 %v5462_v8  ;;  %v4447_v59 = vmul.f32 %v6674_v51, %v8795_v21  ;;  %v4658_v32 = vadd.f32 %v8558_v52, %v4446_v56  ;;  %4648 = vadd.xlane.f32.xlu1 %v4647_v63 }
 0x33d   :  { %v6678_v34 = vpop.eup %6677  ;;  %v5464_v55 = vadd.f32 %v4061_v38, %v8774_v22  ;;  %6701 = vtanh.f32 %v5399_v49  ;;  %v3486_v26 = vpop.f32.mrb[116].mxu1  ;;  %v4448_v47 = vmul.f32 %v6672_v11, %v8798_v40  ;;  %v4653_v41 = vadd.f32 %v4652_v6, %v4442_v37 }
 0x33e   :  { %v6680_v15 = vpop.eup %6679  ;;  %6703 = vtanh.f32 %v5463_v5  ;;  %v4065_v23 = vpop.f32.mrb[116].mxu0  ;;  %v4452_v10 = vmul.f32 %v6678_v34, %v8791_v13  ;;  %v5401_v54 = vadd.f32 %v3486_v26, %v8766_v28  ;;  %v4659_v39 = vadd.f32 %v4658_v32, %v4447_v59 }
 0x33f   :  { %v6682_v25 = vpop.eup %6681  ;;  %6705 = vtanh.f32 %v5400_v43  ;;  %v5465_v17 = vadd.f32 %v4065_v23, %v8768_v62  ;;  %v3488_v42 = vpop.f32.mrb[117].mxu1  ;;  %v4654_v11 = vadd.f32 %v4653_v41, %v4443_v58  ;;  %v4449_v33 = vmul.f32 %v6676_v44, %v8804_v53 }
 0x340   :  { %v6684_v18 = vpop.eup %6683  ;;  %v4067_v52 = vpop.f32.mrb[117].mxu0  ;;  %6707 = vtanh.f32 %v5464_v55  ;;  %v5402_v19 = vadd.f32 %v3488_v42, %v8770_v30  ;;  %v4453_v31 = vmul.f32 %v6682_v25, %v8795_v21  ;;  %v4660_v49 = vadd.f32 %v4659_v39, %v4448_v47 }
 0x341   :  { %v6686_v46 = vpop.eup %6685  ;;  %v5466_v29 = vadd.f32 %v4067_v52, %v8774_v22  ;;  %v3490_v4 = vpop.f32.mrb[118].mxu1  ;;  %6709 = vtanh.f32 %v5401_v54  ;;  %4655 = vadd.xlane.f32.xlu0 %v4654_v11  ;;  %v4665_v0 = vadd.f32 %v8572_v36, %v4452_v10  ;;  %v4454_v44 = vmul.f32 %v6680_v15, %v8798_v40 }
 0x342   :  { %v6688_v45 = vpop.eup %6687  ;;  %v4069_v14 = vpop.f32.mrb[118].mxu0  ;;  %v5403_v12 = vadd.f32 %v3490_v4, %v8766_v28  ;;  %6711 = vtanh.f32 %v5465_v17  ;;  %v4458_v5 = vmul.f32 %v6686_v46, %v8791_v13  ;;  %v4661_v20 = vadd.f32 %v4660_v49, %v4449_v33 }
 0x343   :  { %v6690_v35 = vpop.eup %6689  ;;  %v3492_v8 = vpop.f32.mrb[119].mxu1  ;;  %v5467_v51 = vadd.f32 %v4069_v14, %v8768_v62  ;;  %6713 = vtanh.f32 %v5402_v19  ;;  %v4666_v56 = vadd.f32 %v4665_v0, %v4453_v31  ;;  %v4455_v25 = vmul.f32 %v6684_v18, %v8804_v53 }
 0x344   :  { %v4071_v2 = vpop.f32.mrb[119].mxu0  ;;  %v6692_v9 = vpop.eup %6691  ;;  %v5404_v38 = vadd.f32 %v3492_v8, %v8770_v30  ;;  %6715 = vtanh.f32 %v5466_v29  ;;  %v4459_v43 = vmul.f32 %v6690_v35, %v8795_v21  ;;  %v4672_v63 = vadd.f32 %v8582_v61, %v4458_v5  ;;  %4662 = vadd.xlane.f32.xlu1 %v4661_v20 }
 0x345   :  { %v6694_v1 = vpop.eup %6693  ;;  %v5468_v34 = vadd.f32 %v4071_v2, %v8774_v22  ;;  %6717 = vtanh.f32 %v5403_v12  ;;  %v3496_v36 = vpop.f32.mrb[120].mxu1  ;;  %v4460_v37 = vmul.f32 %v6688_v45, %v8798_v40  ;;  %v4667_v23 = vadd.f32 %v4666_v56, %v4454_v44 }
 0x346   :  { %v6696_v50 = vpop.eup %6695  ;;  %6719 = vtanh.f32 %v5467_v51  ;;  %v4075_v59 = vpop.f32.mrb[120].mxu0  ;;  %v4464_v6 = vmul.f32 %v6694_v1, %v8791_v13  ;;  %v5405_v26 = vadd.f32 %v3496_v36, %v8766_v28  ;;  %v4673_v17 = vadd.f32 %v4672_v63, %v4459_v43 }
 0x347   :  { %v6698_v3 = vpop.eup %6697  ;;  %6721 = vtanh.f32 %v5404_v38  ;;  %v5469_v15 = vadd.f32 %v4075_v59, %v8768_v62  ;;  %v3498_v58 = vpop.f32.mrb[121].mxu1  ;;  %v4668_v42 = vadd.f32 %v4667_v23, %v4455_v25  ;;  %v4461_v39 = vmul.f32 %v6692_v9, %v8804_v53 }
 0x348   :  { %v6700_v55 = vpop.eup %6699  ;;  %v4077_v61 = vpop.f32.mrb[121].mxu0  ;;  %6723 = vtanh.f32 %v5468_v34  ;;  %v5406_v10 = vadd.f32 %v3498_v58, %v8770_v30  ;;  %v4465_v29 = vmul.f32 %v6698_v3, %v8795_v21  ;;  %v4674_v35 = vadd.f32 %v4673_v17, %v4460_v37 }
 0x349   :  { %v6702_v32 = vpop.eup %6701  ;;  %v5470_v46 = vadd.f32 %v4077_v61, %v8774_v22  ;;  %v3500_v18 = vpop.f32.mrb[122].mxu1  ;;  %6725 = vtanh.f32 %v5405_v26  ;;  %4669 = vadd.xlane.f32.xlu0 %v4668_v42  ;;  %v4679_v8 = vadd.f32 %v8590_v27, %v4464_v6  ;;  %v4466_v9 = vmul.f32 %v6696_v50, %v8798_v40 }
 0x34a   :  { %v6704_v47 = vpop.eup %6703  ;;  %v4079_v54 = vpop.f32.mrb[122].mxu0  ;;  %v5407_v52 = vadd.f32 %v3500_v18, %v8766_v28  ;;  %6727 = vtanh.f32 %v5469_v15  ;;  %v4470_v2 = vmul.f32 %v6702_v32, %v8791_v13  ;;  %v4675_v51 = vadd.f32 %v4674_v35, %v4461_v39 }
 0x34b   :  { %v6706_v41 = vpop.eup %6705  ;;  %v3502_v45 = vpop.f32.mrb[123].mxu1  ;;  %v5471_v14 = vadd.f32 %v4079_v54, %v8768_v62  ;;  %6729 = vtanh.f32 %v5406_v10  ;;  %v4680_v38 = vadd.f32 %v4679_v8, %v4465_v29  ;;  %v4467_v34 = vmul.f32 %v6700_v55, %v8804_v53 }
 0x34c   :  { %v4081_v19 = vpop.f32.mrb[123].mxu0  ;;  %v6708_v4 = vpop.eup %6707  ;;  %v5408_v12 = vadd.f32 %v3502_v45, %v8770_v30  ;;  %6731 = vtanh.f32 %v5470_v46  ;;  %v4471_v49 = vmul.f32 %v6706_v41, %v8795_v21  ;;  %v4686_v0 = vadd.f32 %v8597_v57, %v4470_v2  ;;  %4676 = vadd.xlane.f32.xlu1 %v4675_v51 }
 0x34d   :  { %v6710_v11 = vpop.eup %6709  ;;  %v5472_v33 = vadd.f32 %v4081_v19, %v8774_v22  ;;  %6733 = vtanh.f32 %v5407_v52  ;;  %v3506_v27 = vpop.f32.mrb[124].mxu1  ;;  %v4472_v43 = vmul.f32 %v6704_v47, %v8798_v40  ;;  %v4681_v63 = vadd.f32 %v4680_v38, %v4466_v9 }
 0x34e   :  { %v6712_v31 = vpop.eup %6711  ;;  %6735 = vtanh.f32 %v5471_v14  ;;  %v4085_v20 = vpop.f32.mrb[124].mxu0  ;;  %v4476_v3 = vmul.f32 %v6710_v11, %v8791_v13  ;;  %v5409_v56 = vadd.f32 %v3506_v27, %v8766_v28  ;;  %v4687_v32 = vadd.f32 %v4686_v0, %v4471_v49 }
 0x34f   :  { %v6714_v1 = vpop.eup %6713  ;;  %6737 = vtanh.f32 %v5408_v12  ;;  %v5473_v50 = vadd.f32 %v4085_v20, %v8768_v62  ;;  %v3508_v36 = vpop.f32.mrb[125].mxu1  ;;  %v4682_v15 = vadd.f32 %v4681_v63, %v4467_v34  ;;  %v4473_v18 = vmul.f32 %v6708_v4, %v8804_v53 }
 0x350   :  { %v6716_v5 = vpop.eup %6715  ;;  %v4087_v57 = vpop.f32.mrb[125].mxu0  ;;  %6739 = vtanh.f32 %v5472_v33  ;;  %v5410_v25 = vadd.f32 %v3508_v36, %v8770_v30  ;;  %v4477_v47 = vmul.f32 %v6714_v1, %v8795_v21  ;;  %v4688_v54 = vadd.f32 %v4687_v32, %v4472_v43 }
 0x351   :  { %v6718_v44 = vpop.eup %6717  ;;  %v5474_v37 = vadd.f32 %v4087_v57, %v8774_v22  ;;  %v3510_v55 = vpop.f32.mrb[126].mxu1  ;;  %6741 = vtanh.f32 %v5409_v56  ;;  %4683 = vadd.xlane.f32.xlu0 %v4682_v15  ;;  %v4693_v42 = vadd.f32 %v8608_v60, %v4476_v3  ;;  %v4478_v19 = vmul.f32 %v6712_v31, %v8798_v40 }
 0x352   :  { %v6720_v59 = vpop.eup %6719  ;;  %v4089_v6 = vpop.f32.mrb[126].mxu0  ;;  %v5411_v23 = vadd.f32 %v3510_v55, %v8766_v28  ;;  %6743 = vtanh.f32 %v5473_v50  ;;  %v4482_v28 = vmul.f32 %v6718_v44, %v8791_v13  ;;  %v4689_v45 = vadd.f32 %v4688_v54, %v4473_v18  ;;  %v9249_v18 = vld [vmem:[#allocation3_spill] sm:$0xff] }
 0x353   :  { %v6722_v26 = vpop.eup %6721  ;;  %v3512_v58 = vpop.f32.mrb[127].mxu1  ;;  %v5475_v46 = vadd.f32 %v4089_v6, %v8768_v62  ;;  %6745 = vtanh.f32 %v5410_v25  ;;  %v4694_v14 = vadd.f32 %v4693_v42, %v4477_v47  ;;  %v4479_v60 = vmul.f32 %v6716_v5, %v8804_v53 }
 0x354   :  { %v4091_v61 = vpop.f32.mrb[127].mxu0  ;;  %v6724_v10 = vpop.eup %6723  ;;  %v5412_v41 = vadd.f32 %v3512_v58, %v8770_v30  ;;  %6747 = vtanh.f32 %v5474_v37  ;;  %v4483_v29 = vmul.f32 %v6722_v26, %v8795_v21  ;;  %v4700_v39 = vadd.f32 %v8615_v7, %v4482_v28  ;;  %4690 = vadd.xlane.f32.xlu1 %v4689_v45 }
 0x355   :  { %v6726_v17 = vpop.eup %6725  ;;  %6749 = vtanh.f32 %v5411_v23  ;;  %v5476_v4 = vadd.f32 %v4091_v61, %v8774_v22  ;;  %v4695_v8 = vadd.f32 %v4694_v14, %v4478_v19  ;;  %v4484_v2 = vmul.f32 %v6720_v59, %v8798_v40 }
 0x356   :  { %v6728_v52 = vpop.eup %6727  ;;  %6751 = vtanh.f32 %v5475_v46  ;;  %v4488_v30 = vmul.f32 %v6726_v17, %v8791_v13  ;;  %v4701_v31 = vadd.f32 %v4700_v39, %v4483_v29  ;;  %v4485_v1 = vmul.f32 %v6724_v10, %v8804_v53 }
 0x357   :  { %v6730_v62 = vpop.eup %6729  ;;  %6753 = vtanh.f32 %v5412_v41  ;;  %v4696_v49 = vadd.f32 %v4695_v8, %v4479_v60  ;;  %v4490_v0 = vmul.f32 %v6728_v52, %v8798_v40 }
 0x358   :  { %v6732_v35 = vpop.eup %6731  ;;  %v4489_v11 = vmul.f32 %v6730_v62, %v8795_v21  ;;  %v4707_v22 = vadd.f32 %v8623_v24, %v4488_v30  ;;  %6755 = vtanh.f32 %v5476_v4  ;;  %v4702_v9 = vadd.f32 %v4701_v31, %v4484_v2 }
 0x359   :  { %v6734_v12 = vpop.eup %6733  ;;  %4697 = vadd.xlane.f32.xlu0 %v4696_v49  ;;  %v4491_v24 = vmul.f32 %v6732_v35, %v8804_v53 }
 0x35a   :  { %v6736_v51 = vpop.eup %6735  ;;  %v4494_v7 = vmul.f32 %v6734_v12, %v8791_v13  ;;  %v4708_v5 = vadd.f32 %v4707_v22, %v4489_v11  ;;  %v4703_v43 = vadd.f32 %v4702_v9, %v4485_v1 }
 0x35b   :  { %v6738_v33 = vpop.eup %6737  ;;  %v4496_v56 = vmul.f32 %v6736_v51, %v8798_v40 }
 0x35c   :  { %v6740_v38 = vpop.eup %6739  ;;  %v4495_v27 = vmul.f32 %v6738_v33, %v8795_v21  ;;  %v4714_v20 = vadd.f32 %v8629_v16, %v4494_v7  ;;  %v4709_v44 = vadd.f32 %v4708_v5, %v4490_v0  ;;  %4704 = vadd.xlane.f32.xlu1 %v4703_v43 }
 0x35d   :  { %v6742_v34 = vpop.eup %6741  ;;  %v4497_v57 = vmul.f32 %v6740_v38, %v8804_v53 }
 0x35e   :  { %v6744_v3 = vpop.eup %6743  ;;  %v4715_v50 = vadd.f32 %v4714_v20, %v4495_v27  ;;  %v4500_v63 = vmul.f32 %v6742_v34, %v8791_v13  ;;  %v4710_v25 = vadd.f32 %v4709_v44, %v4491_v24 }
 0x35f   :  { %v6746_v36 = vpop.eup %6745  ;;  %v4502_v15 = vmul.f32 %v6744_v3, %v8798_v40 }
 0x360   :  { %v6748_v59 = vpop.eup %6747  ;;  %v4716_v37 = vadd.f32 %v4715_v50, %v4496_v56  ;;  %v4501_v16 = vmul.f32 %v6746_v36, %v8795_v21  ;;  %v4721_v55 = vadd.f32 %v8637_v48, %v4500_v63  ;;  %4711 = vadd.xlane.f32.xlu0 %v4710_v25 }
 0x361   :  { %v6750_v6 = vpop.eup %6749  ;;  %v4503_v47 = vmul.f32 %v6748_v59, %v8804_v53 }
 0x362   :  { %v6752_v32 = vpop.eup %6751  ;;  %v4717_v26 = vadd.f32 %v4716_v37, %v4497_v57  ;;  %v4722_v23 = vadd.f32 %v4721_v55, %v4501_v16  ;;  %v4506_v58 = vmul.f32 %v6750_v6, %v8791_v13  ;;  %v9080_v13 = vstv %s9246_s4 }
 0x363   :  { %v6754_v61 = vpop.eup %6753  ;;  %v4508_v41 = vmul.f32 %v6752_v32, %v8798_v40 }
 0x364   :  { %4718 = vadd.xlane.f32.xlu1 %v4717_v26  ;;  %v4723_v10 = vadd.f32 %v4722_v23, %v4502_v15  ;;  %v4507_v46 = vmul.f32 %v6754_v61, %v8795_v21  ;;  %v4728_v54 = vadd.f32 %v9249_v18, %v4506_v58  ;;  %v6756_v17 = vpop.eup %6755 }
 0x365   :  { %v4509_v28 = vmul.f32 %v6756_v17, %v8804_v53 }
 0x366   :  { %v4724_v48 = vadd.f32 %v4723_v10, %v4503_v47  ;;  %v4729_v42 = vadd.f32 %v4728_v54, %v4507_v46 }
 0x368   :  { %4725 = vadd.xlane.f32.xlu0 %v4724_v48  ;;  %v4730_v52 = vadd.f32 %v4729_v42, %v4508_v41 }
 0x36a   :  { %v4731_v45 = vadd.f32 %v4730_v52, %v4509_v28 }
 0x36c   :  { %4732 = vadd.xlane.f32.xlu1 %v4731_v45 }
 0x37a   :  { %v4516_v21 = vpop.xlane.xlu0 %4515 }
 0x37b   :  { %v4736_v19 = vadd.f32 %v9080_v13, %v4516_v21 }
 0x37d   :  { %4769 = vst.msk [vmem:[%s9247_s5] sm:$0xff] %vm4768_vm0, %v4736_v19 }
 0x37f   :  { %v4523_v40 = vpop.xlane.xlu0 %4522 }
 0x380   :  { %v4737_v53 = vadd.f32 %v9080_v13, %v4523_v40 }
 0x382   :  { %4770 = vst.msk [vmem:[%s9247_s5 + $0x8] sm:$0xff] %vm4768_vm0, %v4737_v53 }
 0x384   :  { %v4530_v29 = vpop.xlane.xlu1 %4529 }
 0x385   :  { %v4738_v62 = vadd.f32 %v9080_v13, %v4530_v29 }
 0x387   :  { %4771 = vst.msk [vmem:[%s9247_s5 + $0x10] sm:$0xff] %vm4768_vm0, %v4738_v62 }
 0x38a   :  { %v4537_v4 = vpop.xlane.xlu1 %4536 }
 0x38b   :  { %v4739_v14 = vadd.f32 %v9080_v13, %v4537_v4 }
 0x38d   :  { %4772 = vst.msk [vmem:[%s9247_s5 + $0x18] sm:$0xff] %vm4768_vm0, %v4739_v14  ;;  %v4544_v39 = vpop.xlane.xlu0 %4543 }
 0x38e   :  { %v4740_v35 = vadd.f32 %v9080_v13, %v4544_v39 }
 0x390   :  { %4773 = vst.msk [vmem:[%s9247_s5 + $0x20] sm:$0xff] %vm4768_vm0, %v4740_v35 }
 0x392   :  { %v4551_v60 = vpop.xlane.xlu1 %4550 }
 0x393   :  { %v4741_v30 = vadd.f32 %v9080_v13, %v4551_v60 }
 0x395   :  { %4774 = vst.msk [vmem:[%s9247_s5 + $0x28] sm:$0xff] %vm4768_vm0, %v4741_v30 }
 0x396   :  { %v4558_v11 = vpop.xlane.xlu0 %4557 }
 0x397   :  { %v4742_v12 = vadd.f32 %v9080_v13, %v4558_v11 }
 0x399   :  { %4775 = vst.msk [vmem:[%s9247_s5 + $0x30] sm:$0xff] %vm4768_vm0, %v4742_v12 }
 0x39a   :  { %v4565_v8 = vpop.xlane.xlu1 %4564 }
 0x39b   :  { %v4743_v2 = vadd.f32 %v9080_v13, %v4565_v8 }
 0x39d   :  { %4776 = vst.msk [vmem:[%s9247_s5 + $0x38] sm:$0xff] %vm4768_vm0, %v4743_v2 }
 0x39e   :  { %v4572_v31 = vpop.xlane.xlu0 %4571 }
 0x39f   :  { %v4744_v51 = vadd.f32 %v9080_v13, %v4572_v31 }
 0x3a1   :  { %4777 = vst.msk [vmem:[%s9247_s5 + $0x40] sm:$0xff] %vm4768_vm0, %v4744_v51  ;;  %v4579_v22 = vpop.xlane.xlu1 %4578 }
 0x3a2   :  { %v4745_v7 = vadd.f32 %v9080_v13, %v4579_v22 }
 0x3a4   :  { %4778 = vst.msk [vmem:[%s9247_s5 + $0x48] sm:$0xff] %vm4768_vm0, %v4745_v7 }
 0x3a6   :  { %v4586_v33 = vpop.xlane.xlu0 %4585 }
 0x3a7   :  { %v4746_v49 = vadd.f32 %v9080_v13, %v4586_v33 }
 0x3a9   :  { %4779 = vst.msk [vmem:[%s9247_s5 + $0x50] sm:$0xff] %vm4768_vm0, %v4746_v49  ;;  %v4593_v1 = vpop.xlane.xlu1 %4592 }
 0x3aa   :  { %v4747_v9 = vadd.f32 %v9080_v13, %v4593_v1 }
 0x3ac   :  { %4780 = vst.msk [vmem:[%s9247_s5 + $0x58] sm:$0xff] %vm4768_vm0, %v4747_v9 }
 0x3ae   :  { %v4600_v38 = vpop.xlane.xlu0 %4599 }
 0x3af   :  { %v4748_v0 = vadd.f32 %v9080_v13, %v4600_v38 }
 0x3b1   :  { %4781 = vst.msk [vmem:[%s9247_s5 + $0x60] sm:$0xff] %vm4768_vm0, %v4748_v0  ;;  %v4607_v5 = vpop.xlane.xlu1 %4606 }
 0x3b2   :  { %v4749_v27 = vadd.f32 %v9080_v13, %v4607_v5 }
 0x3b4   :  { %4782 = vst.msk [vmem:[%s9247_s5 + $0x68] sm:$0xff] %vm4768_vm0, %v4749_v27 }
 0x3b6   :  { %v4614_v20 = vpop.xlane.xlu0 %4613 }
 0x3b7   :  { %v4750_v34 = vadd.f32 %v9080_v13, %v4614_v20 }
 0x3b9   :  { %4783 = vst.msk [vmem:[%s9247_s5 + $0x70] sm:$0xff] %vm4768_vm0, %v4750_v34  ;;  %v4621_v43 = vpop.xlane.xlu1 %4620 }
 0x3ba   :  { %v4751_v24 = vadd.f32 %v9080_v13, %v4621_v43 }
 0x3bc   :  { %4784 = vst.msk [vmem:[%s9247_s5 + $0x78] sm:$0xff] %vm4768_vm0, %v4751_v24 }
 0x3be   :  { %v4628_v3 = vpop.xlane.xlu0 %4627 }
 0x3bf   :  { %v4752_v44 = vadd.f32 %v9080_v13, %v4628_v3 }
 0x3c1   :  { %4785 = vst.msk [vmem:[%s9247_s5 + $0x80] sm:$0xff] %vm4768_vm0, %v4752_v44  ;;  %v4635_v56 = vpop.xlane.xlu1 %4634 }
 0x3c2   :  { %v4753_v50 = vadd.f32 %v9080_v13, %v4635_v56 }
 0x3c4   :  { %4786 = vst.msk [vmem:[%s9247_s5 + $0x88] sm:$0xff] %vm4768_vm0, %v4753_v50 }
 0x3c6   :  { %v4642_v63 = vpop.xlane.xlu0 %4641 }
 0x3c7   :  { %v4754_v36 = vadd.f32 %v9080_v13, %v4642_v63 }
 0x3c9   :  { %4787 = vst.msk [vmem:[%s9247_s5 + $0x90] sm:$0xff] %vm4768_vm0, %v4754_v36  ;;  %v4649_v57 = vpop.xlane.xlu1 %4648 }
 0x3ca   :  { %v4755_v59 = vadd.f32 %v9080_v13, %v4649_v57 }
 0x3cc   :  { %4788 = vst.msk [vmem:[%s9247_s5 + $0x98] sm:$0xff] %vm4768_vm0, %v4755_v59 }
 0x3ce   :  { %v4656_v25 = vpop.xlane.xlu0 %4655 }
 0x3cf   :  { %v4756_v37 = vadd.f32 %v9080_v13, %v4656_v25 }
 0x3d1   :  { %4789 = vst.msk [vmem:[%s9247_s5 + $0xa0] sm:$0xff] %vm4768_vm0, %v4756_v37  ;;  %v4663_v16 = vpop.xlane.xlu1 %4662 }
 0x3d2   :  { %v4757_v55 = vadd.f32 %v9080_v13, %v4663_v16 }
 0x3d4   :  { %4790 = vst.msk [vmem:[%s9247_s5 + $0xa8] sm:$0xff] %vm4768_vm0, %v4757_v55 }
 0x3d6   :  { %v4670_v6 = vpop.xlane.xlu0 %4669 }
 0x3d7   :  { %v4758_v32 = vadd.f32 %v9080_v13, %v4670_v6 }
 0x3d9   :  { %4791 = vst.msk [vmem:[%s9247_s5 + $0xb0] sm:$0xff] %vm4768_vm0, %v4758_v32  ;;  %v4677_v26 = vpop.xlane.xlu1 %4676 }
 0x3da   :  { %v4759_v15 = vadd.f32 %v9080_v13, %v4677_v26 }
 0x3dc   :  { %4792 = vst.msk [vmem:[%s9247_s5 + $0xb8] sm:$0xff] %vm4768_vm0, %v4759_v15 }
 0x3de   :  { %v4684_v23 = vpop.xlane.xlu0 %4683 }
 0x3df   :  { %v4760_v58 = vadd.f32 %v9080_v13, %v4684_v23 }
 0x3e1   :  { %4793 = vst.msk [vmem:[%s9247_s5 + $0xc0] sm:$0xff] %vm4768_vm0, %v4760_v58  ;;  %v4691_v61 = vpop.xlane.xlu1 %4690 }
 0x3e2   :  { %v4761_v47 = vadd.f32 %v9080_v13, %v4691_v61 }
 0x3e4   :  { %4794 = vst.msk [vmem:[%s9247_s5 + $0xc8] sm:$0xff] %vm4768_vm0, %v4761_v47 }
 0x3e6   :  { %v4698_v10 = vpop.xlane.xlu0 %4697 }
 0x3e7   :  { %v4762_v46 = vadd.f32 %v9080_v13, %v4698_v10 }
 0x3e9   :  { %v4705_v18 = vpop.xlane.xlu1 %4704  ;;  %4795 = vst.msk [vmem:[%s9247_s5 + $0xd0] sm:$0xff] %vm4768_vm0, %v4762_v46 }
 0x3ea   :  { %v4763_v54 = vadd.f32 %v9080_v13, %v4705_v18 }
 0x3ec   :  { %4796 = vst.msk [vmem:[%s9247_s5 + $0xd8] sm:$0xff] %vm4768_vm0, %v4763_v54 }
 0x3ed   :  { %v4712_v17 = vpop.xlane.xlu0 %4711 }
 0x3ee   :  { %v4764_v48 = vadd.f32 %v9080_v13, %v4712_v17 }
 0x3f0   :  { %4797 = vst.msk [vmem:[%s9247_s5 + $0xe0] sm:$0xff] %vm4768_vm0, %v4764_v48 }
 0x3f1   :  { %v4719_v41 = vpop.xlane.xlu1 %4718 }
 0x3f2   :  { %v4765_v42 = vadd.f32 %v9080_v13, %v4719_v41 }
 0x3f4   :  { %4798 = vst.msk [vmem:[%s9247_s5 + $0xe8] sm:$0xff] %vm4768_vm0, %v4765_v42 }
 0x3f5   :  { %v4726_v28 = vpop.xlane.xlu0 %4725 }
 0x3f6   :  { %v4766_v52 = vadd.f32 %v9080_v13, %v4726_v28 }
 0x3f8   :  { %4799 = vst.msk [vmem:[%s9247_s5 + $0xf0] sm:$0xff] %vm4768_vm0, %v4766_v52 }
 0x3f9   :  { %v4733_v45 = vpop.xlane.xlu1 %4732 }
 0x3fa   :  { %v4767_v21 = vadd.f32 %v9080_v13, %v4733_v45 }
 0x3fc   :  { %4800 = vst.msk [vmem:[%s9247_s5 + $0xf8] sm:$0xff] %vm4768_vm0, %v4767_v21 }

</bundles_post_ra>
